<compile_context>
chip_gen: v5e
topology: v5e:2x2
jax: 0.10.0
libtpu: 0.0.40
codegen_flags: <defaults>
</compile_context>

<pallas_src>
import jax
import jax.numpy as jnp
from jax import lax
from jax.experimental import pallas as pl
from jax.experimental.pallas import tpu as pltpu

EXPANSION = 4


def _round_up(v, m):
    return ((v + m - 1) // m) * m


# ----------------------------------------------------------------------------
# Fused kernel: one grid step per image.
# ----------------------------------------------------------------------------
def _make_bottleneck_kernel(H, W):
    def kernel(x_ref, w1_ref, c1_ref, b2_ref, w2_ref, w3_ref, wd_ref, c3_ref,
               o_ref, ypad_ref):
        # x:(H*W,Cin) bf16          w1:(Cin,WP) bf16    c1,b2:(1,WP) f32
        # w2:(9,WP,WP) bf16 (HWIO)  w3:(WP,CP) bf16     wd:(Cin,CP) bf16
        # c3:(1,CP) f32             o:(H*W,CP) f32
        # ypad:(H+2,W+2,WP) bf16 VMEM scratch (persists across grid steps)
        WP = w1_ref.shape[1]
        x = x_ref[...]                                          # (H*W, Cin) bf16

        # ---- stage 1: conv1(1x1) (+ folded b1) -> relu -> + b2 -------------
        y1 = jnp.dot(x, w1_ref[...], preferred_element_type=jnp.float32)
        y1 = jnp.maximum(y1 + c1_ref[...], 0.0) + b2_ref[...]   # (H*W, WP) f32

        # ---- stage 2: zero-padded VMEM stage + 3x3 conv as 9 acc. matmuls --
        # Only the halo border needs zeros (interior fully overwritten below);
        # re-zeroing the border each step is cheap and core/grid-order safe.
        zrow = jnp.zeros((1, W + 2, WP), jnp.bfloat16)
        zcol = jnp.zeros((H + 2, 1, WP), jnp.bfloat16)
        ypad_ref[0:1, :, :] = zrow
        ypad_ref[H + 1:H + 2, :, :] = zrow
        ypad_ref[:, 0:1, :] = zcol
        ypad_ref[:, W + 1:W + 2, :] = zcol
        ypad_ref[1:H + 1, 1:W + 1, :] = y1.astype(jnp.bfloat16).reshape(H, W, WP)

        acc = jnp.zeros((H * W, WP), jnp.float32)
        for t in range(9):                                       # static unroll
            dy, dx = t // 3, t % 3
            tap = ypad_ref[dy:dy + H, dx:dx + W, :].reshape(H * W, WP)
            acc = acc + jnp.dot(tap, w2_ref[t],
                                preferred_element_type=jnp.float32)
        y2 = jnp.maximum(acc, 0.0).astype(jnp.bfloat16)          # (H*W, WP)

        # ---- stage 3 + downsample + residual combine + final relu ----------
        out = jnp.dot(y2, w3_ref[...], preferred_element_type=jnp.float32)
        out = out + jnp.dot(x, wd_ref[...], preferred_element_type=jnp.float32)
        o_ref[...] = jnp.maximum(out + c3_ref[...], 0.0)

    return kernel


def _fused_bottleneck(x_bf, w1p, c1, b2p, w2p, w3p, wdp, c3, H, W):
    N, HW, Cin = x_bf.shape
    WP = w1p.shape[1]
    CP = w3p.shape[1]

    flops = 2 * N * HW * (Cin * WP + 9 * WP * WP + WP * CP + Cin * CP)
    bytes_accessed = (2 * N * HW * Cin + 4 * N * HW * CP +
                      2 * (w1p.size + w2p.size + w3p.size + wdp.size) +
                      4 * (c1.size + b2p.size + c3.size))

    return pl.pallas_call(
        _make_bottleneck_kernel(H, W),
        grid=(N,),
        in_specs=[
            pl.BlockSpec((None, HW, Cin), lambda n: (n, 0, 0)),
            pl.BlockSpec((Cin, WP), lambda n: (0, 0)),       # VMEM-resident
            pl.BlockSpec((1, WP), lambda n: (0, 0)),         # VMEM-resident
            pl.BlockSpec((1, WP), lambda n: (0, 0)),         # VMEM-resident
            pl.BlockSpec((9, WP, WP), lambda n: (0, 0, 0)),  # VMEM-resident
            pl.BlockSpec((WP, CP), lambda n: (0, 0)),        # VMEM-resident
            pl.BlockSpec((Cin, CP), lambda n: (0, 0)),       # VMEM-resident
            pl.BlockSpec((1, CP), lambda n: (0, 0)),         # VMEM-resident
        ],
        out_specs=pl.BlockSpec((None, HW, CP), lambda n: (n, 0, 0)),
        out_shape=jax.ShapeDtypeStruct((N, HW, CP), jnp.float32),
        scratch_shapes=[pltpu.VMEM((H + 2, W + 2, WP), jnp.bfloat16)],
        compiler_params=pltpu.CompilerParams(
            dimension_semantics=("parallel",),
            vmem_limit_bytes=32 * 1024 * 1024),
        cost_estimate=pl.CostEstimate(flops=int(flops), transcendentals=0,
                                      bytes_accessed=int(bytes_accessed)),
    )(x_bf, w1p, c1, b2p, w2p, w3p, wdp, c3)


# ----------------------------------------------------------------------------
# Parameter init (deterministic, mirrors the PyTorch __init__ statistics)
# ----------------------------------------------------------------------------
def init_params(key, inplanes, planes, block_idx, max_block,
                base_width=64, groups=1, drop_conv=0.0):
    width = int(planes * (base_width / 64.0)) * groups
    out_ch = EXPANSION * planes

    multiplier = (block_idx + 1) ** (-(1.0 / 6.0)) * max_block ** (1.0 / 6.0)
    multiplier = multiplier * (1.0 - drop_conv) ** 0.5

    k1, k2, k3, k4 = jax.random.split(key, 4)

    def conv_std(cin, kh, kw):
        return (cin * kh * kw / 2.0) ** (-0.5) * multiplier

    # 1x1 conv -> (Cin, Cout);   3x3 conv -> (kh, kw, Cin, Cout) (HWIO)
    w1 = jax.random.normal(k1, (inplanes, width), jnp.float32) * conv_std(inplanes, 1, 1)
    w2 = jax.random.normal(k2, (3, 3, width, width), jnp.float32) * conv_std(width, 3, 3)
    w3 = jax.random.normal(k3, (width, out_ch), jnp.float32) * conv_std(width, 1, 1)
    # downsample conv: kaiming_normal_(a=1) -> std = sqrt(2 / ((1 + 1) * fan_in))
    wd = jax.random.normal(k4, (inplanes, out_ch), jnp.float32) * (1.0 / inplanes) ** 0.5

    params = dict(
        w1=w1, w2=w2, w3=w3, wd=wd,
        # Bias2DMean offsets (bias - running_mean), zero at init.
        b1=jnp.zeros((inplanes,), jnp.float32),
        b2=jnp.zeros((width,), jnp.float32),
        b3=jnp.zeros((width,), jnp.float32),
        bd=jnp.zeros((inplanes,), jnp.float32),
        scale=jnp.ones((1,), jnp.float32),                                 # self._scale
        residual=jnp.float32(max_block ** (-0.5)),                         # self.residual
        identity=jnp.float32(block_idx ** 0.5 / (block_idx + 1) ** 0.5),   # self.identity
    )
    return params, width, out_ch


# ----------------------------------------------------------------------------
# Full Bottleneck forward (stride=1, groups=1, drop_conv=0 -> dropout identity)
# ----------------------------------------------------------------------------
def bottleneck_forward(x_nchw, params):
    x = jnp.transpose(x_nchw, (0, 2, 3, 1)).astype(jnp.float32)   # NCHW -> NHWC
    N, H, W, Cin = x.shape
    HW = H * W
    width = params["w1"].shape[1]
    out_ch = params["w3"].shape[1]
    WP = _round_up(width, 128)       # lane-dense internal channels
    CP = _round_up(out_ch, 128)      # lane-dense output channels

    rs = (params["residual"] * params["scale"][0]).astype(jnp.float32)
    ident = params["identity"].astype(jnp.float32)

    bf = jnp.bfloat16
    w1p = jnp.pad(params["w1"], ((0, 0), (0, WP - width))).astype(bf)
    w2p = jnp.pad(params["w2"],
                  ((0, 0), (0, 0), (0, WP - width), (0, WP - width)))
    w2p = w2p.reshape(9, WP, WP).astype(bf)
    w3p = jnp.pad(rs * params["w3"], ((0, WP - width), (0, CP - out_ch))).astype(bf)
    wdp = jnp.pad(ident * params["wd"], ((0, 0), (0, CP - out_ch))).astype(bf)

    # per-channel biases folded through the 1x1 convs (exact in real arithmetic);
    # b2 cannot be folded because conv2 zero-pads its (biased) input.
    c1 = jnp.pad(params["b1"] @ params["w1"], (0, WP - width)).reshape(1, WP)
    b2p = jnp.pad(params["b2"], (0, WP - width)).reshape(1, WP)
    c3 = jnp.pad(rs * (params["b3"] @ params["w3"]) +
                 ident * (params["bd"] @ params["wd"]),
                 (0, CP - out_ch)).reshape(1, CP)

    x_bf = x.reshape(N, HW, Cin).astype(bf)            # halves the HBM read of x
    out = _fused_bottleneck(x_bf, w1p, c1, b2p, w2p, w3p, wdp, c3, H, W)

    out = out[..., :out_ch].reshape(N, H, W, out_ch)   # drop lane padding
    return jnp.transpose(out, (0, 3, 1, 2))            # back to NCHW


# ----------------------------------------------------------------------------
# Pure-JAX reference (module-structured math; operand_dtype selects whether the
# matmul operands are bf16 -- matching the kernel's mixed precision -- or f32).
# ----------------------------------------------------------------------------
def reference_forward(x_nchw, params, operand_dtype=jnp.bfloat16):
    dt = operand_dtype
    x = jnp.transpose(x_nchw, (0, 2, 3, 1)).astype(jnp.float32)

    def mm(z, w):
        return jnp.einsum("nhwc,co->nhwo", z.astype(dt), w.astype(dt),
                          preferred_element_type=jnp.float32)

    y = jax.nn.relu(mm(x + params["b1"], params["w1"])) + params["b2"]
    y = lax.conv_general_dilated(y.astype(dt), params["w2"].astype(dt),
                                 (1, 1), ((1, 1), (1, 1)),
                                 dimension_numbers=("NHWC", "HWIO", "NHWC"),
                                 preferred_element_type=jnp.float32)
    y = jax.nn.relu(y)
    rs = params["residual"] * params["scale"][0]
    out = mm(y + params["b3"], rs * params["w3"]) + \
          mm(x + params["bd"], params["identity"] * params["wd"])
    return jnp.transpose(jax.nn.relu(out), (0, 3, 1, 2))


if __name__ == "__main__":
    # Bottleneck(inplanes=8, planes=4, block_idx=1, max_block=3,
    #            stride=1, groups=1, base_width=64, drop_conv=0.0)
    inplanes, planes, block_idx, max_block = 8, 4, 1, 3
    N, Hs, Ws = 2, 16, 16

    key = jax.random.PRNGKey(0)
    kx, kp, kb = jax.random.split(key, 3)
    x = jax.random.normal(kx, (N, inplanes, Hs, Ws), jnp.float32)   # NCHW input

    params, width, out_ch = init_params(kp, inplanes, planes, block_idx, max_block)
    fwd = jax.jit(bottleneck_forward)

    # --- check 1: module init (zero Bias2DMean offsets) vs bf16-operand ref ----
    out = jax.block_until_ready(fwd(x, params))
    ref = reference_forward(x, params)                    # bf16 operands, f32 acc
    assert out.shape == (N, out_ch, Hs, Ws), out.shape
    assert jnp.allclose(out, ref, atol=2e-2, rtol=2e-2), \
        float(jnp.max(jnp.abs(out - ref)))

    # --- check 2: nonzero bias offsets (exercises bias folding) vs f32 ref -----
    kb1, kb2, kb3, kb4 = jax.random.split(kb, 4)
    params_b = dict(params)
    params_b["b1"] = 0.1 * jax.random.normal(kb1, (inplanes,), jnp.float32)
    params_b["b2"] = 0.1 * jax.random.normal(kb2, (width,), jnp.float32)
    params_b["b3"] = 0.1 * jax.random.normal(kb3, (width,), jnp.float32)
    params_b["bd"] = 0.1 * jax.random.normal(kb4, (inplanes,), jnp.float32)
    out_b = jax.block_until_ready(fwd(x, params_b))
    ref_b = reference_forward(x, params_b, operand_dtype=jnp.float32)
    rel = jnp.sqrt(jnp.sum((out_b - ref_b) ** 2)) / jnp.sqrt(jnp.sum(ref_b ** 2))
    assert rel < 5e-2, float(rel)   # bf16 mixed-precision vs f32 reference

    print("KERNEL_OK")
</pallas_src>

<mosaic_0001>
module attributes {stable_mosaic.version = 11 : i64} {
  func.func @kernel(%arg0: i32, %arg1: memref<1x256x8xbf16, #tpu.memory_space<vmem>>, %arg2: memref<8x128xbf16, #tpu.memory_space<vmem>>, %arg3: memref<1x128xf32, #tpu.memory_space<vmem>>, %arg4: memref<1x128xf32, #tpu.memory_space<vmem>>, %arg5: memref<9x128x128xbf16, #tpu.memory_space<vmem>>, %arg6: memref<128x128xbf16, #tpu.memory_space<vmem>>, %arg7: memref<8x128xbf16, #tpu.memory_space<vmem>>, %arg8: memref<1x128xf32, #tpu.memory_space<vmem>>, %arg9: memref<1x256x128xf32, #tpu.memory_space<vmem>>, %arg10: memref<18x18x128xbf16, #tpu.memory_space<vmem>>) attributes {dimension_semantics = [#tpu.dimension_semantics<parallel>], iteration_bounds = array<i64: 2>, scalar_prefetch = 0 : i64, scratch_operands = 1 : i64, tpu.core_type = #tpu.core_type<tc>, window_params = [{transform_indices = @transform_0, window_bounds = array<i64: 1, 256, 8>}, {pipeline_mode = #tpu.pipeline_mode<synchronous>, transform_indices = @transform_1, window_bounds = array<i64: 8, 128>}, {pipeline_mode = #tpu.pipeline_mode<synchronous>, transform_indices = @transform_2, window_bounds = array<i64: 1, 128>}, {pipeline_mode = #tpu.pipeline_mode<synchronous>, transform_indices = @transform_3, window_bounds = array<i64: 1, 128>}, {pipeline_mode = #tpu.pipeline_mode<synchronous>, transform_indices = @transform_4, window_bounds = array<i64: 9, 128, 128>}, {pipeline_mode = #tpu.pipeline_mode<synchronous>, transform_indices = @transform_5, window_bounds = array<i64: 128, 128>}, {pipeline_mode = #tpu.pipeline_mode<synchronous>, transform_indices = @transform_6, window_bounds = array<i64: 8, 128>}, {pipeline_mode = #tpu.pipeline_mode<synchronous>, transform_indices = @transform_7, window_bounds = array<i64: 1, 128>}, {transform_indices = @transform_8, window_bounds = array<i64: 1, 256, 128>}]} {
    %c0 = arith.constant 0 : index
    %c0_0 = arith.constant 0 : index
    %c0_1 = arith.constant 0 : index
    %0 = vector.load %arg1[%c0, %c0_0, %c0_1] : memref<1x256x8xbf16, #tpu.memory_space<vmem>>, vector<1x256x8xbf16>
    %1 = vector.shape_cast %0 : vector<1x256x8xbf16> to vector<256x8xbf16>
    %c0_2 = arith.constant 0 : index
    %c0_3 = arith.constant 0 : index
    %2 = vector.load %arg2[%c0_2, %c0_3] : memref<8x128xbf16, #tpu.memory_space<vmem>>, vector<8x128xbf16>
    %cst = arith.constant dense<0.000000e+00> : vector<256x128xf32>
    %3 = tpu.matmul %1, %2, %cst {dimension_numbers = #tpu.dot_dimension_numbers<[1], [0], [0], [1], [0, 0, 1, 1], [], []>} : vector<256x8xbf16>, vector<8x128xbf16>, vector<256x128xf32> -> vector<256x128xf32>
    %c0_4 = arith.constant 0 : index
    %c0_5 = arith.constant 0 : index
    %4 = vector.load %arg3[%c0_4, %c0_5] : memref<1x128xf32, #tpu.memory_space<vmem>>, vector<1x128xf32>
    %5 = vector.broadcast %4 : vector<1x128xf32> to vector<256x128xf32>
    %6 = arith.addf %3, %5 : vector<256x128xf32>
    %cst_6 = arith.constant 0.000000e+00 : f32
    %7 = vector.broadcast %cst_6 : f32 to vector<256x128xf32>
    %8 = arith.maximumf %6, %7 : vector<256x128xf32>
    %c0_7 = arith.constant 0 : index
    %c0_8 = arith.constant 0 : index
    %9 = vector.load %arg4[%c0_7, %c0_8] : memref<1x128xf32, #tpu.memory_space<vmem>>, vector<1x128xf32>
    %10 = vector.broadcast %9 : vector<1x128xf32> to vector<256x128xf32>
    %11 = arith.addf %8, %10 : vector<256x128xf32>
    %cst_9 = arith.constant 0.000000e+00 : bf16
    %12 = vector.broadcast %cst_9 : bf16 to vector<1x18x128xbf16>
    %cst_10 = arith.constant 0.000000e+00 : bf16
    %13 = vector.broadcast %cst_10 : bf16 to vector<18x1x128xbf16>
    %c0_11 = arith.constant 0 : index
    %c0_12 = arith.constant 0 : index
    %c0_13 = arith.constant 0 : index
    %14 = vector.load %arg10[%c0_11, %c0_12, %c0_13] : memref<18x18x128xbf16, #tpu.memory_space<vmem>>, vector<1x18x128xbf16>
    tpu.vector_store %arg10[%c0_11, %c0_12, %c0_13], %12 {strides = array<i32>} : memref<18x18x128xbf16, #tpu.memory_space<vmem>>, vector<1x18x128xbf16>,
    %c17 = arith.constant 17 : index
    %c0_14 = arith.constant 0 : index
    %c0_15 = arith.constant 0 : index
    %15 = vector.load %arg10[%c17, %c0_14, %c0_15] : memref<18x18x128xbf16, #tpu.memory_space<vmem>>, vector<1x18x128xbf16>
    tpu.vector_store %arg10[%c17, %c0_14, %c0_15], %12 {strides = array<i32>} : memref<18x18x128xbf16, #tpu.memory_space<vmem>>, vector<1x18x128xbf16>,
    %c0_16 = arith.constant 0 : index
    %c0_17 = arith.constant 0 : index
    %c0_18 = arith.constant 0 : index
    %16 = vector.load %arg10[%c0_16, %c0_17, %c0_18] : memref<18x18x128xbf16, #tpu.memory_space<vmem>>, vector<18x1x128xbf16>
    tpu.vector_store %arg10[%c0_16, %c0_17, %c0_18], %13 {strides = array<i32>} : memref<18x18x128xbf16, #tpu.memory_space<vmem>>, vector<18x1x128xbf16>,
    %c0_19 = arith.constant 0 : index
    %c17_20 = arith.constant 17 : index
    %c0_21 = arith.constant 0 : index
    %17 = vector.load %arg10[%c0_19, %c17_20, %c0_21] : memref<18x18x128xbf16, #tpu.memory_space<vmem>>, vector<18x1x128xbf16>
    tpu.vector_store %arg10[%c0_19, %c17_20, %c0_21], %13 {strides = array<i32>} : memref<18x18x128xbf16, #tpu.memory_space<vmem>>, vector<18x1x128xbf16>,
    %18 = arith.truncf %11 : vector<256x128xf32> to vector<256x128xbf16>
    %19 = vector.shape_cast %18 : vector<256x128xbf16> to vector<16x16x128xbf16>
    %c1 = arith.constant 1 : index
    %c1_22 = arith.constant 1 : index
    %c0_23 = arith.constant 0 : index
    %20 = vector.load %arg10[%c1, %c1_22, %c0_23] : memref<18x18x128xbf16, #tpu.memory_space<vmem>>, vector<16x16x128xbf16>
    tpu.vector_store %arg10[%c1, %c1_22, %c0_23], %19 {strides = array<i32>} : memref<18x18x128xbf16, #tpu.memory_space<vmem>>, vector<16x16x128xbf16>,
    %cst_24 = arith.constant 0.000000e+00 : f32
    %21 = vector.broadcast %cst_24 : f32 to vector<256x128xf32>
    %c0_25 = arith.constant 0 : index
    %c0_26 = arith.constant 0 : index
    %c0_27 = arith.constant 0 : index
    %22 = vector.load %arg10[%c0_25, %c0_26, %c0_27] : memref<18x18x128xbf16, #tpu.memory_space<vmem>>, vector<16x16x128xbf16>
    %23 = vector.shape_cast %22 : vector<16x16x128xbf16> to vector<256x128xbf16>
    %c0_28 = arith.constant 0 : index
    %c0_29 = arith.constant 0 : index
    %c0_30 = arith.constant 0 : index
    %24 = vector.load %arg5[%c0_28, %c0_29, %c0_30] : memref<9x128x128xbf16, #tpu.memory_space<vmem>>, vector<1x128x128xbf16>
    %25 = vector.shape_cast %24 : vector<1x128x128xbf16> to vector<128x128xbf16>
    %cst_31 = arith.constant dense<0.000000e+00> : vector<256x128xf32>
    %26 = tpu.matmul %23, %25, %cst_31 {dimension_numbers = #tpu.dot_dimension_numbers<[1], [0], [0], [1], [0, 0, 1, 1], [], []>} : vector<256x128xbf16>, vector<128x128xbf16>, vector<256x128xf32> -> vector<256x128xf32>
    %27 = arith.addf %21, %26 : vector<256x128xf32>
    %c0_32 = arith.constant 0 : index
    %c1_33 = arith.constant 1 : index
    %c0_34 = arith.constant 0 : index
    %28 = vector.load %arg10[%c0_32, %c1_33, %c0_34] : memref<18x18x128xbf16, #tpu.memory_space<vmem>>, vector<16x16x128xbf16>
    %29 = vector.shape_cast %28 : vector<16x16x128xbf16> to vector<256x128xbf16>
    %c1_35 = arith.constant 1 : index
    %c0_36 = arith.constant 0 : index
    %c0_37 = arith.constant 0 : index
    %30 = vector.load %arg5[%c1_35, %c0_36, %c0_37] : memref<9x128x128xbf16, #tpu.memory_space<vmem>>, vector<1x128x128xbf16>
    %31 = vector.shape_cast %30 : vector<1x128x128xbf16> to vector<128x128xbf16>
    %cst_38 = arith.constant dense<0.000000e+00> : vector<256x128xf32>
    %32 = tpu.matmul %29, %31, %cst_38 {dimension_numbers = #tpu.dot_dimension_numbers<[1], [0], [0], [1], [0, 0, 1, 1], [], []>} : vector<256x128xbf16>, vector<128x128xbf16>, vector<256x128xf32> -> vector<256x128xf32>
    %33 = arith.addf %27, %32 : vector<256x128xf32>
    %c0_39 = arith.constant 0 : index
    %c2 = arith.constant 2 : index
    %c0_40 = arith.constant 0 : index
    %34 = vector.load %arg10[%c0_39, %c2, %c0_40] : memref<18x18x128xbf16, #tpu.memory_space<vmem>>, vector<16x16x128xbf16>
    %35 = vector.shape_cast %34 : vector<16x16x128xbf16> to vector<256x128xbf16>
    %c2_41 = arith.constant 2 : index
    %c0_42 = arith.constant 0 : index
    %c0_43 = arith.constant 0 : index
    %36 = vector.load %arg5[%c2_41, %c0_42, %c0_43] : memref<9x128x128xbf16, #tpu.memory_space<vmem>>, vector<1x128x128xbf16>
    %37 = vector.shape_cast %36 : vector<1x128x128xbf16> to vector<128x128xbf16>
    %cst_44 = arith.constant dense<0.000000e+00> : vector<256x128xf32>
    %38 = tpu.matmul %35, %37, %cst_44 {dimension_numbers = #tpu.dot_dimension_numbers<[1], [0], [0], [1], [0, 0, 1, 1], [], []>} : vector<256x128xbf16>, vector<128x128xbf16>, vector<256x128xf32> -> vector<256x128xf32>
    %39 = arith.addf %33, %38 : vector<256x128xf32>
    %c1_45 = arith.constant 1 : index
    %c0_46 = arith.constant 0 : index
    %c0_47 = arith.constant 0 : index
    %40 = vector.load %arg10[%c1_45, %c0_46, %c0_47] : memref<18x18x128xbf16, #tpu.memory_space<vmem>>, vector<16x16x128xbf16>
    %41 = vector.shape_cast %40 : vector<16x16x128xbf16> to vector<256x128xbf16>
    %c3 = arith.constant 3 : index
    %c0_48 = arith.constant 0 : index
    %c0_49 = arith.constant 0 : index
    %42 = vector.load %arg5[%c3, %c0_48, %c0_49] : memref<9x128x128xbf16, #tpu.memory_space<vmem>>, vector<1x128x128xbf16>
    %43 = vector.shape_cast %42 : vector<1x128x128xbf16> to vector<128x128xbf16>
    %cst_50 = arith.constant dense<0.000000e+00> : vector<256x128xf32>
    %44 = tpu.matmul %41, %43, %cst_50 {dimension_numbers = #tpu.dot_dimension_numbers<[1], [0], [0], [1], [0, 0, 1, 1], [], []>} : vector<256x128xbf16>, vector<128x128xbf16>, vector<256x128xf32> -> vector<256x128xf32>
    %45 = arith.addf %39, %44 : vector<256x128xf32>
    %c1_51 = arith.constant 1 : index
    %c1_52 = arith.constant 1 : index
    %c0_53 = arith.constant 0 : index
    %46 = vector.load %arg10[%c1_51, %c1_52, %c0_53] : memref<18x18x128xbf16, #tpu.memory_space<vmem>>, vector<16x16x128xbf16>
    %47 = vector.shape_cast %46 : vector<16x16x128xbf16> to vector<256x128xbf16>
    %c4 = arith.constant 4 : index
    %c0_54 = arith.constant 0 : index
    %c0_55 = arith.constant 0 : index
    %48 = vector.load %arg5[%c4, %c0_54, %c0_55] : memref<9x128x128xbf16, #tpu.memory_space<vmem>>, vector<1x128x128xbf16>
    %49 = vector.shape_cast %48 : vector<1x128x128xbf16> to vector<128x128xbf16>
    %cst_56 = arith.constant dense<0.000000e+00> : vector<256x128xf32>
    %50 = tpu.matmul %47, %49, %cst_56 {dimension_numbers = #tpu.dot_dimension_numbers<[1], [0], [0], [1], [0, 0, 1, 1], [], []>} : vector<256x128xbf16>, vector<128x128xbf16>, vector<256x128xf32> -> vector<256x128xf32>
    %51 = arith.addf %45, %50 : vector<256x128xf32>
    %c1_57 = arith.constant 1 : index
    %c2_58 = arith.constant 2 : index
    %c0_59 = arith.constant 0 : index
    %52 = vector.load %arg10[%c1_57, %c2_58, %c0_59] : memref<18x18x128xbf16, #tpu.memory_space<vmem>>, vector<16x16x128xbf16>
    %53 = vector.shape_cast %52 : vector<16x16x128xbf16> to vector<256x128xbf16>
    %c5 = arith.constant 5 : index
    %c0_60 = arith.constant 0 : index
    %c0_61 = arith.constant 0 : index
    %54 = vector.load %arg5[%c5, %c0_60, %c0_61] : memref<9x128x128xbf16, #tpu.memory_space<vmem>>, vector<1x128x128xbf16>
    %55 = vector.shape_cast %54 : vector<1x128x128xbf16> to vector<128x128xbf16>
    %cst_62 = arith.constant dense<0.000000e+00> : vector<256x128xf32>
    %56 = tpu.matmul %53, %55, %cst_62 {dimension_numbers = #tpu.dot_dimension_numbers<[1], [0], [0], [1], [0, 0, 1, 1], [], []>} : vector<256x128xbf16>, vector<128x128xbf16>, vector<256x128xf32> -> vector<256x128xf32>
    %57 = arith.addf %51, %56 : vector<256x128xf32>
    %c2_63 = arith.constant 2 : index
    %c0_64 = arith.constant 0 : index
    %c0_65 = arith.constant 0 : index
    %58 = vector.load %arg10[%c2_63, %c0_64, %c0_65] : memref<18x18x128xbf16, #tpu.memory_space<vmem>>, vector<16x16x128xbf16>
    %59 = vector.shape_cast %58 : vector<16x16x128xbf16> to vector<256x128xbf16>
    %c6 = arith.constant 6 : index
    %c0_66 = arith.constant 0 : index
    %c0_67 = arith.constant 0 : index
    %60 = vector.load %arg5[%c6, %c0_66, %c0_67] : memref<9x128x128xbf16, #tpu.memory_space<vmem>>, vector<1x128x128xbf16>
    %61 = vector.shape_cast %60 : vector<1x128x128xbf16> to vector<128x128xbf16>
    %cst_68 = arith.constant dense<0.000000e+00> : vector<256x128xf32>
    %62 = tpu.matmul %59, %61, %cst_68 {dimension_numbers = #tpu.dot_dimension_numbers<[1], [0], [0], [1], [0, 0, 1, 1], [], []>} : vector<256x128xbf16>, vector<128x128xbf16>, vector<256x128xf32> -> vector<256x128xf32>
    %63 = arith.addf %57, %62 : vector<256x128xf32>
    %c2_69 = arith.constant 2 : index
    %c1_70 = arith.constant 1 : index
    %c0_71 = arith.constant 0 : index
    %64 = vector.load %arg10[%c2_69, %c1_70, %c0_71] : memref<18x18x128xbf16, #tpu.memory_space<vmem>>, vector<16x16x128xbf16>
    %65 = vector.shape_cast %64 : vector<16x16x128xbf16> to vector<256x128xbf16>
    %c7 = arith.constant 7 : index
    %c0_72 = arith.constant 0 : index
    %c0_73 = arith.constant 0 : index
    %66 = vector.load %arg5[%c7, %c0_72, %c0_73] : memref<9x128x128xbf16, #tpu.memory_space<vmem>>, vector<1x128x128xbf16>
    %67 = vector.shape_cast %66 : vector<1x128x128xbf16> to vector<128x128xbf16>
    %cst_74 = arith.constant dense<0.000000e+00> : vector<256x128xf32>
    %68 = tpu.matmul %65, %67, %cst_74 {dimension_numbers = #tpu.dot_dimension_numbers<[1], [0], [0], [1], [0, 0, 1, 1], [], []>} : vector<256x128xbf16>, vector<128x128xbf16>, vector<256x128xf32> -> vector<256x128xf32>
    %69 = arith.addf %63, %68 : vector<256x128xf32>
    %c2_75 = arith.constant 2 : index
    %c2_76 = arith.constant 2 : index
    %c0_77 = arith.constant 0 : index
    %70 = vector.load %arg10[%c2_75, %c2_76, %c0_77] : memref<18x18x128xbf16, #tpu.memory_space<vmem>>, vector<16x16x128xbf16>
    %71 = vector.shape_cast %70 : vector<16x16x128xbf16> to vector<256x128xbf16>
    %c8 = arith.constant 8 : index
    %c0_78 = arith.constant 0 : index
    %c0_79 = arith.constant 0 : index
    %72 = vector.load %arg5[%c8, %c0_78, %c0_79] : memref<9x128x128xbf16, #tpu.memory_space<vmem>>, vector<1x128x128xbf16>
    %73 = vector.shape_cast %72 : vector<1x128x128xbf16> to vector<128x128xbf16>
    %cst_80 = arith.constant dense<0.000000e+00> : vector<256x128xf32>
    %74 = tpu.matmul %71, %73, %cst_80 {dimension_numbers = #tpu.dot_dimension_numbers<[1], [0], [0], [1], [0, 0, 1, 1], [], []>} : vector<256x128xbf16>, vector<128x128xbf16>, vector<256x128xf32> -> vector<256x128xf32>
    %75 = arith.addf %69, %74 : vector<256x128xf32>
    %cst_81 = arith.constant 0.000000e+00 : f32
    %76 = vector.broadcast %cst_81 : f32 to vector<256x128xf32>
    %77 = arith.maximumf %75, %76 : vector<256x128xf32>
    %78 = arith.truncf %77 : vector<256x128xf32> to vector<256x128xbf16>
    %c0_82 = arith.constant 0 : index
    %c0_83 = arith.constant 0 : index
    %79 = vector.load %arg6[%c0_82, %c0_83] : memref<128x128xbf16, #tpu.memory_space<vmem>>, vector<128x128xbf16>
    %cst_84 = arith.constant dense<0.000000e+00> : vector<256x128xf32>
    %80 = tpu.matmul %78, %79, %cst_84 {dimension_numbers = #tpu.dot_dimension_numbers<[1], [0], [0], [1], [0, 0, 1, 1], [], []>} : vector<256x128xbf16>, vector<128x128xbf16>, vector<256x128xf32> -> vector<256x128xf32>
    %c0_85 = arith.constant 0 : index
    %c0_86 = arith.constant 0 : index
    %81 = vector.load %arg7[%c0_85, %c0_86] : memref<8x128xbf16, #tpu.memory_space<vmem>>, vector<8x128xbf16>
    %cst_87 = arith.constant dense<0.000000e+00> : vector<256x128xf32>
    %82 = tpu.matmul %1, %81, %cst_87 {dimension_numbers = #tpu.dot_dimension_numbers<[1], [0], [0], [1], [0, 0, 1, 1], [], []>} : vector<256x8xbf16>, vector<8x128xbf16>, vector<256x128xf32> -> vector<256x128xf32>
    %83 = arith.addf %80, %82 : vector<256x128xf32>
    %c0_88 = arith.constant 0 : index
    %c0_89 = arith.constant 0 : index
    %84 = vector.load %arg8[%c0_88, %c0_89] : memref<1x128xf32, #tpu.memory_space<vmem>>, vector<1x128xf32>
    %85 = vector.broadcast %84 : vector<1x128xf32> to vector<256x128xf32>
    %86 = arith.addf %83, %85 : vector<256x128xf32>
    %cst_90 = arith.constant 0.000000e+00 : f32
    %87 = vector.broadcast %cst_90 : f32 to vector<256x128xf32>
    %88 = arith.maximumf %86, %87 : vector<256x128xf32>
    %c0_91 = arith.constant 0 : index
    %c0_92 = arith.constant 0 : index
    %c0_93 = arith.constant 0 : index
    %89 = vector.load %arg9[%c0_91, %c0_92, %c0_93] : memref<1x256x128xf32, #tpu.memory_space<vmem>>, vector<1x256x128xf32>
    %90 = vector.shape_cast %89 : vector<1x256x128xf32> to vector<256x128xf32>
    %91 = vector.shape_cast %88 : vector<256x128xf32> to vector<1x256x128xf32>
    tpu.vector_store %arg9[%c0_91, %c0_92, %c0_93], %91 {strides = array<i32>} : memref<1x256x128xf32, #tpu.memory_space<vmem>>, vector<1x256x128xf32>,
    return
  }
  func.func @transform_0(%arg0: i32) -> (i32, i32, i32) {
    %c0_i32 = arith.constant 0 : i32
    %c0_i32_0 = arith.constant 0 : i32
    %c0_i32_1 = arith.constant 0 : i32
    return %arg0, %c0_i32, %c0_i32_0 : i32, i32, i32
  }
  func.func @transform_1(%arg0: i32) -> (i32, i32) {
    %c0_i32 = arith.constant 0 : i32
    %c0_i32_0 = arith.constant 0 : i32
    %c0_i32_1 = arith.constant 0 : i32
    return %c0_i32, %c0_i32_0 : i32, i32
  }
  func.func @transform_2(%arg0: i32) -> (i32, i32) {
    %c0_i32 = arith.constant 0 : i32
    %c0_i32_0 = arith.constant 0 : i32
    %c0_i32_1 = arith.constant 0 : i32
    return %c0_i32, %c0_i32_0 : i32, i32
  }
  func.func @transform_3(%arg0: i32) -> (i32, i32) {
    %c0_i32 = arith.constant 0 : i32
    %c0_i32_0 = arith.constant 0 : i32
    %c0_i32_1 = arith.constant 0 : i32
    return %c0_i32, %c0_i32_0 : i32, i32
  }
  func.func @transform_4(%arg0: i32) -> (i32, i32, i32) {
    %c0_i32 = arith.constant 0 : i32
    %c0_i32_0 = arith.constant 0 : i32
    %c0_i32_1 = arith.constant 0 : i32
    %c0_i32_2 = arith.constant 0 : i32
    return %c0_i32, %c0_i32_0, %c0_i32_1 : i32, i32, i32
  }
  func.func @transform_5(%arg0: i32) -> (i32, i32) {
    %c0_i32 = arith.constant 0 : i32
    %c0_i32_0 = arith.constant 0 : i32
    %c0_i32_1 = arith.constant 0 : i32
    return %c0_i32, %c0_i32_0 : i32, i32
  }
  func.func @transform_6(%arg0: i32) -> (i32, i32) {
    %c0_i32 = arith.constant 0 : i32
    %c0_i32_0 = arith.constant 0 : i32
    %c0_i32_1 = arith.constant 0 : i32
    return %c0_i32, %c0_i32_0 : i32, i32
  }
  func.func @transform_7(%arg0: i32) -> (i32, i32) {
    %c0_i32 = arith.constant 0 : i32
    %c0_i32_0 = arith.constant 0 : i32
    %c0_i32_1 = arith.constant 0 : i32
    return %c0_i32, %c0_i32_0 : i32, i32
  }
  func.func @transform_8(%arg0: i32) -> (i32, i32, i32) {
    %c0_i32 = arith.constant 0 : i32
    %c0_i32_0 = arith.constant 0 : i32
    %c0_i32_1 = arith.constant 0 : i32
    return %arg0, %c0_i32, %c0_i32_0 : i32, i32, i32
  }
}

</mosaic_0001>

<bundles_post_ra>
// kernel: bottleneck_forward.1
= control target key start
LH: loop header
LB: loop body
LE: loop exit
PB: predicated region body
PF: predicated region fallthrough
CT: control target
= control target key end

     0   :  { %s6861_s27 = smov 0   ;;  %s8815_s0 = inlined_call_operand.vmem [shape: bf16[2,256,8], index: 0, kind: input, shape index: {}]   ;;  %s8816_s1 = inlined_call_operand.vmem [shape: bf16[8,128], index: 1, kind: input, shape index: {}]   ;;  %s8817_s2 = inlined_call_operand.vmem [shape: f32[1,128], index: 2, kind: input, shape index: {}]   ;;  %s8818_s3 = inlined_call_operand.vmem [shape: f32[1,128], index: 3, kind: input, shape index: {}]   ;;  %s8819_s4 = inlined_call_operand.vmem [shape: bf16[9,128,128], index: 4, kind: input, shape index: {}]   ;;  %s8820_s5 = inlined_call_operand.vmem [shape: bf16[128,128], index: 5, kind: input, shape index: {}]   ;;  %s8821_s6 = inlined_call_operand.vmem [shape: bf16[8,128], index: 6, kind: input, shape index: {}]   ;;  %s8822_s7 = inlined_call_operand.vmem [shape: f32[1,128], index: 7, kind: input, shape index: {}]   ;;  %s8823_s8 = inlined_call_operand.vmem [shape: f32[2,256,128], index: 8, kind: output, shape index: {}]  }
   0x1 LB: > { %s5832_s28 = sadd.s32 4294967295, %s6813_s27   ;;  %p5836_p0 = scmp.ge.s32.totalorder %s6813_s27, 1  ;;  %s6813_s27 = sphi %s6861_s27, %s18_s27  }
   0x2   : > { %p262_p1 = scmp.lt.s32.totalorder %s6813_s27, 3 }
   0x4   : > { %p263_p2 = pnand %p5836_p0, %p262_p1 }
   0x6   : > { %266 = sbr.rel (%p263_p2) target bundleno = 1212 (0x4bc), region = 52 }
   0xb   : > { %v339_v0 = vld [vmem:[%s8816_s1] sm:$0xf]  ;;  %vm473_vm0 = vcmask 1043456   ;;  %p296_p3 = scmp.lt.s32.totalorder %s5832_s28, 1  ;;  %vm424_vm1 = vcmask 64512   ;;  %v6668_v7 = vld [vmem:[%s8819_s4 + $0x38] sm:$0xff] }
   0xc   : > { %v475_v1 = vsel %vm473_vm0, %v339_v0, 0  ;;  %v6684_v8 = vld [vmem:[%s8819_s4 + $0xb8] sm:$0xff]  ;;  %2036 = vmatpush.bf16.msra.mxu2 %v6668_v7  ;;  %v6667_v10 = vld [vmem:[%s8819_s4 + $0x30] sm:$0xff]  ;;  %v6666_v13 = vld [vmem:[%s8819_s4 + $0x28] sm:$0xff]  ;;  %v6815_v17 = vmov 0   ;;  %vm641_vm2 = vcmask 1040384  }
   0xd   : > { %484 = vmatpush.bf16.msra.mxu0 %v475_v1  ;;  %s8933_s28 = smov (!%p296_p3, %s5832_s28), 1  ;;  %2417 = vmatpush.bf16.msra.mxu3 %v6684_v8  ;;  %v6676_v11 = vld [vmem:[%s8819_s4 + $0x78] sm:$0xff]  ;;  %v6683_v12 = vld [vmem:[%s8819_s4 + $0xb0] sm:$0xff]  ;;  %v6682_v15 = vld [vmem:[%s8819_s4 + $0xa8] sm:$0xff]  ;;  %634 = vst [vmem:[#allocation2] sm:$0xf] %v6815_v17 }
   0xe   : > { %s6627_s9 = sshll.u32 %s8933_s28, 7  ;;  %1803 = vmatpush.bf16.msra.mxu1 %v6676_v11  ;;  %v6675_v14 = vld [vmem:[%s8819_s4 + $0x70] sm:$0xff]  ;;  %v6665_v16 = vld [vmem:[%s8819_s4 + $0x20] sm:$0xff]  ;;  %v6674_v18 = vld [vmem:[%s8819_s4 + $0x68] sm:$0xff]  ;;  %635 = vst [vmem:[#allocation2 + $0x4] sm:$0xf] %v6815_v17 }
   0xf   : > { %s6879_s12 = scalar_lea.vmem %s8815_s0, %s6627_s9  ;;  %v6681_v19 = vld [vmem:[%s8819_s4 + $0xa0] sm:$0xff]  ;;  %vm642_vm3 = vsmask.f32 256  ;;  %636 = vst [vmem:[#allocation2 + $0x8] sm:$0x1] %v6815_v17  ;;  %v8829_v20 = vmov 0 }
  0x10   : > { %v6629_v2 = vld [vmem:[%s6879_s12] sm:$0xff]  ;;  %v6630_v3 = vld [vmem:[%s6879_s12 + $0x8] sm:$0xff]  ;;  %v6631_v4 = vld [vmem:[%s6879_s12 + $0x10] sm:$0xff]  ;;  %2037 = vmatpush.bf16.msra.mxu2 %v6667_v10  ;;  %638 = vst [vmem:[#allocation2 + $0xcc] sm:$0xf] %v6815_v17  ;;  %v8832_v22 = vmov 0 }
  0x11   : > { %5905 = vmatmul.msk.bf16.vlgmr.msra.gmra.mxu0 %vm424_vm1, %v6629_v2  ;;  %v6632_v5 = vld [vmem:[%s6879_s12 + $0x18] sm:$0xff]  ;;  %v6633_v6 = vld [vmem:[%s6879_s12 + $0x20] sm:$0xff]  ;;  %v6634_v9 = vld [vmem:[%s6879_s12 + $0x28] sm:$0xff]  ;;  %2418 = vmatpush.bf16.msra.mxu3 %v6683_v12  ;;  %vm698_vm4 = vsmask.f32 7938  ;;  %vm2173_vm7 = vcmask 1042432  }
  0x12   : > { %1804 = vmatpush.bf16.msra.mxu1 %v6675_v14  ;;  %639 = vst [vmem:[#allocation2 + $0xd0] sm:$0xf] %v6815_v17  ;;  %vm6927_vm5 = vmand %vm641_vm2, %vm642_vm3  ;;  %v6664_v21 = vld [vmem:[%s8819_s4 + $0x18] sm:$0xff]  ;;  %v6635_v23 = vld [vmem:[%s6879_s12 + $0x30] sm:$0xff]  ;;  %vm2174_vm8 = vcmask 1046532   ;;  %s6628_s18 = sshll.u32 %s8933_s28, 8 }
  0x13   : > { %v8830_v20 = vsel %vm6927_vm5, 4294967295, %v8829_v20  ;;  %640 = vst [vmem:[#allocation2 + $0xd4] sm:$0x1] %v6815_v17  ;;  %vm6935_vm6 = vmand %vm641_vm2, %vm698_vm4  ;;  %v6673_v25 = vld [vmem:[%s8819_s4 + $0x60] sm:$0xff]  ;;  %v6680_v26 = vld [vmem:[%s8819_s4 + $0x98] sm:$0xff]  ;;  %s8725_s21 = scalar_lea.vmem %s8823_s8, %s6628_s18 }
  0x14   : > { %2038 = vmatpush.bf16.msra.mxu2 %v6666_v13  ;;  %8831 = vst [vmem:[#allocation3_spill] sm:$0xff] %v8830_v20  ;;  %v8833_v22 = vsel %vm6935_vm6, 4294967295, %v8832_v22  ;;  %v644_v24 = vld [vmem:[#allocation2] sm:$0x1]  ;;  %v6663_v29 = vld [vmem:[%s8819_s4 + $0x10] sm:$0xff]  ;;  %v6672_v31 = vld [vmem:[%s8819_s4 + $0x58] sm:$0xff] }
  0x15   : > { %2419 = vmatpush.bf16.msra.mxu3 %v6682_v15  ;;  %8834 = vst [vmem:[#allocation4_spill] sm:$0xff] %v8833_v22  ;;  %v645_v27 = vsel %vm6927_vm5, 0, %v644_v24  ;;  %v6679_v32 = vld [vmem:[%s8819_s4 + $0x90] sm:$0xff]  ;;  %v647_v33 = vld [vmem:[#allocation2 + $0xc] sm:$0x1]  ;;  %v6661_v47 = vld [vmem:[%s8819_s4] sm:$0xff] }
  0x16   : > { %1805 = vmatpush.bf16.msra.mxu1 %v6674_v18  ;;  %646 = vst [vmem:[#allocation2] sm:$0x1] %v645_v27  ;;  %v700_v28 = vld [vmem:[#allocation2 + $0x8] sm:$0x1]  ;;  %v648_v34 = vsel %vm6927_vm5, 0, %v647_v33  ;;  %v6671_v38 = vld [vmem:[%s8819_s4 + $0x50] sm:$0xff]  ;;  %vm6974_vm9 = vmor %vm2173_vm7, %vm2174_vm8 }
  0x17   : > { %v701_v30 = vsel %vm6935_vm6, 0, %v700_v28  ;;  %649 = vst [vmem:[#allocation2 + $0xc] sm:$0x1] %v648_v34  ;;  %v6662_v35 = vld [vmem:[%s8819_s4 + $0x8] sm:$0xff]  ;;  %v1224_v36 = vld [vmem:[#allocation2 + $0x4] sm:$0xf]  ;;  %vm7032_vm13 = vmand %vm473_vm0, %vm698_vm4 }
  0x18   : > { %2039 = vmatpush.bf16.msra.mxu2 %v6665_v16  ;;  %702 = vst [vmem:[#allocation2 + $0x8] sm:$0x1] %v701_v30  ;;  %v6678_v39 = vld [vmem:[%s8819_s4 + $0x88] sm:$0xff]  ;;  %v2178_v40 = vrot.slane %v1224_v36, 5  ;;  %v1300_v43 = vshll.u32 %v1224_v36, 16  ;;  %v1304_v46 = vshrl.u32 %v1224_v36, 16 }
  0x19   : > { %2420 = vmatpush.bf16.msra.mxu3 %v6681_v19  ;;  %v2125_v45 = vld [vmem:[#allocation2] sm:$0xe]  ;;  %v703_v55 = vld [vmem:[#allocation2 + $0x14] sm:$0x1]  ;;  %v6670_v56 = vld [vmem:[%s8819_s4 + $0x48] sm:$0xff] }
  0x1a   : > { %1806 = vmatpush.bf16.msra.mxu1 %v6673_v25  ;;  %v6065_v48 = vrot.slane %v2125_v45, 9  ;;  %v2180_v49 = vrot.slane %v2178_v40, 4  ;;  %v1302_v54 = vrot.slane %v1300_v43, 5  ;;  %v6677_v57 = vld [vmem:[%s8819_s4 + $0x80] sm:$0xff]  ;;  %v1306_v59 = vrot.slane %v1304_v46, 4  ;;  %v6636_v61 = vld [vmem:[%s6879_s12 + $0x38] sm:$0xff] }
  0x1b   : > { %v704_v62 = vsel %vm6935_vm6, 0, %v703_v55  ;;  %vm1287_vm10 = vsmask.f32 3328  ;;  %vm1288_vm11 = vsmask.f32 7440  ;;  %v6716_v36 = vld [vmem:[%s8819_s4 + $0x138] sm:$0xff] }
  0x1c   : > { %2040 = vmatpush.bf16.msra.mxu2 %v6664_v21  ;;  %v2179_v58 = vsel %vm6974_vm9, %v6065_v48, %v2178_v40  ;;  %705 = vst [vmem:[#allocation2 + $0x14] sm:$0x1] %v704_v62  ;;  %vm6991_vm12 = vmor %vm1287_vm10, %vm1288_vm11  ;;  %v650_v15 = vld [vmem:[#allocation2 + $0x18] sm:$0x1]  ;;  %v7008_v18 = vld [vmem:[%s8817_s2] ss:$0 sm:$0xff] }
  0x1d   : > { %2421 = vmatpush.bf16.msra.mxu3 %v6680_v26  ;;  %v1223_v37 = vld [vmem:[#allocation2] sm:$0xf]  ;;  %v2305_v1 = vunpack.c.l.b16 %v2179_v58  ;;  %v651_v17 = vsel %vm6927_vm5, 0, %v650_v15  ;;  %vm786_vm14 = vsmask.f32 4368 }
  0x1e   : > { %1807 = vmatpush.bf16.msra.mxu1 %v6672_v31  ;;  %v1291_v41 = vshrl.u32 %v1223_v37, 16  ;;  %v1294_v42 = vshll.u32 %v1223_v37, 16  ;;  %v6645_v63 = vld [vmem:[#allocation2] sm:$0xff]  ;;  %652 = vst [vmem:[#allocation2 + $0x18] sm:$0x1] %v651_v17  ;;  %vm7045_vm15 = vmor %vm642_vm3, %vm786_vm14 }
  0x1f   : > { %v1271_v44 = vld [vmem:[#allocation2 + $0x8] sm:$0x1]  ;;  %v706_v19 = vld [vmem:[#allocation2 + $0x20] sm:$0x1] }
  0x20   : > { %2041 = vmatpush.bf16.msra.mxu2 %v6663_v29  ;;  %v2181_v51 = vrot.slane %v1271_v44, 5  ;;  %v1293_v52 = vrot.slane %v1291_v41, 4  ;;  %v1296_v53 = vrot.slane %v1294_v42, 5  ;;  %v1310_v60 = vshll.u32 %v1271_v44, 16  ;;  %v6637_v21 = vld [vmem:[%s6879_s12 + $0x40] sm:$0xff] }
  0x21   : > { %5906 = vmatmul.msk.bf16.gmra.mxu0 %vm424_vm1, %v6630_v3  ;;  %2422 = vmatpush.bf16.msra.mxu3 %v6679_v32  ;;  %v7017_v26 = vld [vmem:[%s8818_s3] ss:$0 sm:$0xff]  ;;  %v653_v29 = vld [vmem:[#allocation2 + $0x24] sm:$0x1]  ;;  %v1111_v41 = vld [vmem:[#allocation2 + $0xc] sm:$0xf] }
  0x22   : > { %1808 = vmatpush.bf16.msra.mxu1 %v6671_v38  ;;  %v2182_v0 = vsel %vm6974_vm9, %v2180_v49, %v2181_v51  ;;  %v1297_v2 = vor.u32 %v1296_v53, %v1293_v52  ;;  %v1312_v7 = vrot.slane %v1310_v60, 5  ;;  %v654_v31 = vsel %vm6927_vm5, 0, %v653_v29  ;;  %v709_v44 = vld [vmem:[#allocation2 + $0x2c] sm:$0x1] }
  0x23   : > { %v2306_v3 = vunpack.c.l.b16 %v2182_v0  ;;  %655 = vst [vmem:[#allocation2 + $0x24] sm:$0x1] %v654_v31  ;;  %v710_v48 = vsel %vm6935_vm6, 0, %v709_v44 }
  0x24   : > { %2042 = vmatpush.bf16.msra.mxu2 %v6662_v35  ;;  %v6708_v35 = vld [vmem:[%s8819_s4 + $0xf8] sm:$0xff]  ;;  %711 = vst [vmem:[#allocation2 + $0x2c] sm:$0x1] %v710_v48 }
  0x25   : > { %2423 = vmatpush.bf16.msra.mxu3 %v6678_v39  ;;  %v2337_v8 = vpack.c.b16 %v2306_v3, %v2305_v1  ;;  %2731 = vmatpush.bf16.msrb.mxu0 %v6708_v35  ;;  %v1118_v15 = vld [vmem:[#allocation2 + $0x18] sm:$0xf] }
  0x26   : > { %1809 = vmatpush.bf16.msra.mxu1 %v6670_v56 }
  0x28   : > { %2043 = vmatpush.bf16.msra.mxu2 %v6661_v47  ;;  %v6638_v47 = vld [vmem:[%s6879_s12 + $0x48] sm:$0xff] }
  0x29   : > { %2424 = vmatpush.bf16.msra.mxu3 %v6677_v57  ;;  %v1115_v57 = vld [vmem:[#allocation2 + $0x14] sm:$0x1] }
  0x2b   : > { %2044 = vmatmul.bf16.vlgmr.msra.gmra.mxu2 %v6645_v63 }
  0x2c   : > { %2425 = vmatmul.bf16.vlgmr.msra.gmra.mxu3 %v2337_v8 }
  0x31   : > { %5907 = vmatmul.msk.bf16.gmra.mxu0 %vm424_vm1, %v6631_v4  ;;  %v1307_v4 = vor.u32 %v1306_v59, %v1302_v54 }
  0x33   : > { %v1308_v10 = vrot.slane %v1307_v4, 4 }
  0x35   : > { %v1313_v12 = vsel %vm6991_vm12, %v1308_v10, %v1312_v7  ;;  %v656_v10 = vld [vmem:[#allocation2 + $0x30] sm:$0x1] }
  0x36   : > { %v1692_v14 = vunpack.c.l.b16 %v1313_v12 }
  0x41   : > { %5908 = vmatmul.msk.bf16.gmra.mxu0 %vm424_vm1, %v6632_v5 }
  0x51   : > { %5909 = vmatmul.msk.bf16.gmra.mxu0 %vm424_vm1, %v6633_v6  ;;  %v1298_v6 = vrot.slane %v1297_v2, 4 }
  0x53   : > { %v1303_v11 = vsel %vm6991_vm12, %v1298_v6, %v1302_v54 }
  0x54   : > { %v1691_v13 = vunpack.c.l.b16 %v1303_v11 }
  0x56   : > { %v1723_v16 = vpack.c.b16 %v1692_v14, %v1691_v13  ;;  %v657_v14 = vsel %vm6927_vm5, 0, %v656_v10 }
  0x57   : > { %658 = vst [vmem:[#allocation2 + $0x30] sm:$0x1] %v657_v14 }
  0x61   : > { %5910 = vmatmul.msk.bf16.gmra.mxu0 %vm424_vm1, %v6634_v9  ;;  %v6669_v9 = vld [vmem:[%s8819_s4 + $0x40] sm:$0xff] }
  0x62   : > { %1810 = vmatpush.bf16.msra.mxu1 %v6669_v9 }
  0x65   : > { %1811 = vmatmul.bf16.vlgmr.msra.gmra.mxu1 %v1723_v16 }
  0x66   : > { %3413 = vmatpush.bf16.msrb.mxu1 %v6716_v36 }
  0x71   : > { %5911 = vmatmul.msk.bf16.gmra.mxu0 %vm424_vm1, %v6635_v23  ;;  %v707_v23 = vsel %vm6935_vm6, 0, %v706_v19 }
  0x72   : > { %708 = vst [vmem:[#allocation2 + $0x20] sm:$0x1] %v707_v23 }
  0x81   : > { %5912 = vmatmul.msk.bf16.gmra.mxu0 %vm424_vm1, %v6636_v61 }
  0x8e   : > { %v486_v24 = vpop.f32.mrf.mxu0 }
  0x8f   : > { %v487_v25 = vadd.f32 %v7008_v18, %v486_v24 }
  0x91   : > { %v566_v27 = vmax.f32 %v487_v25, 0.0  ;;  %5913 = vmatmul.msk.bf16.gmra.mxu0 %vm424_vm1, %v6637_v21 }
  0x93   : > { %v602_v28 = vadd.f32 %v7017_v26, %v566_v27 }
  0x95   : > { %v754_v30 = vpack.c.bf16 %v602_v28, %v602_v28  ;;  %v6639_v28 = vld [vmem:[%s6879_s12 + $0x50] sm:$0xff] }
  0x96   : > { %v488_v32 = vpop.f32.mrf.mxu0 }
  0x97   : > { %v789_v33 = vshrl.u32 %v754_v30, 16  ;;  %v489_v34 = vadd.f32 %v7008_v18, %v488_v32  ;;  %v792_v38 = vshll.u32 %v754_v30, 16 }
  0x99   : > { %v791_v37 = vrot.slane %v789_v33, 7  ;;  %v567_v39 = vmax.f32 %v489_v34, 0.0 }
  0x9b   : > { %v794_v42 = vor.u32 %v792_v38, %v791_v37  ;;  %v603_v43 = vadd.f32 %v7017_v26, %v567_v39  ;;  %v795_v58 = vrot.slane %v791_v37, 4  ;;  %v712_v39 = vld [vmem:[#allocation2 + $0x38] sm:$0x1] }
  0x9d   : > { %v1112_v45 = vsel %vm7032_vm13, %v794_v42, %v1111_v41  ;;  %v755_v46 = vpack.c.bf16 %v603_v43, %v603_v43 }
  0x9e   : > { %1113 = vst [vmem:[#allocation2 + $0xc] sm:$0xf] %v1112_v45  ;;  %v491_v49 = vpop.f32.mrf.mxu0 }
  0x9f   : > { %v797_v51 = vshrl.u32 %v755_v46, 16  ;;  %v492_v52 = vadd.f32 %v7008_v18, %v491_v49  ;;  %v800_v54 = vshll.u32 %v755_v46, 16  ;;  %v1122_v49 = vld [vmem:[#allocation2 + $0x20] sm:$0x1] }
  0xa1   : > { %v799_v53 = vrot.slane %v797_v51, 7  ;;  %v568_v55 = vmax.f32 %v492_v52, 0.0  ;;  %5914 = vmatmul.msk.bf16.gmra.mxu0 %vm424_vm1, %v6638_v47 }
  0xa3   : > { %v802_v59 = vor.u32 %v800_v54, %v799_v53  ;;  %v804_v60 = vrot.slane %v799_v53, 4  ;;  %v604_v61 = vadd.f32 %v7017_v26, %v568_v55  ;;  %v713_v54 = vsel %vm6935_vm6, 0, %v712_v39 }
  0xa4   : > { %714 = vst [vmem:[#allocation2 + $0x38] sm:$0x1] %v713_v54 }
  0xa5   : > { %v803_v62 = vsel %vm7045_vm15, %v795_v58, %v802_v59  ;;  %v1116_v63 = vsel %vm6927_vm5, %v804_v60, %v1115_v57  ;;  %v756_v0 = vpack.c.bf16 %v604_v61, %v604_v61  ;;  %v1225_v1 = vld [vmem:[#allocation2 + $0xc] sm:$0xf] }
  0xa6   : > { %1114 = vst [vmem:[#allocation2 + $0x10] sm:$0xf] %v803_v62  ;;  %v493_v2 = vpop.f32.mrf.mxu0  ;;  %v1315_v3 = vshrl.u32 %v1225_v1, 16  ;;  %v1318_v7 = vshll.u32 %v1225_v1, 16  ;;  %v2126_v16 = vld [vmem:[#allocation2 + $0xc] sm:$0xe] }
  0xa7   : > { %1117 = vst [vmem:[#allocation2 + $0x14] sm:$0x1] %v1116_v63  ;;  %v806_v4 = vshrl.u32 %v756_v0, 16  ;;  %v494_v6 = vadd.f32 %v7008_v18, %v493_v2  ;;  %v809_v8 = vshll.u32 %v756_v0, 16  ;;  %v6066_v30 = vrot.slane %v2126_v16, 9 }
  0xa8   : > { %v1317_v9 = vrot.slane %v1315_v3, 4  ;;  %v1320_v13 = vrot.slane %v1318_v7, 5 }
  0xa9   : > { %v808_v11 = vrot.slane %v806_v4, 7  ;;  %v569_v12 = vmax.f32 %v494_v6, 0.0 }
  0xaa   : > { %v1321_v21 = vor.u32 %v1320_v13, %v1317_v9  ;;  %v6715_v13 = vld [vmem:[%s8819_s4 + $0x130] sm:$0xff] }
  0xab   : > { %v811_v17 = vor.u32 %v809_v8, %v808_v11  ;;  %v605_v19 = vadd.f32 %v7017_v26, %v569_v12  ;;  %v812_v23 = vrot.slane %v808_v11, 4  ;;  %v6707_v12 = vld [vmem:[%s8819_s4 + $0xf0] sm:$0xff]  ;;  %3414 = vmatpush.bf16.msrb.mxu1 %v6715_v13 }
  0xac   : > { %v1322_v38 = vrot.slane %v1321_v21, 4  ;;  %2732 = vmatpush.bf16.msrb.mxu0 %v6707_v12 }
  0xad   : > { %v1119_v24 = vsel %vm7032_vm13, %v811_v17, %v1118_v15  ;;  %v757_v25 = vpack.c.bf16 %v605_v19, %v605_v19  ;;  %v6646_v27 = vld [vmem:[#allocation2 + $0xc] sm:$0xff]  ;;  %v659_v19 = vld [vmem:[#allocation2 + $0x3c] sm:$0x1] }
  0xae   : > { %v1226_v29 = vld [vmem:[#allocation2 + $0x10] sm:$0xf]  ;;  %1120 = vst [vmem:[#allocation2 + $0x18] sm:$0xf] %v1119_v24  ;;  %v496_v31 = vpop.f32.mrf.mxu0  ;;  %v1272_v32 = vld [vmem:[#allocation2 + $0x14] sm:$0x1]  ;;  %2049 = vmatmul.bf16.gmra.mxu2 %v6646_v27 }
  0xaf   : > { %v2185_v33 = vrot.slane %v1226_v29, 5  ;;  %v1324_v34 = vshll.u32 %v1226_v29, 16  ;;  %v814_v35 = vshrl.u32 %v757_v25, 16  ;;  %v497_v36 = vadd.f32 %v7008_v18, %v496_v31  ;;  %v1125_v27 = vld [vmem:[#allocation2 + $0x24] sm:$0xf] }
  0xb0   : > { %v2188_v37 = vrot.slane %v1272_v32, 5  ;;  %v1328_v44 = vshrl.u32 %v1226_v29, 16  ;;  %v817_v46 = vshll.u32 %v757_v25, 16  ;;  %v1334_v53 = vshll.u32 %v1272_v32, 16 }
  0xb1   : > { %v2186_v41 = vsel %vm6974_vm9, %v6066_v30, %v2185_v33  ;;  %v2187_v42 = vrot.slane %v2185_v33, 4  ;;  %v1326_v43 = vrot.slane %v1324_v34, 5  ;;  %v816_v45 = vrot.slane %v814_v35, 7  ;;  %5915 = vmatmul.msk.bf16.gmra.mxu0 %vm424_vm1, %v6639_v28 }
  0xb2   : > { %v570_v47 = vmax.f32 %v497_v36, 0.0  ;;  %v2307_v48 = vunpack.c.l.b16 %v2186_v41  ;;  %v1330_v52 = vrot.slane %v1328_v44, 4  ;;  %v1336_v6 = vrot.slane %v1334_v53, 5 }
  0xb3   : > { %v2189_v51 = vsel %vm6974_vm9, %v2187_v42, %v2188_v37  ;;  %v819_v55 = vor.u32 %v817_v46, %v816_v45  ;;  %v821_v57 = vrot.slane %v816_v45, 4  ;;  %v1327_v60 = vsel %vm6991_vm12, %v1322_v38, %v1326_v43  ;;  %v6640_v37 = vld [vmem:[%s6879_s12 + $0x58] sm:$0xff] }
  0xb4   : > { %v606_v58 = vadd.f32 %v7017_v26, %v570_v47  ;;  %v2308_v59 = vunpack.c.l.b16 %v2189_v51  ;;  %v1331_v61 = vor.u32 %v1330_v52, %v1326_v43  ;;  %v1693_v11 = vunpack.c.l.b16 %v1327_v60  ;;  %v1129_v60 = vld [vmem:[#allocation2 + $0x2c] sm:$0x1] }
  0xb5   : > { %v820_v62 = vsel %vm7045_vm15, %v812_v23, %v819_v55  ;;  %v1123_v63 = vsel %vm6927_vm5, %v821_v57, %v1122_v49  ;;  %v1227_v2 = vld [vmem:[#allocation2 + $0x18] sm:$0xf]  ;;  %v660_v25 = vsel %vm6927_vm5, 0, %v659_v19  ;;  %v715_v49 = vld [vmem:[#allocation2 + $0x44] sm:$0x1] }
  0xb6   : > { %v758_v0 = vpack.c.bf16 %v606_v58, %v606_v58  ;;  %v2338_v1 = vpack.c.b16 %v2308_v59, %v2307_v48  ;;  %1121 = vst [vmem:[#allocation2 + $0x1c] sm:$0xf] %v820_v62  ;;  %v498_v3 = vpop.f32.mrf.mxu0  ;;  %v1332_v4 = vrot.slane %v1331_v61, 4  ;;  %v1339_v7 = vshrl.u32 %v1227_v2, 16  ;;  %v2127_v28 = vld [vmem:[#allocation2 + $0x18] sm:$0xe] }
  0xb7   : > { %v1342_v8 = vshll.u32 %v1227_v2, 16  ;;  %1124 = vst [vmem:[#allocation2 + $0x20] sm:$0x1] %v1123_v63  ;;  %v499_v10 = vadd.f32 %v7008_v18, %v498_v3  ;;  %v6067_v39 = vrot.slane %v2127_v28, 9 }
  0xb8   : > { %v823_v9 = vshrl.u32 %v758_v0, 16  ;;  %2430 = vmatmul.bf16.gmra.mxu3 %v2338_v1  ;;  %v826_v14 = vshll.u32 %v758_v0, 16  ;;  %v1337_v15 = vsel %vm6991_vm12, %v1332_v4, %v1336_v6  ;;  %v1341_v16 = vrot.slane %v1339_v7, 4  ;;  %661 = vst [vmem:[#allocation2 + $0x3c] sm:$0x1] %v660_v25 }
  0xb9   : > { %v1344_v17 = vrot.slane %v1342_v8, 5  ;;  %v571_v23 = vmax.f32 %v499_v10, 0.0  ;;  %v1694_v24 = vunpack.c.l.b16 %v1337_v15  ;;  %v716_v0 = vsel %vm6935_vm6, 0, %v715_v49 }
  0xba   : > { %v825_v21 = vrot.slane %v823_v9, 7  ;;  %717 = vst [vmem:[#allocation2 + $0x44] sm:$0x1] %v716_v0 }
  0xbb   : > { %v607_v30 = vadd.f32 %v7017_v26, %v571_v23  ;;  %v1724_v31 = vpack.c.b16 %v1694_v24, %v1693_v11  ;;  %v1345_v32 = vor.u32 %v1344_v17, %v1341_v16  ;;  %v662_v24 = vld [vmem:[#allocation2 + $0x48] sm:$0x1] }
  0xbc   : > { %v828_v29 = vor.u32 %v826_v14, %v825_v21  ;;  %v829_v33 = vrot.slane %v825_v21, 4 }
  0xbd   : > { %v759_v35 = vpack.c.bf16 %v607_v30, %v607_v30  ;;  %1816 = vmatmul.bf16.gmra.mxu1 %v1724_v31  ;;  %v6647_v36 = vld [vmem:[#allocation2 + $0x18] sm:$0xff]  ;;  %v1346_v48 = vrot.slane %v1345_v32, 4 }
  0xbe   : > { %v1126_v34 = vsel %vm7032_vm13, %v828_v29, %v1125_v27  ;;  %v1228_v38 = vld [vmem:[#allocation2 + $0x1c] sm:$0xf]  ;;  %v501_v41 = vpop.f32.mrf.mxu0  ;;  %v1273_v42 = vld [vmem:[#allocation2 + $0x20] sm:$0x1]  ;;  %2054 = vmatmul.bf16.gmra.mxu2 %v6647_v36  ;;  %v663_v29 = vsel %vm6927_vm5, 0, %v662_v24 }
  0xbf   : > { %1127 = vst [vmem:[#allocation2 + $0x24] sm:$0xf] %v1126_v34  ;;  %v2192_v43 = vrot.slane %v1228_v38, 5  ;;  %v1348_v44 = vshll.u32 %v1228_v38, 16  ;;  %v831_v45 = vshrl.u32 %v759_v35, 16  ;;  %v502_v46 = vadd.f32 %v7008_v18, %v501_v41 }
  0xc0   : > { %v2195_v47 = vrot.slane %v1273_v42, 5  ;;  %v1352_v54 = vshrl.u32 %v1228_v38, 16  ;;  %v834_v57 = vshll.u32 %v759_v35, 16  ;;  %v1358_v63 = vshll.u32 %v1273_v42, 16  ;;  %664 = vst [vmem:[#allocation2 + $0x48] sm:$0x1] %v663_v29 }
  0xc1   : > { %v2193_v51 = vsel %vm6974_vm9, %v6067_v39, %v2192_v43  ;;  %v2194_v52 = vrot.slane %v2192_v43, 4  ;;  %v1350_v53 = vrot.slane %v1348_v44, 5  ;;  %v833_v55 = vrot.slane %v831_v45, 7  ;;  %5916 = vmatmul.msk.bf16.gmra.mxu0 %vm424_vm1, %v6640_v37  ;;  %v1132_v34 = vld [vmem:[#allocation2 + $0x30] sm:$0xf]  ;;  %v6641_v45 = vld [vmem:[%s6879_s12 + $0x60] sm:$0xff] }
  0xc2   : > { %v572_v58 = vmax.f32 %v502_v46, 0.0  ;;  %v2309_v59 = vunpack.c.l.b16 %v2193_v51  ;;  %v1354_v62 = vrot.slane %v1352_v54, 4  ;;  %v1360_v15 = vrot.slane %v1358_v63, 5 }
  0xc3   : > { %v2196_v61 = vsel %vm6974_vm9, %v2194_v52, %v2195_v47  ;;  %v836_v1 = vor.u32 %v834_v57, %v833_v55  ;;  %v838_v2 = vrot.slane %v833_v55, 4  ;;  %v1351_v6 = vsel %vm6991_vm12, %v1346_v48, %v1350_v53 }
  0xc4   : > { %v608_v3 = vadd.f32 %v7017_v26, %v572_v58  ;;  %v2310_v4 = vunpack.c.l.b16 %v2196_v61  ;;  %v1355_v7 = vor.u32 %v1354_v62, %v1350_v53  ;;  %v1695_v23 = vunpack.c.l.b16 %v1351_v6  ;;  %v718_v58 = vld [vmem:[#allocation2 + $0x50] sm:$0x1] }
  0xc5   : > { %v837_v8 = vsel %vm7045_vm15, %v829_v33, %v836_v1  ;;  %v1130_v9 = vsel %vm6927_vm5, %v838_v2, %v1129_v60 }
  0xc6   : > { %v760_v10 = vpack.c.bf16 %v608_v3, %v608_v3  ;;  %v2339_v11 = vpack.c.b16 %v2310_v4, %v2309_v59  ;;  %v1229_v12 = vld [vmem:[#allocation2 + $0x24] sm:$0xf]  ;;  %1128 = vst [vmem:[#allocation2 + $0x28] sm:$0xf] %v837_v8  ;;  %v503_v13 = vpop.f32.mrf.mxu0  ;;  %v1356_v14 = vrot.slane %v1355_v7, 4  ;;  %v719_v8 = vsel %vm6935_vm6, 0, %v718_v58 }
  0xc7   : > { %v1363_v16 = vshrl.u32 %v1229_v12, 16  ;;  %v1366_v17 = vshll.u32 %v1229_v12, 16  ;;  %1131 = vst [vmem:[#allocation2 + $0x2c] sm:$0x1] %v1130_v9  ;;  %v504_v21 = vadd.f32 %v7008_v18, %v503_v13  ;;  %v2128_v35 = vld [vmem:[#allocation2 + $0x24] sm:$0xe] }
  0xc8   : > { %v840_v19 = vshrl.u32 %v760_v10, 16  ;;  %2435 = vmatmul.bf16.gmra.mxu3 %v2339_v11  ;;  %v1361_v25 = vsel %vm6991_vm12, %v1356_v14, %v1360_v15  ;;  %v843_v31 = vshll.u32 %v760_v10, 16  ;;  %v6068_v47 = vrot.slane %v2128_v35, 9  ;;  %v1136_v3 = vld [vmem:[#allocation2 + $0x38] sm:$0x1] }
  0xc9   : > { %v1365_v27 = vrot.slane %v1363_v16, 4  ;;  %v1368_v28 = vrot.slane %v1366_v17, 5  ;;  %v573_v32 = vmax.f32 %v504_v21, 0.0  ;;  %v1696_v33 = vunpack.c.l.b16 %v1361_v25  ;;  %720 = vst [vmem:[#allocation2 + $0x50] sm:$0x1] %v719_v8 }
  0xca   : > { %v842_v30 = vrot.slane %v840_v19, 7 }
  0xcb   : > { %v609_v37 = vadd.f32 %v7017_v26, %v573_v32  ;;  %v1725_v38 = vpack.c.b16 %v1696_v33, %v1695_v23  ;;  %v1369_v39 = vor.u32 %v1368_v28, %v1365_v27  ;;  %v6706_v32 = vld [vmem:[%s8819_s4 + $0xe8] sm:$0xff] }
  0xcc   : > { %v845_v36 = vor.u32 %v843_v31, %v842_v30  ;;  %v846_v41 = vrot.slane %v842_v30, 4  ;;  %v6714_v33 = vld [vmem:[%s8819_s4 + $0x128] sm:$0xff]  ;;  %2733 = vmatpush.bf16.msrb.mxu0 %v6706_v32 }
  0xcd   : > { %v761_v43 = vpack.c.bf16 %v609_v37, %v609_v37  ;;  %1821 = vmatmul.bf16.gmra.mxu1 %v1725_v38  ;;  %v6648_v44 = vld [vmem:[#allocation2 + $0x24] sm:$0xff]  ;;  %v1370_v57 = vrot.slane %v1369_v39, 4  ;;  %v665_v38 = vld [vmem:[#allocation2 + $0x54] sm:$0x1] }
  0xce   : > { %v1133_v42 = vsel %vm7032_vm13, %v845_v36, %v1132_v34  ;;  %v1230_v46 = vld [vmem:[#allocation2 + $0x28] sm:$0xf]  ;;  %v506_v48 = vpop.f32.mrf.mxu0  ;;  %v1274_v49 = vld [vmem:[#allocation2 + $0x2c] sm:$0x1]  ;;  %2059 = vmatmul.bf16.gmra.mxu2 %v6648_v44  ;;  %3415 = vmatpush.bf16.msrb.mxu1 %v6714_v33  ;;  %v1139_v44 = vld [vmem:[#allocation2 + $0x3c] sm:$0xf] }
  0xcf   : > { %1134 = vst [vmem:[#allocation2 + $0x30] sm:$0xf] %v1133_v42  ;;  %v2199_v51 = vrot.slane %v1230_v46, 5  ;;  %v1372_v52 = vshll.u32 %v1230_v46, 16  ;;  %v848_v53 = vshrl.u32 %v761_v43, 16  ;;  %v507_v54 = vadd.f32 %v7008_v18, %v506_v48 }
  0xd0   : > { %v2202_v55 = vrot.slane %v1274_v49, 5  ;;  %v1376_v62 = vshrl.u32 %v1230_v46, 16  ;;  %v851_v0 = vshll.u32 %v761_v43, 16  ;;  %v1382_v7 = vshll.u32 %v1274_v49, 16 }
  0xd1   : > { %v2200_v59 = vsel %vm6974_vm9, %v6068_v47, %v2199_v51  ;;  %v2201_v60 = vrot.slane %v2199_v51, 4  ;;  %v1374_v61 = vrot.slane %v1372_v52, 5  ;;  %v850_v63 = vrot.slane %v848_v53, 7  ;;  %5917 = vmatmul.msk.bf16.gmra.mxu0 %vm424_vm1, %v6641_v45 }
  0xd2   : > { %v574_v1 = vmax.f32 %v507_v54, 0.0  ;;  %v2311_v2 = vunpack.c.l.b16 %v2200_v59  ;;  %v1378_v6 = vrot.slane %v1376_v62, 4  ;;  %v1384_v25 = vrot.slane %v1382_v7, 5 }
  0xd3   : > { %v2203_v4 = vsel %vm6974_vm9, %v2201_v60, %v2202_v55  ;;  %v853_v9 = vor.u32 %v851_v0, %v850_v63  ;;  %v855_v10 = vrot.slane %v850_v63, 4  ;;  %v1375_v13 = vsel %vm6991_vm12, %v1370_v57, %v1374_v61  ;;  %v6642_v55 = vld [vmem:[%s6879_s12 + $0x68] sm:$0xff] }
  0xd4   : > { %v610_v11 = vadd.f32 %v7017_v26, %v574_v1  ;;  %v2312_v12 = vunpack.c.l.b16 %v2203_v4  ;;  %v1379_v14 = vor.u32 %v1378_v6, %v1374_v61  ;;  %v1697_v31 = vunpack.c.l.b16 %v1375_v13 }
  0xd5   : > { %v854_v15 = vsel %vm7045_vm15, %v846_v41, %v853_v9  ;;  %v1137_v16 = vsel %vm6927_vm5, %v855_v10, %v1136_v3  ;;  %v666_v43 = vsel %vm6927_vm5, 0, %v665_v38  ;;  %v721_v3 = vld [vmem:[#allocation2 + $0x5c] sm:$0x1]  ;;  %v6705_v9 = vld [vmem:[%s8819_s4 + $0xe0] sm:$0xff] }
  0xd6   : > { %v762_v17 = vpack.c.bf16 %v610_v11, %v610_v11  ;;  %v2340_v19 = vpack.c.b16 %v2312_v12, %v2311_v2  ;;  %v1231_v21 = vld [vmem:[#allocation2 + $0x30] sm:$0xf]  ;;  %1135 = vst [vmem:[#allocation2 + $0x34] sm:$0xf] %v854_v15  ;;  %v508_v23 = vpop.f32.mrf.mxu0  ;;  %v1380_v24 = vrot.slane %v1379_v14, 4  ;;  %2734 = vmatpush.bf16.msrb.mxu0 %v6705_v9 }
  0xd7   : > { %v1387_v27 = vshrl.u32 %v1231_v21, 16  ;;  %v1390_v28 = vshll.u32 %v1231_v21, 16  ;;  %1138 = vst [vmem:[#allocation2 + $0x38] sm:$0x1] %v1137_v16  ;;  %v509_v30 = vadd.f32 %v7008_v18, %v508_v23  ;;  %v2129_v45 = vld [vmem:[#allocation2 + $0x30] sm:$0xe] }
  0xd8   : > { %v857_v29 = vshrl.u32 %v762_v17, 16  ;;  %2440 = vmatmul.bf16.gmra.mxu3 %v2340_v19  ;;  %v860_v34 = vshll.u32 %v762_v17, 16  ;;  %v1385_v35 = vsel %vm6991_vm12, %v1380_v24, %v1384_v25  ;;  %667 = vst [vmem:[#allocation2 + $0x54] sm:$0x1] %v666_v43  ;;  %v6069_v58 = vrot.slane %v2129_v45, 9 }
  0xd9   : > { %v1389_v36 = vrot.slane %v1387_v27, 4  ;;  %v1392_v37 = vrot.slane %v1390_v28, 5  ;;  %v575_v41 = vmax.f32 %v509_v30, 0.0  ;;  %v1698_v42 = vunpack.c.l.b16 %v1385_v35  ;;  %v1143_v14 = vld [vmem:[#allocation2 + $0x44] sm:$0x1] }
  0xda   : > { %v859_v39 = vrot.slane %v857_v29, 7  ;;  %v722_v19 = vsel %vm6935_vm6, 0, %v721_v3  ;;  %v6704_v29 = vld [vmem:[%s8819_s4 + $0xd8] sm:$0xff]  ;;  %v6643_v3 = vld [vmem:[%s6879_s12 + $0x70] sm:$0xff] }
  0xdb   : > { %v611_v47 = vadd.f32 %v7017_v26, %v575_v41  ;;  %v1726_v48 = vpack.c.b16 %v1698_v42, %v1697_v31  ;;  %v1393_v49 = vor.u32 %v1392_v37, %v1389_v36  ;;  %723 = vst [vmem:[#allocation2 + $0x5c] sm:$0x1] %v722_v19  ;;  %2735 = vmatpush.bf16.msrb.mxu0 %v6704_v29  ;;  %v1150_v29 = vld [vmem:[#allocation2 + $0x50] sm:$0x1] }
  0xdc   : > { %v862_v46 = vor.u32 %v860_v34, %v859_v39  ;;  %v863_v51 = vrot.slane %v859_v39, 4 }
  0xdd   : > { %v763_v53 = vpack.c.bf16 %v611_v47, %v611_v47  ;;  %1826 = vmatmul.bf16.gmra.mxu1 %v1726_v48  ;;  %v6649_v54 = vld [vmem:[#allocation2 + $0x30] sm:$0xff]  ;;  %v1394_v2 = vrot.slane %v1393_v49, 4 }
  0xde   : > { %v1140_v52 = vsel %vm7032_vm13, %v862_v46, %v1139_v44  ;;  %v1232_v57 = vld [vmem:[#allocation2 + $0x34] sm:$0xf]  ;;  %v511_v59 = vpop.f32.mrf.mxu0  ;;  %v1275_v60 = vld [vmem:[#allocation2 + $0x38] sm:$0x1]  ;;  %2064 = vmatmul.bf16.gmra.mxu2 %v6649_v54  ;;  %v668_v44 = vld [vmem:[#allocation2 + $0x60] sm:$0x1] }
  0xdf   : > { %1141 = vst [vmem:[#allocation2 + $0x3c] sm:$0xf] %v1140_v52  ;;  %v2206_v61 = vrot.slane %v1232_v57, 5  ;;  %v1396_v62 = vshll.u32 %v1232_v57, 16  ;;  %v865_v63 = vshrl.u32 %v763_v53, 16  ;;  %v512_v0 = vadd.f32 %v7008_v18, %v511_v59  ;;  %v6703_v49 = vld [vmem:[%s8819_s4 + $0xd0] sm:$0xff] }
  0xe0   : > { %v2209_v1 = vrot.slane %v1275_v60, 5  ;;  %v1400_v8 = vshrl.u32 %v1232_v57, 16  ;;  %v868_v11 = vshll.u32 %v763_v53, 16  ;;  %v1406_v17 = vshll.u32 %v1275_v60, 16  ;;  %2736 = vmatpush.bf16.msrb.mxu0 %v6703_v49 }
  0xe1   : > { %v2207_v4 = vsel %vm6974_vm9, %v6069_v58, %v2206_v61  ;;  %v2208_v6 = vrot.slane %v2206_v61, 4  ;;  %v1398_v7 = vrot.slane %v1396_v62, 5  ;;  %v867_v10 = vrot.slane %v865_v63, 7  ;;  %5918 = vmatmul.msk.bf16.gmra.mxu0 %vm424_vm1, %v6642_v55  ;;  %v1146_v55 = vld [vmem:[#allocation2 + $0x48] sm:$0xf] }
  0xe2   : > { %v576_v12 = vmax.f32 %v512_v0, 0.0  ;;  %v2313_v13 = vunpack.c.l.b16 %v2207_v4  ;;  %v1402_v16 = vrot.slane %v1400_v8, 4  ;;  %v1408_v37 = vrot.slane %v1406_v17, 5  ;;  %v6702_v62 = vld [vmem:[%s8819_s4 + $0xc8] sm:$0xff] }
  0xe3   : > { %v2210_v15 = vsel %vm6974_vm9, %v2208_v6, %v2209_v1  ;;  %v870_v21 = vor.u32 %v868_v11, %v867_v10  ;;  %v872_v23 = vrot.slane %v867_v10, 4  ;;  %v1399_v27 = vsel %vm6991_vm12, %v1394_v2, %v1398_v7 }
  0xe4   : > { %v612_v24 = vadd.f32 %v7017_v26, %v576_v12  ;;  %v2314_v25 = vunpack.c.l.b16 %v2210_v15  ;;  %v1403_v28 = vor.u32 %v1402_v16, %v1398_v7  ;;  %v1699_v43 = vunpack.c.l.b16 %v1399_v27  ;;  %2737 = vmatpush.bf16.msrb.mxu0 %v6702_v62  ;;  %v724_v15 = vld [vmem:[#allocation2 + $0x68] sm:$0x1] }
  0xe5   : > { %v871_v30 = vsel %vm7045_vm15, %v863_v51, %v870_v21  ;;  %v1144_v31 = vsel %vm6927_vm5, %v872_v23, %v1143_v14  ;;  %v669_v48 = vsel %vm6927_vm5, 0, %v668_v44  ;;  %v6701_v23 = vld [vmem:[%s8819_s4 + $0xc0] sm:$0xff] }
  0xe6   : > { %v764_v32 = vpack.c.bf16 %v612_v24, %v612_v24  ;;  %v2341_v33 = vpack.c.b16 %v2314_v25, %v2313_v13  ;;  %v1233_v34 = vld [vmem:[#allocation2 + $0x3c] sm:$0xf]  ;;  %1142 = vst [vmem:[#allocation2 + $0x40] sm:$0xf] %v871_v30  ;;  %v513_v35 = vpop.f32.mrf.mxu0  ;;  %v1404_v36 = vrot.slane %v1403_v28, 4 }
  0xe7   : > { %v1411_v38 = vshrl.u32 %v1233_v34, 16  ;;  %v1414_v39 = vshll.u32 %v1233_v34, 16  ;;  %1145 = vst [vmem:[#allocation2 + $0x44] sm:$0x1] %v1144_v31  ;;  %v514_v42 = vadd.f32 %v7008_v18, %v513_v35  ;;  %v2130_v57 = vld [vmem:[#allocation2 + $0x3c] sm:$0xe] }
  0xe8   : > { %v874_v41 = vshrl.u32 %v764_v32, 16  ;;  %2445 = vmatmul.bf16.gmra.mxu3 %v2341_v33  ;;  %v1409_v45 = vsel %vm6991_vm12, %v1404_v36, %v1408_v37  ;;  %v877_v52 = vshll.u32 %v764_v32, 16  ;;  %670 = vst [vmem:[#allocation2 + $0x60] sm:$0x1] %v669_v48  ;;  %v6070_v6 = vrot.slane %v2130_v57, 9  ;;  %2738 = vmatpush.bf16.msrb.mxu0 %v6701_v23 }
  0xe9   : > { %v1413_v46 = vrot.slane %v1411_v38, 4  ;;  %v1416_v47 = vrot.slane %v1414_v39, 5  ;;  %v577_v53 = vmax.f32 %v514_v42, 0.0  ;;  %v1700_v54 = vunpack.c.l.b16 %v1409_v45 }
  0xea   : > { %v876_v51 = vrot.slane %v874_v41, 7  ;;  %v725_v33 = vsel %vm6935_vm6, 0, %v724_v15 }
  0xeb   : > { %v613_v59 = vadd.f32 %v7017_v26, %v577_v53  ;;  %v1727_v60 = vpack.c.b16 %v1700_v54, %v1699_v43  ;;  %v1417_v61 = vor.u32 %v1416_v47, %v1413_v46  ;;  %726 = vst [vmem:[#allocation2 + $0x68] sm:$0x1] %v725_v33 }
  0xec   : > { %v879_v58 = vor.u32 %v877_v52, %v876_v51  ;;  %v880_v63 = vrot.slane %v876_v51, 4 }
  0xed   : > { %v765_v1 = vpack.c.bf16 %v613_v59, %v613_v59  ;;  %1831 = vmatmul.bf16.gmra.mxu1 %v1727_v60  ;;  %v6650_v2 = vld [vmem:[#allocation2 + $0x3c] sm:$0xff]  ;;  %v1418_v14 = vrot.slane %v1417_v61, 4  ;;  %v671_v61 = vld [vmem:[#allocation2 + $0x6c] sm:$0x1] }
  0xee   : > { %v1147_v0 = vsel %vm7032_vm13, %v879_v58, %v1146_v55  ;;  %v1234_v4 = vld [vmem:[#allocation2 + $0x40] sm:$0xf]  ;;  %v516_v7 = vpop.f32.mrf.mxu0  ;;  %v1276_v8 = vld [vmem:[#allocation2 + $0x44] sm:$0x1]  ;;  %2069 = vmatmul.bf16.gmra.mxu2 %v6650_v2  ;;  %v1153_v2 = vld [vmem:[#allocation2 + $0x54] sm:$0xf] }
  0xef   : > { %1148 = vst [vmem:[#allocation2 + $0x48] sm:$0xf] %v1147_v0  ;;  %v2213_v9 = vrot.slane %v1234_v4, 5  ;;  %v1420_v10 = vshll.u32 %v1234_v4, 16  ;;  %v882_v11 = vshrl.u32 %v765_v1, 16  ;;  %v517_v12 = vadd.f32 %v7008_v18, %v516_v7  ;;  %v6713_v55 = vld [vmem:[%s8819_s4 + $0x120] sm:$0xff] }
  0xf0   : > { %v2216_v13 = vrot.slane %v1276_v8, 5  ;;  %v1424_v21 = vshrl.u32 %v1234_v4, 16  ;;  %v885_v25 = vshll.u32 %v765_v1, 16  ;;  %v1430_v32 = vshll.u32 %v1276_v8, 16  ;;  %3416 = vmatpush.bf16.msrb.mxu1 %v6713_v55 }
  0xf1   : > { %v2214_v16 = vsel %vm6974_vm9, %v6070_v6, %v2213_v9  ;;  %v2215_v17 = vrot.slane %v2213_v9, 4  ;;  %v1422_v19 = vrot.slane %v1420_v10, 5  ;;  %v884_v24 = vrot.slane %v882_v11, 7  ;;  %5919 = vmatmul.msk.bf16.gmra.mxu0 %vm424_vm1, %v6643_v3 }
  0xf2   : > { %v578_v27 = vmax.f32 %v517_v12, 0.0  ;;  %v2315_v28 = vunpack.c.l.b16 %v2214_v16  ;;  %v1426_v31 = vrot.slane %v1424_v21, 4  ;;  %v1432_v48 = vrot.slane %v1430_v32, 5 }
  0xf3   : > { %v2217_v30 = vsel %vm6974_vm9, %v2215_v17, %v2216_v13  ;;  %v887_v34 = vor.u32 %v885_v25, %v884_v24  ;;  %v889_v35 = vrot.slane %v884_v24, 4  ;;  %v1423_v38 = vsel %vm6991_vm12, %v1418_v14, %v1422_v19  ;;  %v6644_v13 = vld [vmem:[%s6879_s12 + $0x78] sm:$0xff] }
  0xf4   : > { %v614_v36 = vadd.f32 %v7017_v26, %v578_v27  ;;  %v2316_v37 = vunpack.c.l.b16 %v2217_v30  ;;  %v1427_v39 = vor.u32 %v1426_v31, %v1422_v19  ;;  %v1701_v54 = vunpack.c.l.b16 %v1423_v38 }
  0xf5   : > { %v888_v41 = vsel %vm7045_vm15, %v880_v63, %v887_v34  ;;  %v1151_v42 = vsel %vm6927_vm5, %v889_v35, %v1150_v29  ;;  %v672_v1 = vsel %vm6927_vm5, 0, %v671_v61 }
  0xf6   : > { %v766_v43 = vpack.c.bf16 %v614_v36, %v614_v36  ;;  %v2342_v44 = vpack.c.b16 %v2316_v37, %v2315_v28  ;;  %v1235_v45 = vld [vmem:[#allocation2 + $0x48] sm:$0xf]  ;;  %1149 = vst [vmem:[#allocation2 + $0x4c] sm:$0xf] %v888_v41  ;;  %v518_v46 = vpop.f32.mrf.mxu0  ;;  %v1428_v47 = vrot.slane %v1427_v39, 4 }
  0xf7   : > { %v1435_v49 = vshrl.u32 %v1235_v45, 16  ;;  %v1438_v51 = vshll.u32 %v1235_v45, 16  ;;  %1152 = vst [vmem:[#allocation2 + $0x50] sm:$0x1] %v1151_v42  ;;  %v519_v53 = vadd.f32 %v7008_v18, %v518_v46  ;;  %v2131_v3 = vld [vmem:[#allocation2 + $0x48] sm:$0xe] }
  0xf8   : > { %v891_v52 = vshrl.u32 %v766_v43, 16  ;;  %2450 = vmatmul.bf16.gmra.mxu3 %v2342_v44  ;;  %v894_v57 = vshll.u32 %v766_v43, 16  ;;  %v1433_v58 = vsel %vm6991_vm12, %v1428_v47, %v1432_v48  ;;  %673 = vst [vmem:[#allocation2 + $0x6c] sm:$0x1] %v672_v1  ;;  %v6071_v15 = vrot.slane %v2131_v3, 9 }
  0xf9   : > { %v1437_v59 = vrot.slane %v1435_v49, 4  ;;  %v1440_v60 = vrot.slane %v1438_v51, 5  ;;  %v579_v63 = vmax.f32 %v519_v53, 0.0  ;;  %v1702_v0 = vunpack.c.l.b16 %v1433_v58  ;;  %v727_v28 = vld [vmem:[#allocation2 + $0x74] sm:$0x1] }
  0xfa   : > { %v893_v62 = vrot.slane %v891_v52, 7  ;;  %v1157_v37 = vld [vmem:[#allocation2 + $0x5c] sm:$0x1]  ;;  %v728_v42 = vsel %vm6935_vm6, 0, %v727_v28 }
  0xfb   : > { %v615_v6 = vadd.f32 %v7017_v26, %v579_v63  ;;  %v1728_v7 = vpack.c.b16 %v1702_v0, %v1701_v54  ;;  %v1441_v8 = vor.u32 %v1440_v60, %v1437_v59  ;;  %729 = vst [vmem:[#allocation2 + $0x74] sm:$0x1] %v728_v42  ;;  %v674_v63 = vld [vmem:[#allocation2 + $0x78] sm:$0x1] }
  0xfc   : > { %v896_v4 = vor.u32 %v894_v57, %v893_v62  ;;  %v897_v9 = vrot.slane %v893_v62, 4 }
  0xfd   : > { %v767_v11 = vpack.c.bf16 %v615_v6, %v615_v6  ;;  %1836 = vmatmul.bf16.gmra.mxu1 %v1728_v7  ;;  %v6651_v12 = vld [vmem:[#allocation2 + $0x48] sm:$0xff]  ;;  %v1442_v27 = vrot.slane %v1441_v8, 4 }
  0xfe   : > { %v1154_v10 = vsel %vm7032_vm13, %v896_v4, %v1153_v2  ;;  %v1236_v14 = vld [vmem:[#allocation2 + $0x4c] sm:$0xf]  ;;  %v521_v16 = vpop.f32.mrf.mxu0  ;;  %v1277_v17 = vld [vmem:[#allocation2 + $0x50] sm:$0x1]  ;;  %2074 = vmatmul.bf16.gmra.mxu2 %v6651_v12  ;;  %v675_v4 = vsel %vm6927_vm5, 0, %v674_v63 }
  0xff   : > { %1155 = vst [vmem:[#allocation2 + $0x54] sm:$0xf] %v1154_v10  ;;  %v2220_v19 = vrot.slane %v1236_v14, 5  ;;  %v1444_v21 = vshll.u32 %v1236_v14, 16  ;;  %v899_v23 = vshrl.u32 %v767_v11, 16  ;;  %v522_v24 = vadd.f32 %v7008_v18, %v521_v16  ;;  %v1812_v16 = vpop.f32.mrf.mxu1 }
 0x100   : > { %v2223_v25 = vrot.slane %v1277_v17, 5  ;;  %v1448_v32 = vshrl.u32 %v1236_v14, 16  ;;  %v902_v34 = vshll.u32 %v767_v11, 16  ;;  %v1454_v41 = vshll.u32 %v1277_v17, 16  ;;  %676 = vst [vmem:[#allocation2 + $0x78] sm:$0x1] %v675_v4  ;;  %v2045_v17 = vpop.f32.mrf.mxu2 }
 0x101   : > { %v2221_v29 = vsel %vm6974_vm9, %v6071_v15, %v2220_v19  ;;  %v2222_v30 = vrot.slane %v2220_v19, 4  ;;  %v1446_v31 = vrot.slane %v1444_v21, 5  ;;  %v901_v33 = vrot.slane %v899_v23, 7  ;;  %5920 = vmatmul.msk.bf16.gmra.mxu0 %vm424_vm1, %v6644_v13  ;;  %v1160_v10 = vld [vmem:[#allocation2 + $0x60] sm:$0xf] }
 0x102   : > { %v580_v35 = vmax.f32 %v522_v24, 0.0  ;;  %v2317_v36 = vunpack.c.l.b16 %v2221_v29  ;;  %v1450_v39 = vrot.slane %v1448_v32, 4  ;;  %v1456_v58 = vrot.slane %v1454_v41, 5 }
 0x103   : > { %v2224_v38 = vsel %vm6974_vm9, %v2222_v30, %v2223_v25  ;;  %v904_v43 = vor.u32 %v902_v34, %v901_v33  ;;  %v906_v44 = vrot.slane %v901_v33, 4  ;;  %v1447_v47 = vsel %vm6991_vm12, %v1442_v27, %v1446_v31  ;;  %v7242_v33 = vld [vmem:[%s8817_s2] ss:$0 sm:$0xff] }
 0x104   : > { %v616_v45 = vadd.f32 %v7017_v26, %v580_v35  ;;  %v2318_v46 = vunpack.c.l.b16 %v2224_v38  ;;  %v1451_v48 = vor.u32 %v1450_v39, %v1446_v31  ;;  %v1703_v62 = vunpack.c.l.b16 %v1447_v47  ;;  %v6685_v35 = vld [vmem:[#allocation2 + $0xc] sm:$0xff]  ;;  %v2426_v47 = vpop.f32.mrf.mxu3 }
 0x105   : > { %v905_v49 = vsel %vm7045_vm15, %v897_v9, %v904_v43  ;;  %v1158_v51 = vsel %vm6927_vm5, %v906_v44, %v1157_v37  ;;  %v2046_v27 = vadd.f32 %v2045_v17, %v1812_v16  ;;  %v677_v16 = vld [vmem:[#allocation2 + $0x84] sm:$0x1] }
 0x106   : > { %v768_v52 = vpack.c.bf16 %v616_v45, %v616_v45  ;;  %v2343_v53 = vpack.c.b16 %v2318_v46, %v2317_v36  ;;  %v1237_v54 = vld [vmem:[#allocation2 + $0x54] sm:$0xf]  ;;  %1156 = vst [vmem:[#allocation2 + $0x58] sm:$0xf] %v905_v49  ;;  %v523_v55 = vpop.f32.mrf.mxu0  ;;  %v1452_v57 = vrot.slane %v1451_v48, 4 }
 0x107   : > { %v1459_v26 = vshrl.u32 %v1237_v54, 16  ;;  %v1462_v59 = vshll.u32 %v1237_v54, 16  ;;  %1159 = vst [vmem:[#allocation2 + $0x5c] sm:$0x1] %v1158_v51  ;;  %v524_v61 = vadd.f32 %v7008_v18, %v523_v55  ;;  %v2132_v1 = vld [vmem:[#allocation2 + $0x54] sm:$0xe]  ;;  %v7249_v54 = vadd.f32 %v2426_v47, %v2046_v27 }
 0x108   : > { %v908_v60 = vshrl.u32 %v768_v52, 16  ;;  %2455 = vmatmul.bf16.gmra.mxu3 %v2343_v53  ;;  %v1457_v0 = vsel %vm6991_vm12, %v1452_v57, %v1456_v58  ;;  %v911_v7 = vshll.u32 %v768_v52, 16  ;;  %v7234_v18 = vld [vmem:[%s8818_s3] ss:$0 sm:$0xff]  ;;  %v6072_v15 = vrot.slane %v2132_v1, 9  ;;  %v6686_v47 = vld [vmem:[#allocation2 + $0x18] sm:$0xff] }
 0x109   : > { %v1461_v2 = vrot.slane %v1459_v26, 4  ;;  %v1464_v3 = vrot.slane %v1462_v59, 5  ;;  %v581_v8 = vmax.f32 %v524_v61, 0.0  ;;  %v1704_v9 = vunpack.c.l.b16 %v1457_v0  ;;  %v730_v48 = vld [vmem:[#allocation2 + $0x80] sm:$0x1] }
 0x10a   : > { %v910_v6 = vrot.slane %v908_v60, 7  ;;  %v1164_v49 = vld [vmem:[#allocation2 + $0x68] sm:$0x1]  ;;  %v731_v61 = vsel %vm6935_vm6, 0, %v730_v48  ;;  %v678_v27 = vsel %vm6927_vm5, 0, %v677_v16 }
 0x10b   : > { %v617_v12 = vadd.f32 %v7234_v18, %v581_v8  ;;  %v1729_v13 = vpack.c.b16 %v1704_v9, %v1703_v62  ;;  %v1465_v14 = vor.u32 %v1464_v3, %v1461_v2  ;;  %732 = vst [vmem:[#allocation2 + $0x80] sm:$0x1] %v731_v61 }
 0x10c   : > { %v913_v11 = vor.u32 %v911_v7, %v910_v6  ;;  %v914_v19 = vrot.slane %v910_v6, 4  ;;  %679 = vst [vmem:[#allocation2 + $0x84] sm:$0x1] %v678_v27 }
 0x10d   : > { %v769_v23 = vpack.c.bf16 %v617_v12, %v617_v12  ;;  %1841 = vmatmul.bf16.gmra.mxu1 %v1729_v13  ;;  %v6652_v24 = vld [vmem:[#allocation2 + $0x54] sm:$0xff]  ;;  %v1466_v37 = vrot.slane %v1465_v14, 4 }
 0x10e   : > { %v1161_v21 = vsel %vm7032_vm13, %v913_v11, %v1160_v10  ;;  %v1238_v25 = vld [vmem:[#allocation2 + $0x58] sm:$0xf]  ;;  %v526_v28 = vpop.f32.mrf.mxu0  ;;  %v1278_v29 = vld [vmem:[#allocation2 + $0x5c] sm:$0x1]  ;;  %2079 = vmatmul.bf16.gmra.mxu2 %v6652_v24  ;;  %v1167_v24 = vld [vmem:[#allocation2 + $0x6c] sm:$0xf] }
 0x10f   : > { %1162 = vst [vmem:[#allocation2 + $0x60] sm:$0xf] %v1161_v21  ;;  %v2227_v30 = vrot.slane %v1238_v25, 5  ;;  %v1468_v31 = vshll.u32 %v1238_v25, 16  ;;  %v916_v32 = vshrl.u32 %v769_v23, 16  ;;  %v527_v34 = vadd.f32 %v7242_v33, %v526_v28  ;;  %v6712_v11 = vld [vmem:[%s8819_s4 + $0x118] sm:$0xff] }
 0x110   : > { %v2230_v36 = vrot.slane %v1278_v29, 5  ;;  %v1472_v42 = vshrl.u32 %v1238_v25, 16  ;;  %v919_v44 = vshll.u32 %v769_v23, 16  ;;  %v1478_v53 = vshll.u32 %v1278_v29, 16  ;;  %3417 = vmatpush.bf16.msrb.mxu1 %v6712_v11 }
 0x111   : > { %v2228_v38 = vsel %vm6974_vm9, %v6072_v15, %v2227_v30  ;;  %v2229_v39 = vrot.slane %v2227_v30, 4  ;;  %v1470_v41 = vrot.slane %v1468_v31, 5  ;;  %v918_v43 = vrot.slane %v916_v32, 7  ;;  %2739 = vmatmul.bf16.vlgmr.msrb.gmra.mxu0 %v6685_v35 }
 0x112   : > { %v582_v45 = vmax.f32 %v527_v34, 0.0  ;;  %v2319_v46 = vunpack.c.l.b16 %v2228_v38  ;;  %v1474_v52 = vrot.slane %v1472_v42, 4  ;;  %v1480_v6 = vrot.slane %v1478_v53, 5 }
 0x113   : > { %v2231_v51 = vsel %vm6974_vm9, %v2229_v39, %v2230_v36  ;;  %v921_v55 = vor.u32 %v919_v44, %v918_v43  ;;  %v923_v57 = vrot.slane %v918_v43, 4  ;;  %v1471_v59 = vsel %vm6991_vm12, %v1466_v37, %v1470_v41 }
 0x114   : > { %v618_v58 = vadd.f32 %v7234_v18, %v582_v45  ;;  %v2320_v26 = vunpack.c.l.b16 %v2231_v51  ;;  %v1475_v60 = vor.u32 %v1474_v52, %v1470_v41  ;;  %v1705_v14 = vunpack.c.l.b16 %v1471_v59 }
 0x115   : > { %v922_v62 = vsel %vm7045_vm15, %v914_v19, %v921_v55  ;;  %v1165_v63 = vsel %vm6927_vm5, %v923_v57, %v1164_v49  ;;  %v733_v49 = vld [vmem:[#allocation2 + $0x8c] sm:$0x1] }
 0x116   : > { %v770_v0 = vpack.c.bf16 %v618_v58, %v618_v58  ;;  %v2344_v1 = vpack.c.b16 %v2320_v26, %v2319_v46  ;;  %v1239_v2 = vld [vmem:[#allocation2 + $0x60] sm:$0xf]  ;;  %1163 = vst [vmem:[#allocation2 + $0x64] sm:$0xf] %v922_v62  ;;  %v528_v3 = vpop.f32.mrf.mxu0  ;;  %v1476_v4 = vrot.slane %v1475_v60, 4 }
 0x117   : > { %v1483_v7 = vshrl.u32 %v1239_v2, 16  ;;  %1166 = vst [vmem:[#allocation2 + $0x68] sm:$0x1] %v1165_v63  ;;  %v529_v9 = vadd.f32 %v7242_v33, %v528_v3  ;;  %v1486_v10 = vshll.u32 %v1239_v2, 16  ;;  %v2133_v25 = vld [vmem:[#allocation2 + $0x60] sm:$0xe] }
 0x118   : > { %v925_v8 = vshrl.u32 %v770_v0, 16  ;;  %2460 = vmatmul.bf16.gmra.mxu3 %v2344_v1  ;;  %v928_v12 = vshll.u32 %v770_v0, 16  ;;  %v1481_v13 = vsel %vm6991_vm12, %v1476_v4, %v1480_v6  ;;  %v6073_v38 = vrot.slane %v2133_v25, 9  ;;  %v1171_v60 = vld [vmem:[#allocation2 + $0x74] sm:$0x1] }
 0x119   : > { %v1485_v15 = vrot.slane %v1483_v7, 4  ;;  %v583_v19 = vmax.f32 %v529_v9, 0.0  ;;  %v1706_v21 = vunpack.c.l.b16 %v1481_v13  ;;  %v1488_v23 = vrot.slane %v1486_v10, 5 }
 0x11a   : > { %v927_v17 = vrot.slane %v925_v8, 7  ;;  %v734_v0 = vsel %vm6935_vm6, 0, %v733_v49 }
 0x11b   : > { %v619_v29 = vadd.f32 %v7234_v18, %v583_v19  ;;  %v1730_v30 = vpack.c.b16 %v1706_v21, %v1705_v14  ;;  %v1489_v31 = vor.u32 %v1488_v23, %v1485_v15  ;;  %735 = vst [vmem:[#allocation2 + $0x8c] sm:$0x1] %v734_v0  ;;  %v6724_v21 = vld [vmem:[%s8819_s4 + $0x178] sm:$0xff] }
 0x11c   : > { %v930_v28 = vor.u32 %v928_v12, %v927_v17  ;;  %v931_v32 = vrot.slane %v927_v17, 4  ;;  %v6748_v23 = vld [vmem:[%s8819_s4 + $0x1b8] sm:$0xff]  ;;  %3839 = vmatpush.bf16.msrb.mxu2 %v6724_v21 }
 0x11d   : > { %v771_v35 = vpack.c.bf16 %v619_v29, %v619_v29  ;;  %1846 = vmatmul.bf16.gmra.mxu1 %v1730_v30  ;;  %v6653_v36 = vld [vmem:[#allocation2 + $0x60] sm:$0xff]  ;;  %v1490_v43 = vrot.slane %v1489_v31, 4  ;;  %v680_v29 = vld [vmem:[#allocation2 + $0x90] sm:$0x1]  ;;  %v1174_v31 = vld [vmem:[#allocation2 + $0x78] sm:$0xf]  ;;  %4154 = vmatpush.bf16.msrb.mxu3 %v6748_v23 }
 0x11e   : > { %v1168_v34 = vsel %vm7032_vm13, %v930_v28, %v1167_v24  ;;  %v1240_v37 = vld [vmem:[#allocation2 + $0x64] sm:$0xf]  ;;  %v531_v39 = vpop.f32.mrf.mxu0  ;;  %v1279_v41 = vld [vmem:[#allocation2 + $0x68] sm:$0x1]  ;;  %2084 = vmatmul.bf16.gmra.mxu2 %v6653_v36  ;;  %v7296_v36 = vpop.f32.mrf.mxu2 }
 0x11f   : > { %1169 = vst [vmem:[#allocation2 + $0x6c] sm:$0xf] %v1168_v34  ;;  %v2234_v42 = vrot.slane %v1240_v37, 5  ;;  %v933_v44 = vshrl.u32 %v771_v35, 16  ;;  %v936_v45 = vshll.u32 %v771_v35, 16  ;;  %v532_v46 = vadd.f32 %v7242_v33, %v531_v39 }
 0x120   : > { %v2237_v48 = vrot.slane %v1279_v41, 5  ;;  %v1492_v53 = vshll.u32 %v1240_v37, 16  ;;  %v1496_v55 = vshrl.u32 %v1240_v37, 16  ;;  %v1502_v59 = vshll.u32 %v1279_v41, 16 }
 0x121   : > { %v2235_v51 = vsel %vm6974_vm9, %v6073_v38, %v2234_v42  ;;  %v2236_v52 = vrot.slane %v2234_v42, 4  ;;  %v935_v57 = vrot.slane %v933_v44, 7  ;;  %v584_v58 = vmax.f32 %v532_v46, 0.0  ;;  %2744 = vmatmul.bf16.gmra.mxu0 %v6686_v47 }
 0x122   : > { %v2321_v26 = vunpack.c.l.b16 %v2235_v51  ;;  %v1494_v62 = vrot.slane %v1492_v53, 5  ;;  %v1498_v63 = vrot.slane %v1496_v55, 4  ;;  %v1504_v15 = vrot.slane %v1502_v59, 5  ;;  %v6687_v59 = vld [vmem:[#allocation2 + $0x24] sm:$0xff] }
 0x123   : > { %v2238_v61 = vsel %vm6974_vm9, %v2236_v52, %v2237_v48  ;;  %v938_v1 = vor.u32 %v936_v45, %v935_v57  ;;  %v940_v2 = vrot.slane %v935_v57, 4  ;;  %v620_v3 = vadd.f32 %v7234_v18, %v584_v58 }
 0x124   : > { %v2322_v4 = vunpack.c.l.b16 %v2238_v61  ;;  %v1495_v6 = vsel %vm6991_vm12, %v1490_v43, %v1494_v62  ;;  %v1499_v7 = vor.u32 %v1498_v63, %v1494_v62  ;;  %v681_v35 = vsel %vm6927_vm5, 0, %v680_v29  ;;  %v736_v61 = vld [vmem:[#allocation2 + $0x98] sm:$0x1] }
 0x125   : > { %v939_v8 = vsel %vm7045_vm15, %v931_v32, %v938_v1  ;;  %v1172_v9 = vsel %vm6927_vm5, %v940_v2, %v1171_v60  ;;  %v772_v10 = vpack.c.bf16 %v620_v3, %v620_v3  ;;  %v1707_v27 = vunpack.c.l.b16 %v1495_v6  ;;  %682 = vst [vmem:[#allocation2 + $0x90] sm:$0x1] %v681_v35  ;;  %v7304_v3 = vpop.f32.mrf.mxu1 }
 0x126   : > { %v2345_v11 = vpack.c.b16 %v2322_v4, %v2321_v26  ;;  %v1241_v12 = vld [vmem:[#allocation2 + $0x6c] sm:$0xf]  ;;  %1170 = vst [vmem:[#allocation2 + $0x70] sm:$0xf] %v939_v8  ;;  %v533_v13 = vpop.f32.mrf.mxu0  ;;  %v1500_v14 = vrot.slane %v1499_v7, 4 }
 0x127   : > { %v1507_v16 = vshrl.u32 %v1241_v12, 16  ;;  %1173 = vst [vmem:[#allocation2 + $0x74] sm:$0x1] %v1172_v9  ;;  %v942_v17 = vshrl.u32 %v772_v10, 16  ;;  %v534_v19 = vadd.f32 %v7242_v33, %v533_v13  ;;  %v945_v24 = vshll.u32 %v772_v10, 16  ;;  %v7306_v9 = vpop.f32.mrf.mxu3 }
 0x128   : > { %2465 = vmatmul.bf16.gmra.mxu3 %v2345_v11  ;;  %v1505_v25 = vsel %vm6991_vm12, %v1500_v14, %v1504_v15  ;;  %v1510_v28 = vshll.u32 %v1241_v12, 16  ;;  %v2134_v37 = vld [vmem:[#allocation2 + $0x6c] sm:$0xe]  ;;  %v1178_v8 = vld [vmem:[#allocation2 + $0x80] sm:$0x1]  ;;  %v737_v14 = vsel %vm6935_vm6, 0, %v736_v61 }
 0x129   : > { %v944_v30 = vrot.slane %v942_v17, 7  ;;  %v585_v32 = vmax.f32 %v534_v19, 0.0  ;;  %v1708_v34 = vunpack.c.l.b16 %v1505_v25  ;;  %v1509_v38 = vrot.slane %v1507_v16, 4  ;;  %738 = vst [vmem:[#allocation2 + $0x98] sm:$0x1] %v737_v14 }
 0x12a   : > { %v1512_v39 = vrot.slane %v1510_v28, 5  ;;  %v6074_v48 = vrot.slane %v2134_v37, 9 }
 0x12b   : > { %v947_v41 = vor.u32 %v945_v24, %v944_v30  ;;  %v621_v42 = vadd.f32 %v7234_v18, %v585_v32  ;;  %v1731_v43 = vpack.c.b16 %v1708_v34, %v1707_v27  ;;  %v948_v49 = vrot.slane %v944_v30, 4 }
 0x12c   : > { %v1513_v55 = vor.u32 %v1512_v39, %v1509_v38 }
 0x12d   : > { %v1175_v44 = vsel %vm7032_vm13, %v947_v41, %v1174_v31  ;;  %v773_v45 = vpack.c.bf16 %v621_v42, %v621_v42  ;;  %1851 = vmatmul.bf16.gmra.mxu1 %v1731_v43  ;;  %v6654_v46 = vld [vmem:[#allocation2 + $0x6c] sm:$0xff]  ;;  %v683_v43 = vld [vmem:[#allocation2 + $0x9c] sm:$0x1] }
 0x12e   : > { %v1242_v47 = vld [vmem:[#allocation2 + $0x70] sm:$0xf]  ;;  %1176 = vst [vmem:[#allocation2 + $0x78] sm:$0xf] %v1175_v44  ;;  %v536_v51 = vpop.f32.mrf.mxu0  ;;  %v1280_v52 = vld [vmem:[#allocation2 + $0x74] sm:$0x1]  ;;  %2089 = vmatmul.bf16.gmra.mxu2 %v6654_v46 }
 0x12f   : > { %v2241_v53 = vrot.slane %v1242_v47, 5  ;;  %v950_v57 = vshrl.u32 %v773_v45, 16  ;;  %v953_v58 = vshll.u32 %v773_v45, 16  ;;  %v537_v26 = vadd.f32 %v7242_v33, %v536_v51  ;;  %v6711_v41 = vld [vmem:[%s8819_s4 + $0x110] sm:$0xff] }
 0x130   : > { %v2244_v60 = vrot.slane %v1280_v52, 5  ;;  %v1516_v0 = vshll.u32 %v1242_v47, 16  ;;  %v1520_v1 = vshrl.u32 %v1242_v47, 16  ;;  %v1526_v7 = vshll.u32 %v1280_v52, 16  ;;  %3418 = vmatpush.bf16.msrb.mxu1 %v6711_v41 }
 0x131   : > { %v2242_v62 = vsel %vm6974_vm9, %v6074_v48, %v2241_v53  ;;  %v2243_v63 = vrot.slane %v2241_v53, 4  ;;  %v952_v2 = vrot.slane %v950_v57, 7  ;;  %v586_v4 = vmax.f32 %v537_v26, 0.0  ;;  %2749 = vmatmul.bf16.gmra.mxu0 %v6687_v59  ;;  %v2050_v10 = vpop.f32.mrf.mxu2  ;;  %v1181_v48 = vld [vmem:[#allocation2 + $0x84] sm:$0xf] }
 0x132   : > { %v2323_v6 = vunpack.c.l.b16 %v2242_v62  ;;  %v1518_v12 = vrot.slane %v1516_v0, 5  ;;  %v1522_v13 = vrot.slane %v1520_v1, 4  ;;  %v1514_v21 = vrot.slane %v1513_v55, 4 }
 0x133   : > { %v2245_v11 = vsel %vm6974_vm9, %v2243_v63, %v2244_v60  ;;  %v955_v15 = vor.u32 %v953_v58, %v952_v2  ;;  %v957_v16 = vrot.slane %v952_v2, 4  ;;  %v622_v17 = vadd.f32 %v7234_v18, %v586_v4 }
 0x134   : > { %v2324_v19 = vunpack.c.l.b16 %v2245_v11  ;;  %v1523_v23 = vor.u32 %v1522_v13, %v1518_v12  ;;  %v1528_v32 = vrot.slane %v1526_v7, 5  ;;  %v1519_v38 = vsel %vm6991_vm12, %v1514_v21, %v1518_v12 }
 0x135   : > { %v956_v24 = vsel %vm7045_vm15, %v948_v49, %v955_v15  ;;  %v1179_v25 = vsel %vm6927_vm5, %v957_v16, %v1178_v8  ;;  %v774_v27 = vpack.c.bf16 %v622_v17, %v622_v17  ;;  %v1243_v29 = vld [vmem:[#allocation2 + $0x78] sm:$0xf]  ;;  %v1709_v52 = vunpack.c.l.b16 %v1519_v38  ;;  %v6688_v15 = vld [vmem:[#allocation2 + $0x30] sm:$0xff]  ;;  %v739_v17 = vld [vmem:[#allocation2 + $0xa4] sm:$0x1] }
 0x136   : > { %v2346_v28 = vpack.c.b16 %v2324_v19, %v2323_v6  ;;  %1177 = vst [vmem:[#allocation2 + $0x7c] sm:$0xf] %v956_v24  ;;  %v538_v30 = vpop.f32.mrf.mxu0  ;;  %v1524_v31 = vrot.slane %v1523_v23, 4  ;;  %v1531_v34 = vshrl.u32 %v1243_v29, 16  ;;  %v1534_v39 = vshll.u32 %v1243_v29, 16 }
 0x137   : > { %1180 = vst [vmem:[#allocation2 + $0x80] sm:$0x1] %v1179_v25  ;;  %v959_v35 = vshrl.u32 %v774_v27, 16  ;;  %v539_v37 = vadd.f32 %v7242_v33, %v538_v30  ;;  %v962_v45 = vshll.u32 %v774_v27, 16  ;;  %v2135_v53 = vld [vmem:[#allocation2 + $0x78] sm:$0xe] }
 0x138   : > { %2470 = vmatmul.bf16.gmra.mxu3 %v2346_v28  ;;  %v1529_v42 = vsel %vm6991_vm12, %v1524_v31, %v1528_v32  ;;  %v1533_v55 = vrot.slane %v1531_v34, 4  ;;  %v684_v57 = vsel %vm6927_vm5, 0, %v683_v43  ;;  %v1536_v61 = vrot.slane %v1534_v39, 5  ;;  %v1185_v30 = vld [vmem:[#allocation2 + $0x8c] sm:$0x1] }
 0x139   : > { %v7325_v44 = vrot.slane %v959_v35, 7  ;;  %v587_v46 = vmax.f32 %v539_v37, 0.0  ;;  %v1710_v47 = vunpack.c.l.b16 %v1529_v42  ;;  %v2052_v60 = vpop.f32.mrf.mxu2  ;;  %685 = vst [vmem:[#allocation2 + $0x9c] sm:$0x1] %v684_v57  ;;  %v6075_v6 = vrot.slane %v2135_v53, 9 }
 0x13a   : > { %v1817_v49 = vpop.f32.mrf.mxu1  ;;  %v1537_v16 = vor.u32 %v1536_v61, %v1533_v55  ;;  %v740_v38 = vsel %vm6935_vm6, 0, %v739_v17 }
 0x13b   : > { %v2431_v51 = vpop.f32.mrf.mxu3  ;;  %v964_v58 = vor.u32 %v962_v45, %v7325_v44  ;;  %v623_v26 = vadd.f32 %v7234_v18, %v587_v46  ;;  %v2051_v59 = vadd.f32 %v2050_v10, %v1817_v49  ;;  %v1732_v62 = vpack.c.b16 %v1710_v47, %v1709_v52  ;;  %741 = vst [vmem:[#allocation2 + $0xa4] sm:$0x1] %v740_v38 }
 0x13c   : > { %v965_v7 = vrot.slane %v7325_v44, 4  ;;  %v1538_v47 = vrot.slane %v1537_v16, 4 }
 0x13d   : > { %v1182_v63 = vsel %vm7032_vm13, %v964_v58, %v1181_v48  ;;  %v775_v0 = vpack.c.bf16 %v623_v26, %v623_v26  ;;  %v7333_v1 = vadd.f32 %v2431_v51, %v2051_v59  ;;  %v6655_v2 = vld [vmem:[#allocation2 + $0x78] sm:$0xff]  ;;  %1856 = vmatmul.bf16.gmra.mxu1 %v1732_v62 }
 0x13e   : > { %v1244_v4 = vld [vmem:[#allocation2 + $0x7c] sm:$0xf]  ;;  %1183 = vst [vmem:[#allocation2 + $0x84] sm:$0xf] %v1182_v63  ;;  %v541_v8 = vpop.f32.mrf.mxu0  ;;  %v1281_v11 = vld [vmem:[#allocation2 + $0x80] sm:$0x1]  ;;  %2094 = vmatmul.bf16.gmra.mxu2 %v6655_v2 }
 0x13f   : > { %v2248_v10 = vrot.slane %v1244_v4, 5  ;;  %v967_v12 = vshrl.u32 %v775_v0, 16  ;;  %v970_v13 = vshll.u32 %v775_v0, 16  ;;  %v542_v14 = vadd.f32 %v7242_v33, %v541_v8  ;;  %v6723_v63 = vld [vmem:[%s8819_s4 + $0x170] sm:$0xff]  ;;  %v686_v8 = vld [vmem:[#allocation2 + $0xa8] sm:$0x1] }
 0x140   : > { %v2251_v21 = vrot.slane %v1281_v11, 5  ;;  %v1540_v23 = vshll.u32 %v1244_v4, 16  ;;  %v1544_v24 = vshrl.u32 %v1244_v4, 16  ;;  %v1550_v29 = vshll.u32 %v1281_v11, 16  ;;  %v6747_v0 = vld [vmem:[%s8819_s4 + $0x1b0] sm:$0xff]  ;;  %3840 = vmatpush.bf16.msrb.mxu2 %v6723_v63 }
 0x141   : > { %v2250_v19 = vrot.slane %v2248_v10, 4  ;;  %v969_v25 = vrot.slane %v967_v12, 7  ;;  %v588_v27 = vmax.f32 %v542_v14, 0.0  ;;  %2754 = vmatmul.bf16.gmra.mxu0 %v6688_v15  ;;  %v2249_v28 = vsel %vm6974_vm9, %v6075_v6, %v2248_v10  ;;  %v2055_v44 = vpop.f32.mrf.mxu2  ;;  %v1188_v10 = vld [vmem:[#allocation2 + $0x90] sm:$0xf]  ;;  %4155 = vmatpush.bf16.msrb.mxu3 %v6747_v0 }
 0x142   : > { %v1819_v31 = vpop.f32.mrf.mxu1  ;;  %v1542_v35 = vrot.slane %v1540_v23, 5  ;;  %v1546_v37 = vrot.slane %v1544_v24, 4  ;;  %v2325_v45 = vunpack.c.l.b16 %v2249_v28  ;;  %v1552_v59 = vrot.slane %v1550_v29, 5 }
 0x143   : > { %v2433_v32 = vpop.f32.mrf.mxu3  ;;  %v2252_v34 = vsel %vm6974_vm9, %v2250_v19, %v2251_v21  ;;  %v972_v39 = vor.u32 %v970_v13, %v969_v25  ;;  %v974_v41 = vrot.slane %v969_v25, 4  ;;  %v624_v42 = vadd.f32 %v7234_v18, %v588_v27 }
 0x144   : > { %v2053_v43 = vadd.f32 %v2052_v60, %v1819_v31  ;;  %v2326_v46 = vunpack.c.l.b16 %v2252_v34  ;;  %v1547_v48 = vor.u32 %v1546_v37, %v1542_v35  ;;  %v1543_v62 = vsel %vm6991_vm12, %v1538_v47, %v1542_v35 }
 0x145   : > { %v973_v49 = vsel %vm7045_vm15, %v965_v7, %v972_v39  ;;  %v1186_v51 = vsel %vm6927_vm5, %v974_v41, %v1185_v30  ;;  %v776_v52 = vpack.c.bf16 %v624_v42, %v624_v42  ;;  %v1245_v55 = vld [vmem:[#allocation2 + $0x84] sm:$0xf]  ;;  %v687_v14 = vsel %vm6927_vm5, 0, %v686_v8 }
 0x146   : > { %v7348_v53 = vadd.f32 %v2433_v32, %v2053_v43  ;;  %1184 = vst [vmem:[#allocation2 + $0x88] sm:$0xf] %v973_v49  ;;  %v543_v57 = vpop.f32.mrf.mxu0  ;;  %v2347_v58 = vpack.c.b16 %v2326_v46, %v2325_v45  ;;  %v1548_v26 = vrot.slane %v1547_v48, 4  ;;  %v1555_v6 = vshrl.u32 %v1245_v55, 16  ;;  %v2136_v19 = vld [vmem:[#allocation2 + $0x84] sm:$0xe] }
 0x147   : > { %1187 = vst [vmem:[#allocation2 + $0x8c] sm:$0x1] %v1186_v51  ;;  %v976_v60 = vshrl.u32 %v776_v52, 16  ;;  %v544_v61 = vadd.f32 %v7242_v33, %v543_v57  ;;  %v979_v2 = vshll.u32 %v776_v52, 16  ;;  %v1558_v7 = vshll.u32 %v1245_v55, 16  ;;  %v6689_v46 = vld [vmem:[#allocation2 + $0x3c] sm:$0xff] }
 0x148   : > { %2475 = vmatmul.bf16.gmra.mxu3 %v2347_v58  ;;  %v1553_v4 = vsel %vm6991_vm12, %v1548_v26, %v1552_v59  ;;  %v1711_v17 = vunpack.c.l.b16 %v1543_v62  ;;  %v1557_v21 = vrot.slane %v1555_v6, 4  ;;  %688 = vst [vmem:[#allocation2 + $0xa8] sm:$0x1] %v687_v14  ;;  %v6076_v37 = vrot.slane %v2136_v19, 9  ;;  %v742_v48 = vld [vmem:[#allocation2 + $0xb0] sm:$0x1] }
 0x149   : > { %v7361_v11 = vrot.slane %v976_v60, 7  ;;  %v589_v12 = vmax.f32 %v544_v61, 0.0  ;;  %v1712_v13 = vunpack.c.l.b16 %v1553_v4  ;;  %v2057_v27 = vpop.f32.mrf.mxu2  ;;  %v1560_v28 = vrot.slane %v1558_v7, 5  ;;  %v1192_v60 = vld [vmem:[#allocation2 + $0x98] sm:$0x1] }
 0x14a   : > { %v1822_v15 = vpop.f32.mrf.mxu1  ;;  %v743_v4 = vsel %vm6935_vm6, 0, %v742_v48 }
 0x14b   : > { %v2436_v16 = vpop.f32.mrf.mxu3  ;;  %v981_v23 = vor.u32 %v979_v2, %v7361_v11  ;;  %v625_v24 = vadd.f32 %v7234_v18, %v589_v12  ;;  %v2056_v25 = vadd.f32 %v2055_v44, %v1822_v15  ;;  %v1733_v29 = vpack.c.b16 %v1712_v13, %v1711_v17  ;;  %744 = vst [vmem:[#allocation2 + $0xb0] sm:$0x1] %v743_v4 }
 0x14c   : > { %v982_v38 = vrot.slane %v7361_v11, 4  ;;  %v1561_v47 = vor.u32 %v1560_v28, %v1557_v21 }
 0x14d   : > { %v1189_v30 = vsel %vm7032_vm13, %v981_v23, %v1188_v10  ;;  %v777_v31 = vpack.c.bf16 %v625_v24, %v625_v24  ;;  %v7369_v32 = vadd.f32 %v2436_v16, %v2056_v25  ;;  %v6656_v34 = vld [vmem:[#allocation2 + $0x84] sm:$0xff]  ;;  %1861 = vmatmul.bf16.gmra.mxu1 %v1733_v29 }
 0x14e   : > { %v1246_v35 = vld [vmem:[#allocation2 + $0x88] sm:$0xf]  ;;  %1190 = vst [vmem:[#allocation2 + $0x90] sm:$0xf] %v1189_v30  ;;  %v546_v39 = vpop.f32.mrf.mxu0  ;;  %v1282_v41 = vld [vmem:[#allocation2 + $0x8c] sm:$0x1]  ;;  %2099 = vmatmul.bf16.gmra.mxu2 %v6656_v34 }
 0x14f   : > { %v2255_v42 = vrot.slane %v1246_v35, 5  ;;  %v984_v43 = vshrl.u32 %v777_v31, 16  ;;  %v987_v44 = vshll.u32 %v777_v31, 16  ;;  %v547_v45 = vadd.f32 %v7242_v33, %v546_v39  ;;  %v689_v39 = vld [vmem:[#allocation2 + $0xb4] sm:$0x1] }
 0x150   : > { %v2258_v51 = vrot.slane %v1282_v41, 5  ;;  %v1564_v52 = vshll.u32 %v1246_v35, 16  ;;  %v1568_v55 = vshrl.u32 %v1246_v35, 16  ;;  %v1574_v59 = vshll.u32 %v1282_v41, 16  ;;  %v6710_v35 = vld [vmem:[%s8819_s4 + $0x108] sm:$0xff] }
 0x151   : > { %v2257_v49 = vrot.slane %v2255_v42, 4  ;;  %v986_v57 = vrot.slane %v984_v43, 7  ;;  %v590_v58 = vmax.f32 %v547_v45, 0.0  ;;  %2759 = vmatmul.bf16.gmra.mxu0 %v6689_v46  ;;  %v2256_v26 = vsel %vm6974_vm9, %v6076_v37, %v2255_v42  ;;  %v2060_v10 = vpop.f32.mrf.mxu2  ;;  %3419 = vmatpush.bf16.msrb.mxu1 %v6710_v35  ;;  %v1195_v45 = vld [vmem:[#allocation2 + $0x9c] sm:$0xf] }
 0x152   : > { %v1824_v61 = vpop.f32.mrf.mxu1  ;;  %v1566_v0 = vrot.slane %v1564_v52, 5  ;;  %v1570_v2 = vrot.slane %v1568_v55, 4  ;;  %v2327_v12 = vunpack.c.l.b16 %v2256_v26  ;;  %v1562_v14 = vrot.slane %v1561_v47, 4 }
 0x153   : > { %v2438_v62 = vpop.f32.mrf.mxu3  ;;  %v2259_v63 = vsel %vm6974_vm9, %v2257_v49, %v2258_v51  ;;  %v989_v6 = vor.u32 %v987_v44, %v986_v57  ;;  %v991_v7 = vrot.slane %v986_v57, 4  ;;  %v626_v8 = vadd.f32 %v7234_v18, %v590_v58 }
 0x154   : > { %v2058_v11 = vadd.f32 %v2057_v27, %v1824_v61  ;;  %v2328_v13 = vunpack.c.l.b16 %v2259_v63  ;;  %v1571_v15 = vor.u32 %v1570_v2, %v1566_v0  ;;  %v1576_v28 = vrot.slane %v1574_v59, 5 }
 0x155   : > { %v990_v16 = vsel %vm7045_vm15, %v982_v38, %v989_v6  ;;  %v1193_v17 = vsel %vm6927_vm5, %v991_v7, %v1192_v60  ;;  %v778_v19 = vpack.c.bf16 %v626_v8, %v626_v8  ;;  %v1247_v23 = vld [vmem:[#allocation2 + $0x90] sm:$0xf]  ;;  %v1567_v31 = vsel %vm6991_vm12, %v1562_v14, %v1566_v0  ;;  %v6690_v14 = vld [vmem:[#allocation2 + $0x48] sm:$0xff] }
 0x156   : > { %v7384_v21 = vadd.f32 %v2438_v62, %v2058_v11  ;;  %1191 = vst [vmem:[#allocation2 + $0x94] sm:$0xf] %v990_v16  ;;  %v548_v24 = vpop.f32.mrf.mxu0  ;;  %v2348_v25 = vpack.c.b16 %v2328_v13, %v2327_v12  ;;  %v1572_v27 = vrot.slane %v1571_v15, 4  ;;  %v1579_v34 = vshrl.u32 %v1247_v23, 16  ;;  %v2137_v49 = vld [vmem:[#allocation2 + $0x90] sm:$0xe] }
 0x157   : > { %1194 = vst [vmem:[#allocation2 + $0x98] sm:$0x1] %v1193_v17  ;;  %v993_v29 = vshrl.u32 %v778_v19, 16  ;;  %v549_v30 = vadd.f32 %v7242_v33, %v548_v24  ;;  %v1582_v38 = vshll.u32 %v1247_v23, 16  ;;  %v996_v42 = vshll.u32 %v778_v19, 16 }
 0x158   : > { %2480 = vmatmul.bf16.gmra.mxu3 %v2348_v25  ;;  %v1577_v37 = vsel %vm6991_vm12, %v1572_v27, %v1576_v28  ;;  %v1713_v48 = vunpack.c.l.b16 %v1567_v31  ;;  %v1581_v51 = vrot.slane %v1579_v34, 4  ;;  %v690_v52 = vsel %vm6927_vm5, 0, %v689_v39  ;;  %v745_v16 = vld [vmem:[#allocation2 + $0xbc] sm:$0x1] }
 0x159   : > { %v7394_v41 = vrot.slane %v993_v29, 7  ;;  %v591_v43 = vmax.f32 %v549_v30, 0.0  ;;  %v1714_v44 = vunpack.c.l.b16 %v1577_v37  ;;  %v2062_v26 = vpop.f32.mrf.mxu2  ;;  %v1584_v59 = vrot.slane %v1582_v38, 5  ;;  %691 = vst [vmem:[#allocation2 + $0xb4] sm:$0x1] %v690_v52 }
 0x15a   : > { %v1827_v46 = vpop.f32.mrf.mxu1  ;;  %v6077_v4 = vrot.slane %v2137_v49, 9  ;;  %v1199_v30 = vld [vmem:[#allocation2 + $0xa4] sm:$0x1]  ;;  %v746_v39 = vsel %vm6935_vm6, 0, %v745_v16 }
 0x15b   : > { %v2441_v47 = vpop.f32.mrf.mxu3  ;;  %v998_v55 = vor.u32 %v996_v42, %v7394_v41  ;;  %v627_v57 = vadd.f32 %v7234_v18, %v591_v43  ;;  %v2061_v58 = vadd.f32 %v2060_v10, %v1827_v46  ;;  %v1734_v60 = vpack.c.b16 %v1714_v44, %v1713_v48  ;;  %747 = vst [vmem:[#allocation2 + $0xbc] sm:$0x1] %v746_v39 }
 0x15c   : > { %v999_v6 = vrot.slane %v7394_v41, 4  ;;  %v1585_v15 = vor.u32 %v1584_v59, %v1581_v51 }
 0x15d   : > { %v1196_v61 = vsel %vm7032_vm13, %v998_v55, %v1195_v45  ;;  %v779_v62 = vpack.c.bf16 %v627_v57, %v627_v57  ;;  %v7402_v63 = vadd.f32 %v2441_v47, %v2061_v58  ;;  %v6657_v0 = vld [vmem:[#allocation2 + $0x90] sm:$0xff]  ;;  %1866 = vmatmul.bf16.gmra.mxu1 %v1734_v60 }
 0x15e   : > { %v1248_v2 = vld [vmem:[#allocation2 + $0x94] sm:$0xf]  ;;  %1197 = vst [vmem:[#allocation2 + $0x9c] sm:$0xf] %v1196_v61  ;;  %v551_v7 = vpop.f32.mrf.mxu0  ;;  %v1283_v8 = vld [vmem:[#allocation2 + $0x98] sm:$0x1]  ;;  %2104 = vmatmul.bf16.gmra.mxu2 %v6657_v0 }
 0x15f   : > { %v2262_v11 = vrot.slane %v1248_v2, 5  ;;  %v1001_v10 = vshrl.u32 %v779_v62, 16  ;;  %v1004_v12 = vshll.u32 %v779_v62, 16  ;;  %v552_v13 = vadd.f32 %v7242_v33, %v551_v7 }
 0x160   : > { %v2265_v19 = vrot.slane %v1283_v8, 5  ;;  %v1588_v23 = vshll.u32 %v1248_v2, 16  ;;  %v1592_v24 = vshrl.u32 %v1248_v2, 16  ;;  %v1598_v29 = vshll.u32 %v1283_v8, 16 }
 0x161   : > { %v2264_v17 = vrot.slane %v2262_v11, 4  ;;  %v1003_v25 = vrot.slane %v1001_v10, 7  ;;  %v592_v27 = vmax.f32 %v552_v13, 0.0  ;;  %2764 = vmatmul.bf16.gmra.mxu0 %v6690_v14  ;;  %v2263_v28 = vsel %vm6974_vm9, %v6077_v4, %v2262_v11  ;;  %v2065_v45 = vpop.f32.mrf.mxu2  ;;  %v6722_v4 = vld [vmem:[%s8819_s4 + $0x168] sm:$0xff] }
 0x162   : > { %v1829_v31 = vpop.f32.mrf.mxu1  ;;  %v1590_v37 = vrot.slane %v1588_v23, 5  ;;  %v1594_v38 = vrot.slane %v1592_v24, 4  ;;  %v2329_v46 = vunpack.c.l.b16 %v2263_v28  ;;  %v1586_v48 = vrot.slane %v1585_v15, 4  ;;  %v1202_v14 = vld [vmem:[#allocation2 + $0xa8] sm:$0xf]  ;;  %3841 = vmatpush.bf16.msrb.mxu2 %v6722_v4 }
 0x163   : > { %v2443_v34 = vpop.f32.mrf.mxu3  ;;  %v2266_v35 = vsel %vm6974_vm9, %v2264_v17, %v2265_v19  ;;  %v1006_v41 = vor.u32 %v1004_v12, %v1003_v25  ;;  %v1008_v42 = vrot.slane %v1003_v25, 4  ;;  %v628_v43 = vadd.f32 %v7234_v18, %v592_v27  ;;  %v692_v12 = vld [vmem:[#allocation2 + $0xc0] sm:$0x1] }
 0x164   : > { %v2063_v44 = vadd.f32 %v2062_v26, %v1829_v31  ;;  %v2330_v47 = vunpack.c.l.b16 %v2266_v35  ;;  %v1595_v49 = vor.u32 %v1594_v38, %v1590_v37  ;;  %v1600_v61 = vrot.slane %v1598_v29, 5 }
 0x165   : > { %v1007_v51 = vsel %vm7045_vm15, %v999_v6, %v1006_v41  ;;  %v1200_v52 = vsel %vm6927_vm5, %v1008_v42, %v1199_v30  ;;  %v780_v55 = vpack.c.bf16 %v628_v43, %v628_v43  ;;  %v1249_v58 = vld [vmem:[#allocation2 + $0x9c] sm:$0xf]  ;;  %v1591_v2 = vsel %vm6991_vm12, %v1586_v48, %v1590_v37  ;;  %v6746_v6 = vld [vmem:[%s8819_s4 + $0x1a8] sm:$0xff] }
 0x166   : > { %v7417_v57 = vadd.f32 %v2443_v34, %v2063_v44  ;;  %1198 = vst [vmem:[#allocation2 + $0xa0] sm:$0xf] %v1007_v51  ;;  %v553_v59 = vpop.f32.mrf.mxu0  ;;  %v2349_v60 = vpack.c.b16 %v2330_v47, %v2329_v46  ;;  %v1596_v26 = vrot.slane %v1595_v49, 4  ;;  %v1603_v11 = vshrl.u32 %v1249_v58, 16  ;;  %4156 = vmatpush.bf16.msrb.mxu3 %v6746_v6  ;;  %v2138_v25 = vld [vmem:[#allocation2 + $0x9c] sm:$0xe] }
 0x167   : > { %1201 = vst [vmem:[#allocation2 + $0xa4] sm:$0x1] %v1200_v52  ;;  %v1010_v62 = vshrl.u32 %v780_v55, 16  ;;  %v554_v0 = vadd.f32 %v7242_v33, %v553_v59  ;;  %v1013_v7 = vshll.u32 %v780_v55, 16  ;;  %v1606_v10 = vshll.u32 %v1249_v58, 16  ;;  %v6691_v51 = vld [vmem:[#allocation2 + $0x54] sm:$0xff] }
 0x168   : > { %2485 = vmatmul.bf16.gmra.mxu3 %v2349_v60  ;;  %v1601_v8 = vsel %vm6991_vm12, %v1596_v26, %v1600_v61  ;;  %v693_v17 = vsel %vm6927_vm5, 0, %v692_v12  ;;  %v1715_v24 = vunpack.c.l.b16 %v1591_v2  ;;  %v1605_v27 = vrot.slane %v1603_v11, 4  ;;  %v748_v55 = vld [vmem:[#allocation2 + $0xc8] sm:$0x1]  ;;  %v6721_v58 = vld [vmem:[%s8819_s4 + $0x160] sm:$0xff] }
 0x169   : > { %v7430_v13 = vrot.slane %v1010_v62, 7  ;;  %v593_v15 = vmax.f32 %v554_v0, 0.0  ;;  %v1716_v16 = vunpack.c.l.b16 %v1601_v8  ;;  %694 = vst [vmem:[#allocation2 + $0xc0] sm:$0x1] %v693_v17  ;;  %v2067_v31 = vpop.f32.mrf.mxu2  ;;  %v1608_v34 = vrot.slane %v1606_v10, 5  ;;  %3842 = vmatpush.bf16.msrb.mxu2 %v6721_v58 }
 0x16a   : > { %v1832_v19 = vpop.f32.mrf.mxu1  ;;  %v6078_v43 = vrot.slane %v2138_v25, 9  ;;  %v749_v12 = vsel %vm6935_vm6, 0, %v748_v55 }
 0x16b   : > { %v2446_v23 = vpop.f32.mrf.mxu3  ;;  %v1015_v28 = vor.u32 %v1013_v7, %v7430_v13  ;;  %v629_v29 = vadd.f32 %v7234_v18, %v593_v15  ;;  %v2066_v30 = vadd.f32 %v2065_v45, %v1832_v19  ;;  %v1735_v35 = vpack.c.b16 %v1716_v16, %v1715_v24  ;;  %v7457_v16 = vld [vmem:[%s8818_s3] ss:$0 sm:$0xff]  ;;  %750 = vst [vmem:[#allocation2 + $0xc8] sm:$0x1] %v749_v12 }
 0x16c   : > { %v1016_v44 = vrot.slane %v7430_v13, 4  ;;  %v1609_v52 = vor.u32 %v1608_v34, %v1605_v27  ;;  %v6720_v13 = vld [vmem:[%s8819_s4 + $0x158] sm:$0xff] }
 0x16d   : > { %v1203_v37 = vsel %vm7032_vm13, %v1015_v28, %v1202_v14  ;;  %v781_v38 = vpack.c.bf16 %v629_v29, %v629_v29  ;;  %v7438_v39 = vadd.f32 %v2446_v23, %v2066_v30  ;;  %v6658_v41 = vld [vmem:[#allocation2 + $0x9c] sm:$0xff]  ;;  %1871 = vmatmul.bf16.gmra.mxu1 %v1735_v35  ;;  %3843 = vmatpush.bf16.msrb.mxu2 %v6720_v13 }
 0x16e   : > { %v1250_v42 = vld [vmem:[#allocation2 + $0xa0] sm:$0xf]  ;;  %1204 = vst [vmem:[#allocation2 + $0xa8] sm:$0xf] %v1203_v37  ;;  %v556_v46 = vpop.f32.mrf.mxu0  ;;  %v1284_v47 = vld [vmem:[#allocation2 + $0xa4] sm:$0x1]  ;;  %2109 = vmatmul.bf16.gmra.mxu2 %v6658_v41 }
 0x16f   : > { %v2269_v18 = vrot.slane %v1250_v42, 5  ;;  %v1018_v45 = vshrl.u32 %v781_v38, 16  ;;  %v1021_v48 = vshll.u32 %v781_v38, 16  ;;  %v557_v49 = vadd.f32 %v7242_v33, %v556_v46  ;;  %v1206_v33 = vld [vmem:[#allocation2 + $0xb0] sm:$0x1] }
 0x170   : > { %v2272_v60 = vrot.slane %v1284_v47, 5  ;;  %v1612_v26 = vshll.u32 %v1250_v42, 16  ;;  %v1616_v61 = vshrl.u32 %v1250_v42, 16  ;;  %v1622_v4 = vshll.u32 %v1284_v47, 16  ;;  %v7475_v47 = vld [vmem:[%s8817_s2] ss:$0 sm:$0xff] }
 0x171   : > { %v2271_v59 = vrot.slane %v2269_v18, 4  ;;  %v1020_v62 = vrot.slane %v1018_v45, 7  ;;  %v594_v0 = vmax.f32 %v557_v49, 0.0  ;;  %2769 = vmatmul.bf16.gmra.mxu0 %v6691_v51  ;;  %v2270_v2 = vsel %vm6974_vm9, %v6078_v43, %v2269_v18  ;;  %v2070_v23 = vpop.f32.mrf.mxu2  ;;  %v6745_v43 = vld [vmem:[%s8819_s4 + $0x1a0] sm:$0xff] }
 0x172   : > { %v1834_v6 = vpop.f32.mrf.mxu1  ;;  %v1614_v11 = vrot.slane %v1612_v26, 5  ;;  %v1618_v10 = vrot.slane %v1616_v61, 4  ;;  %v2331_v24 = vunpack.c.l.b16 %v2270_v2  ;;  %v1610_v27 = vrot.slane %v1609_v52, 4  ;;  %v6709_v49 = vld [vmem:[%s8819_s4 + $0x100] sm:$0xff]  ;;  %4157 = vmatpush.bf16.msrb.mxu3 %v6745_v43  ;;  %v1209_v26 = vld [vmem:[#allocation2 + $0xb4] sm:$0xf] }
 0x173   : > { %v2448_v7 = vpop.f32.mrf.mxu3  ;;  %v2273_v8 = vsel %vm6974_vm9, %v2271_v59, %v2272_v60  ;;  %v1023_v14 = vor.u32 %v1021_v48, %v1020_v62  ;;  %v1025_v15 = vrot.slane %v1020_v62, 4  ;;  %v630_v17 = vadd.f32 %v7457_v16, %v594_v0  ;;  %3420 = vmatpush.bf16.msrb.mxu1 %v6709_v49 }
 0x174   : > { %v2068_v19 = vadd.f32 %v2067_v31, %v1834_v6  ;;  %v2332_v25 = vunpack.c.l.b16 %v2273_v8  ;;  %v1619_v28 = vor.u32 %v1618_v10, %v1614_v11  ;;  %v1624_v42 = vrot.slane %v1622_v4, 5  ;;  %v6744_v4 = vld [vmem:[%s8819_s4 + $0x198] sm:$0xff] }
 0x175   : > { %v1024_v29 = vsel %vm7045_vm15, %v1016_v44, %v1023_v14  ;;  %v1207_v30 = vsel %vm6927_vm5, %v1025_v15, %v1206_v33  ;;  %v782_v34 = vpack.c.bf16 %v630_v17, %v630_v17  ;;  %v1251_v37 = vld [vmem:[#allocation2 + $0xa8] sm:$0xf]  ;;  %v6719_v44 = vld [vmem:[%s8819_s4 + $0x150] sm:$0xff]  ;;  %v1615_v45 = vsel %vm6991_vm12, %v1610_v27, %v1614_v11 }
 0x176   : > { %v7464_v35 = vadd.f32 %v2448_v7, %v2068_v19  ;;  %1205 = vst [vmem:[#allocation2 + $0xac] sm:$0xf] %v1024_v29  ;;  %v558_v38 = vpop.f32.mrf.mxu0  ;;  %v2350_v31 = vpack.c.b16 %v2332_v25, %v2331_v24  ;;  %v1620_v41 = vrot.slane %v1619_v28, 4  ;;  %v1627_v48 = vshrl.u32 %v1251_v37, 16  ;;  %3844 = vmatpush.bf16.msrb.mxu2 %v6719_v44  ;;  %v6718_v33 = vld [vmem:[%s8819_s4 + $0x148] sm:$0xff]  ;;  %4158 = vmatpush.bf16.msrb.mxu3 %v6744_v4 }
 0x177   : > { %1208 = vst [vmem:[#allocation2 + $0xb0] sm:$0x1] %v1207_v30  ;;  %v1027_v46 = vshrl.u32 %v782_v34, 16  ;;  %v559_v18 = vadd.f32 %v7475_v47, %v558_v38  ;;  %v1630_v52 = vshll.u32 %v1251_v37, 16  ;;  %v1030_v58 = vshll.u32 %v782_v34, 16  ;;  %v6692_v37 = vld [vmem:[#allocation2 + $0x60] sm:$0xff] }
 0x178   : > { %2490 = vmatmul.bf16.gmra.mxu3 %v2350_v31  ;;  %v1625_v51 = vsel %vm6991_vm12, %v1620_v41, %v1624_v42  ;;  %v1717_v0 = vunpack.c.l.b16 %v1615_v45  ;;  %v1629_v2 = vrot.slane %v1627_v48, 4  ;;  %v2139_v10 = vld [vmem:[#allocation2 + $0xa8] sm:$0xe]  ;;  %v6743_v31 = vld [vmem:[%s8819_s4 + $0x190] sm:$0xff]  ;;  %v6717_v41 = vld [vmem:[%s8819_s4 + $0x140] sm:$0xff] }
 0x179   : > { %v7485_v55 = vrot.slane %v1027_v46, 7  ;;  %v595_v59 = vmax.f32 %v559_v18, 0.0  ;;  %v1718_v60 = vunpack.c.l.b16 %v1625_v51  ;;  %v2072_v11 = vpop.f32.mrf.mxu2  ;;  %v1632_v12 = vrot.slane %v1630_v52, 5  ;;  %v1213_v51 = vld [vmem:[#allocation2 + $0xbc] sm:$0x1] }
 0x17a   : > { %v1837_v61 = vpop.f32.mrf.mxu1  ;;  %v6079_v28 = vrot.slane %v2139_v10, 9  ;;  %3845 = vmatpush.bf16.msrb.mxu2 %v6718_v33  ;;  %4159 = vmatpush.bf16.msrb.mxu3 %v6743_v31  ;;  %v6742_v33 = vld [vmem:[%s8819_s4 + $0x188] sm:$0xff] }
 0x17b   : > { %v2451_v62 = vpop.f32.mrf.mxu3  ;;  %v1032_v6 = vor.u32 %v1030_v58, %v7485_v55  ;;  %v631_v7 = vadd.f32 %v7457_v16, %v595_v59  ;;  %v2071_v8 = vadd.f32 %v2070_v23, %v1837_v61  ;;  %v1736_v13 = vpack.c.b16 %v1718_v60, %v1717_v0 }
 0x17c   : > { %v1033_v23 = vrot.slane %v7485_v55, 4  ;;  %v1633_v38 = vor.u32 %v1632_v12, %v1629_v2 }
 0x17d   : > { %v1210_v14 = vsel %vm7032_vm13, %v1032_v6, %v1209_v26  ;;  %v783_v15 = vpack.c.bf16 %v631_v7, %v631_v7  ;;  %v7497_v17 = vadd.f32 %v2451_v62, %v2071_v8  ;;  %v6659_v19 = vld [vmem:[#allocation2 + $0xa8] sm:$0xff]  ;;  %1876 = vmatmul.bf16.gmra.mxu1 %v1736_v13 }
 0x17e   : > { %v1252_v24 = vld [vmem:[#allocation2 + $0xac] sm:$0xf]  ;;  %1211 = vst [vmem:[#allocation2 + $0xb4] sm:$0xf] %v1210_v14  ;;  %v561_v25 = vpop.f32.mrf.mxu0  ;;  %v1285_v27 = vld [vmem:[#allocation2 + $0xb0] sm:$0x1]  ;;  %2114 = vmatmul.bf16.gmra.mxu2 %v6659_v19  ;;  %4160 = vmatpush.bf16.msrb.mxu3 %v6742_v33 }
 0x17f   : > { %v2276_v29 = vrot.slane %v1252_v24, 5  ;;  %v1035_v30 = vshrl.u32 %v783_v15, 16  ;;  %v562_v34 = vadd.f32 %v7475_v47, %v561_v25  ;;  %v2279_v43 = vrot.slane %v1285_v27, 5  ;;  %3846 = vmatpush.bf16.msrb.mxu2 %v6717_v41 }
 0x180   : > { %v1636_v44 = vshll.u32 %v1252_v24, 16  ;;  %v1640_v46 = vshrl.u32 %v1252_v24, 16  ;;  %v1038_v45 = vshll.u32 %v783_v15, 16  ;;  %v1646_v26 = vshll.u32 %v1285_v27, 16  ;;  %v6741_v24 = vld [vmem:[%s8819_s4 + $0x180] sm:$0xff] }
 0x181   : > { %v2278_v42 = vrot.slane %v2276_v29, 4  ;;  %v1037_v18 = vrot.slane %v1035_v30, 7  ;;  %v596_v48 = vmax.f32 %v562_v34, 0.0  ;;  %2774 = vmatmul.bf16.gmra.mxu0 %v6692_v37  ;;  %v2277_v49 = vsel %vm6974_vm9, %v6079_v28, %v2276_v29  ;;  %v2075_v4 = vpop.f32.mrf.mxu2 }
 0x182   : > { %v1839_v52 = vpop.f32.mrf.mxu1  ;;  %v1638_v59 = vrot.slane %v1636_v44, 5  ;;  %v1642_v60 = vrot.slane %v1640_v46, 4  ;;  %v2333_v6 = vunpack.c.l.b16 %v2277_v49  ;;  %v1634_v8 = vrot.slane %v1633_v38, 4  ;;  %4161 = vmatpush.bf16.msrb.mxu3 %v6741_v24 }
 0x183   : > { %v2453_v55 = vpop.f32.mrf.mxu3  ;;  %v2280_v58 = vsel %vm6974_vm9, %v2278_v42, %v2279_v43  ;;  %v1040_v61 = vor.u32 %v1038_v45, %v1037_v18  ;;  %v1042_v62 = vrot.slane %v1037_v18, 4  ;;  %v632_v0 = vadd.f32 %v7457_v16, %v596_v48  ;;  %v1216_v18 = vld [vmem:[#allocation2 + $0xc0] sm:$0xf] }
 0x184   : > { %v2073_v2 = vadd.f32 %v2072_v11, %v1839_v52  ;;  %v2334_v7 = vunpack.c.l.b16 %v2280_v58  ;;  %v1643_v10 = vor.u32 %v1642_v60, %v1638_v59  ;;  %v7521_v11 = vld [vmem:[#allocation2 + $0x10] sm:$0xf]  ;;  %v1639_v28 = vsel %vm6991_vm12, %v1634_v8, %v1638_v59 }
 0x185   : > { %v1041_v12 = vsel %vm7045_vm15, %v1033_v23, %v1040_v61  ;;  %v1214_v13 = vsel %vm6927_vm5, %v1042_v62, %v1213_v51  ;;  %v784_v14 = vpack.c.bf16 %v632_v0, %v632_v0  ;;  %v1253_v19 = vld [vmem:[#allocation2 + $0xb4] sm:$0xf]  ;;  %v1648_v23 = vrot.slane %v1646_v26, 5  ;;  %v6756_v61 = vld [vmem:[%s8819_s4 + $0x1f8] sm:$0xff] }
 0x186   : > { %v7519_v15 = vadd.f32 %v2453_v55, %v2073_v2  ;;  %1212 = vst [vmem:[#allocation2 + $0xb8] sm:$0xf] %v1041_v12  ;;  %v563_v25 = vpop.f32.mrf.mxu0  ;;  %v2351_v27 = vpack.c.b16 %v2334_v7, %v2333_v6  ;;  %v1644_v29 = vrot.slane %v1643_v10, 4  ;;  %v1651_v38 = vshrl.u32 %v1253_v19, 16  ;;  %v2140_v26 = vld [vmem:[#allocation2 + $0xb4] sm:$0xe]  ;;  %4836 = vmatpush.bf16.msra.mxu0 %v6756_v61 }
 0x187   : > { %1215 = vst [vmem:[#allocation2 + $0xbc] sm:$0x1] %v1214_v13  ;;  %v1044_v30 = vshrl.u32 %v784_v14, 16  ;;  %v1047_v34 = vshll.u32 %v784_v14, 16  ;;  %v564_v37 = vadd.f32 %v7475_v47, %v563_v25  ;;  %v1654_v41 = vshll.u32 %v1253_v19, 16  ;;  %v6693_v25 = vld [vmem:[#allocation2 + $0x6c] sm:$0xff] }
 0x188   : > { %2495 = vmatmul.bf16.gmra.mxu3 %v2351_v27  ;;  %v1649_v31 = vsel %vm6991_vm12, %v1644_v29, %v1648_v23  ;;  %v3600_v42 = vrot.slane %v7521_v11, 5  ;;  %v1719_v49 = vunpack.c.l.b16 %v1639_v28  ;;  %v1653_v51 = vrot.slane %v1651_v38, 4  ;;  %v7534_v47 = vld [vmem:[#allocation2 + $0x14] sm:$0x1]  ;;  %v6764_v28 = vld [vmem:[%s8819_s4 + $0x238] sm:$0xff] }
 0x189   : > { %v7532_v43 = vrot.slane %v1044_v30, 7  ;;  %v597_v44 = vmax.f32 %v564_v37, 0.0  ;;  %v1720_v46 = vunpack.c.l.b16 %v1649_v31  ;;  %v1656_v52 = vrot.slane %v1654_v41, 5  ;;  %v2077_v60 = vpop.f32.mrf.mxu2  ;;  %5262 = vmatpush.bf16.msra.mxu1 %v6764_v28  ;;  %v1220_v41 = vld [vmem:[#allocation2 + $0xc8] sm:$0x1] }
 0x18a   : > { %v1842_v45 = vpop.f32.mrf.mxu1  ;;  %v3602_v0 = vrot.slane %v3600_v42, 4  ;;  %v6080_v12 = vrot.slane %v2140_v26, 9 }
 0x18b   : > { %v2456_v48 = vpop.f32.mrf.mxu3  ;;  %v1049_v55 = vor.u32 %v1047_v34, %v7532_v43  ;;  %v633_v58 = vadd.f32 %v7457_v16, %v597_v44  ;;  %v2076_v59 = vadd.f32 %v2075_v4, %v1842_v45  ;;  %v1737_v62 = vpack.c.b16 %v1720_v46, %v1719_v49 }
 0x18c   : > { %v3603_v16 = vrot.slane %v7534_v47, 5  ;;  %v1657_v14 = vor.u32 %v1656_v52, %v1653_v51  ;;  %v1050_v37 = vrot.slane %v7532_v43, 4 }
 0x18d   : > { %v1217_v2 = vsel %vm7032_vm13, %v1049_v55, %v1216_v18  ;;  %v785_v33 = vpack.c.bf16 %v633_v58, %v633_v58  ;;  %v7545_v6 = vadd.f32 %v2456_v48, %v2076_v59  ;;  %v6660_v7 = vld [vmem:[#allocation2 + $0xb4] sm:$0xff]  ;;  %1881 = vmatmul.bf16.gmra.mxu1 %v1737_v62  ;;  %v3534_v59 = vld [vmem:[#allocation2 + $0xc] sm:$0xe] }
 0x18e   : > { %v1254_v8 = vld [vmem:[#allocation2 + $0xb8] sm:$0xf]  ;;  %1218 = vst [vmem:[#allocation2 + $0xc0] sm:$0xf] %v1217_v2  ;;  %v2740_v4 = vpop.f32.mrf.mxu0  ;;  %v1286_v10 = vld [vmem:[#allocation2 + $0xbc] sm:$0x1]  ;;  %2119 = vmatmul.bf16.gmra.mxu2 %v6660_v7 }
 0x18f   : > { %v2283_v13 = vrot.slane %v1254_v8, 5  ;;  %v1052_v19 = vshrl.u32 %v785_v33, 16  ;;  %v1055_v24 = vshll.u32 %v785_v33, 16  ;;  %v7549_v40 = vadd.f32 %v2740_v4, %v7249_v54  ;;  %v2852_v62 = vld [vmem:[#allocation2 + $0xc] sm:$0xf] }
 0x190   : > { %v2286_v27 = vrot.slane %v1286_v10, 5  ;;  %v1660_v30 = vshll.u32 %v1254_v8, 16  ;;  %v1664_v34 = vshrl.u32 %v1254_v8, 16  ;;  %v3604_v54 = vsel %vm6974_vm9, %v3602_v0, %v3603_v16 }
 0x191   : > { %v2284_v29 = vsel %vm6974_vm9, %v6080_v12, %v2283_v13  ;;  %v2285_v23 = vrot.slane %v2283_v13, 4  ;;  %v1054_v38 = vrot.slane %v1052_v19, 7  ;;  %2779 = vmatmul.bf16.gmra.mxu0 %v6693_v25  ;;  %v1670_v49 = vshll.u32 %v1286_v10, 16  ;;  %v2080_v43 = vpop.f32.mrf.mxu2 }
 0x192   : > { %v2335_v31 = vunpack.c.l.b16 %v2284_v29  ;;  %v1844_v44 = vpop.f32.mrf.mxu1  ;;  %v1662_v45 = vrot.slane %v1660_v30, 5  ;;  %v1666_v48 = vrot.slane %v1664_v34, 4  ;;  %v1658_v26 = vrot.slane %v1657_v14, 4 }
 0x193   : > { %v2458_v46 = vpop.f32.mrf.mxu3  ;;  %v2287_v18 = vsel %vm6974_vm9, %v2285_v23, %v2286_v27  ;;  %v1057_v51 = vor.u32 %v1055_v24, %v1054_v38  ;;  %v1059_v52 = vrot.slane %v1054_v38, 4  ;;  %v2078_v55 = vadd.f32 %v2077_v60, %v1844_v44  ;;  %v2856_v44 = vld [vmem:[#allocation2 + $0x1c] sm:$0xf] }
 0x194   : > { %v2336_v58 = vunpack.c.l.b16 %v2287_v18  ;;  %v1667_v61 = vor.u32 %v1666_v48, %v1662_v45  ;;  %v2910_v0 = vshll.u32 %v7521_v11, 16  ;;  %v2914_v2 = vshrl.u32 %v7521_v11, 16 }
 0x195   : > { %v1058_v33 = vsel %vm7045_vm15, %v1050_v37, %v1057_v51  ;;  %v1221_v7 = vsel %vm6927_vm5, %v1059_v52, %v1220_v41  ;;  %v7567_v8 = vadd.f32 %v2458_v46, %v2078_v55  ;;  %v1663_v4 = vsel %vm6991_vm12, %v1658_v26, %v1662_v45  ;;  %v6694_v51 = vld [vmem:[#allocation2 + $0x78] sm:$0xff] }
 0x196   : > { %v2352_v16 = vpack.c.b16 %v2336_v58, %v2335_v31  ;;  %1219 = vst [vmem:[#allocation2 + $0xc4] sm:$0xf] %v1058_v33  ;;  %v7569_v60 = vpop.f32.mrf.mxu0  ;;  %v1668_v10 = vrot.slane %v1667_v61, 4  ;;  %v1672_v12 = vrot.slane %v1670_v49, 5  ;;  %v6289_v13 = vrot.slane %v3534_v59, 9 }
 0x197   : > { %1222 = vst [vmem:[#allocation2 + $0xc8] sm:$0x1] %v1221_v7  ;;  %v2901_v14 = vshrl.u32 %v2852_v62, 16  ;;  %v3728_v24 = vunpack.c.l.b16 %v3604_v54  ;;  %v2904_v25 = vshll.u32 %v2852_v62, 16  ;;  %v1721_v27 = vunpack.c.l.b16 %v1663_v4  ;;  %v2857_v58 = vld [vmem:[#allocation2 + $0x20] sm:$0x1] }
 0x198   : > { %2500 = vmatmul.bf16.gmra.mxu3 %v2352_v16  ;;  %v1673_v56 = vsel %vm6991_vm12, %v1668_v10, %v1672_v12  ;;  %v3601_v19 = vsel %vm6974_vm9, %v6289_v13, %v3600_v42  ;;  %v2912_v29 = vrot.slane %v2910_v0, 5  ;;  %v2916_v23 = vrot.slane %v2914_v2, 4  ;;  %v3535_v61 = vld [vmem:[#allocation2 + $0x18] sm:$0xe] }
 0x199   : > { %v1722_v28 = vunpack.c.l.b16 %v1673_v56  ;;  %v2082_v31 = vpop.f32.mrf.mxu2  ;;  %v3727_v41 = vunpack.c.l.b16 %v3601_v19  ;;  %v2903_v46 = vrot.slane %v2901_v14, 4  ;;  %v2906_v45 = vrot.slane %v2904_v25, 5  ;;  %v2855_v7 = vld [vmem:[#allocation2 + $0x18] sm:$0xf] }
 0x19a   : > { %v1847_v30 = vpop.f32.mrf.mxu1  ;;  %v2917_v48 = vor.u32 %v2916_v23, %v2912_v29  ;;  %v3607_v54 = vrot.slane %v2856_v44, 5  ;;  %v2920_v52 = vshll.u32 %v7534_v47, 16  ;;  %v2934_v16 = vshll.u32 %v2856_v44, 16  ;;  %v6725_v14 = vld [vmem:[#allocation2 + $0x18] sm:$0xff] }
 0x19b   : > { %v2461_v34 = vpop.f32.mrf.mxu3  ;;  %v2081_v37 = vadd.f32 %v2080_v43, %v1847_v30  ;;  %v1738_v38 = vpack.c.b16 %v1722_v28, %v1721_v27  ;;  %v3759_v11 = vpack.c.b16 %v3728_v24, %v3727_v41  ;;  %v2907_v55 = vor.u32 %v2906_v45, %v2903_v46 }
 0x19c   : > { %v2918_v43 = vrot.slane %v2917_v48, 4  ;;  %v3609_v62 = vrot.slane %v3607_v54, 4  ;;  %v2922_v33 = vrot.slane %v2920_v52, 5  ;;  %v2938_v4 = vshrl.u32 %v2856_v44, 16 }
 0x19d   : > { %v7579_v18 = vadd.f32 %v2461_v34, %v2081_v37  ;;  %1886 = vmatmul.bf16.gmra.mxu1 %v1738_v38  ;;  %v2908_v12 = vrot.slane %v2907_v55, 4  ;;  %v6290_v56 = vrot.slane %v3535_v61, 9  ;;  %v2925_v24 = vshrl.u32 %v2855_v7, 16 }
 0x19e   : > { %v2745_v42 = vpop.f32.mrf.mxu0  ;;  %3847 = vmatmul.bf16.vlgmr.msrb.gmra.mxu2 %v3759_v11  ;;  %v2923_v47 = vsel %vm6991_vm12, %v2918_v43, %v2922_v33  ;;  %v2928_v25 = vshll.u32 %v2855_v7, 16  ;;  %v7596_v23 = vrot.slane %v2934_v16, 5  ;;  %v2940_v30 = vrot.slane %v2938_v4, 4  ;;  %v7615_v7 = vld [vmem:[#allocation2 + $0x2c] sm:$0x1] }
 0x19f   : > { %v7582_v49 = vadd.f32 %v2745_v42, %v7333_v1  ;;  %v3610_v1 = vrot.slane %v2857_v58, 5  ;;  %v2913_v28 = vsel %vm6991_vm12, %v2908_v12, %v2912_v29  ;;  %v3302_v34 = vunpack.c.l.b16 %v2923_v47  ;;  %v7617_v4 = vld [vmem:[#allocation2 + $0x1c] sm:$0xf] }
 0x1a0   : > { %v3608_v37 = vsel %vm6974_vm9, %v6290_v56, %v3607_v54  ;;  %v3301_v46 = vunpack.c.l.b16 %v2913_v28  ;;  %v2927_v11 = vrot.slane %v2925_v24, 4  ;;  %v2941_v29 = vor.u32 %v2940_v30, %v7596_v23  ;;  %v6755_v54 = vld [vmem:[%s8819_s4 + $0x1f0] sm:$0xff]  ;;  %v3536_v24 = vld [vmem:[#allocation2 + $0x24] sm:$0xe] }
 0x1a1   : > { %2784 = vmatmul.bf16.gmra.mxu0 %v6694_v51  ;;  %v2085_v2 = vpop.f32.mrf.mxu2  ;;  %v3611_v19 = vsel %vm6974_vm9, %v3609_v62, %v3610_v1  ;;  %v3729_v42 = vunpack.c.l.b16 %v3608_v37  ;;  %v6763_v62 = vld [vmem:[%s8819_s4 + $0x230] sm:$0xff]  ;;  %v5023_v37 = vrot.slane %v7617_v4, 5 }
 0x1a2   : > { %v1849_v59 = vpop.f32.mrf.mxu1  ;;  %v3730_v38 = vunpack.c.l.b16 %v3611_v19  ;;  %v3333_v51 = vpack.c.b16 %v3302_v34, %v3301_v46  ;;  %4837 = vmatpush.bf16.msra.mxu0 %v6755_v54  ;;  %v2942_v33 = vrot.slane %v2941_v29, 4  ;;  %5263 = vmatpush.bf16.msra.mxu1 %v6763_v62  ;;  %v7627_v34 = vld [vmem:[#allocation2 + $0x20] sm:$0x1] }
 0x1a3   : > { %v2463_v26 = vpop.f32.mrf.mxu3  ;;  %v2083_v0 = vadd.f32 %v2082_v31, %v1849_v59  ;;  %v7600_v31 = vld [vmem:[#allocation2 + $0x28] sm:$0xf]  ;;  %v2944_v59 = vshll.u32 %v2857_v58, 16  ;;  %v5025_v54 = vrot.slane %v5023_v37, 4 }
 0x1a4   : > { %v3614_v52 = vrot.slane %v7600_v31, 5  ;;  %v3760_v43 = vpack.c.b16 %v3730_v38, %v3729_v42 }
 0x1a5   : > { %v7585_v10 = vadd.f32 %v2463_v26, %v2083_v0  ;;  %v2946_v58 = vrot.slane %v2944_v59, 5  ;;  %v4958_v59 = vld [vmem:[#allocation2 + $0x24] sm:$0xe] }
 0x1a6   : > { %v2747_v13 = vpop.f32.mrf.mxu0  ;;  %v3616_v16 = vrot.slane %v3614_v52, 4 }
 0x1a7   : > { %v7592_v27 = vadd.f32 %v2747_v13, %v7348_v53  ;;  %v2930_v53 = vrot.slane %v2928_v25, 5  ;;  %v3617_v13 = vrot.slane %v7615_v7, 5  ;;  %v2947_v19 = vsel %vm6991_vm12, %v2942_v33, %v2946_v58  ;;  %v2858_v25 = vld [vmem:[#allocation2 + $0x24] sm:$0xf] }
 0x1a8   : > { %4162 = vmatmul.bf16.vlgmr.msrb.gmra.mxu3 %v6725_v14  ;;  %v4957_v14 = vld [vmem:[#allocation2 + $0x18] sm:$0xe]  ;;  %v2949_v42 = vshrl.u32 %v2858_v25, 16  ;;  %v2952_v62 = vshll.u32 %v2858_v25, 16 }
 0x1a9   : > { %v2087_v48 = vpop.f32.mrf.mxu2  ;;  %v2931_v61 = vor.u32 %v2930_v53, %v2927_v11  ;;  %v3618_v30 = vsel %vm6974_vm9, %v3616_v16, %v3617_v13  ;;  %v6513_v46 = vrot.slane %v4957_v14, 9  ;;  %v6726_v53 = vld [vmem:[#allocation2 + $0x24] sm:$0xff] }
 0x1aa   : > { %v1852_v41 = vpop.f32.mrf.mxu1 }
 0x1ab   : > { %v2466_v44 = vpop.f32.mrf.mxu3  ;;  %v2086_v45 = vadd.f32 %v2085_v2, %v1852_v41  ;;  %v6695_v2 = vld [vmem:[#allocation2 + $0x84] sm:$0xff]  ;;  %v2932_v47 = vrot.slane %v2931_v61, 4  ;;  %v2958_v41 = vshll.u32 %v7600_v31, 16  ;;  %v3732_v61 = vunpack.c.l.b16 %v3618_v30 }
 0x1ad   : > { %v7607_v55 = vadd.f32 %v2466_v44, %v2086_v45  ;;  %3421 = vmatmul.bf16.vlgmr.msrb.gmra.mxu1 %v3333_v51  ;;  %v2937_v28 = vsel %vm6991_vm12, %v2932_v47, %v7596_v23  ;;  %v2962_v44 = vshrl.u32 %v7600_v31, 16  ;;  %v3304_v45 = vunpack.c.l.b16 %v2947_v19  ;;  %v7634_v23 = vld [vmem:[#allocation2 + $0x28] sm:$0xf]  ;;  %v7651_v47 = vld [vmem:[#allocation2 + $0x34] sm:$0xf] }
 0x1ae   : > { %v2750_v26 = vpop.f32.mrf.mxu0  ;;  %3852 = vmatmul.bf16.gmra.mxu2 %v3760_v43  ;;  %v5024_v51 = vsel %vm6974_vm9, %v6513_v46, %v5023_v37  ;;  %v5026_v43 = vrot.slane %v7627_v34, 5  ;;  %v3303_v31 = vunpack.c.l.b16 %v2937_v28  ;;  %v7646_v33 = vrot.slane %v2958_v41, 5  ;;  %v7653_v28 = vld [vmem:[#allocation2 + $0x34] sm:$0xf]  ;;  %v4959_v41 = vld [vmem:[#allocation2 + $0x30] sm:$0xe] }
 0x1af   : > { %v7613_v0 = vadd.f32 %v2750_v26, %v7369_v32  ;;  %v5030_v58 = vrot.slane %v7634_v23, 5  ;;  %v5150_v13 = vunpack.c.l.b16 %v5024_v51  ;;  %v2954_v46 = vrot.slane %v2952_v62, 5  ;;  %v7661_v51 = vld [vmem:[#allocation2 + $0x38] sm:$0x1]  ;;  %v6696_v62 = vld [vmem:[#allocation2 + $0x90] sm:$0xff] }
 0x1b0   : > { %v5027_v16 = vsel %vm6974_vm9, %v5025_v54, %v5026_v43  ;;  %v5037_v54 = vrot.slane %v7651_v47, 5 }
 0x1b1   : > { %8843 = vst [vmem:[#allocation5_spill] sm:$0xff] %v7613_v0  ;;  %2789 = vmatmul.bf16.gmra.mxu0 %v6695_v2  ;;  %v2090_v32 = vpop.f32.mrf.mxu2  ;;  %v7644_v2 = vld [vmem:[#allocation2 + $0x2c] sm:$0x1]  ;;  %v5151_v14 = vunpack.c.l.b16 %v5027_v16  ;;  %v5032_v30 = vrot.slane %v5030_v58, 4 }
 0x1b2   : > { %v1854_v1 = vpop.f32.mrf.mxu1  ;;  %v5033_v37 = vrot.slane %v7644_v2, 5  ;;  %v6750_v0 = vld [vmem:[%s8819_s4 + $0x1c8] sm:$0xff] }
 0x1b3   : > { %v2468_v12 = vpop.f32.mrf.mxu3  ;;  %v2088_v56 = vadd.f32 %v2087_v48, %v1854_v1  ;;  %v6291_v48 = vrot.slane %v3536_v24, 9  ;;  %v3334_v24 = vpack.c.b16 %v3304_v45, %v3303_v31  ;;  %v3621_v31 = vrot.slane %v7653_v28, 5 }
 0x1b4   : > { %v5034_v45 = vsel %vm6974_vm9, %v5032_v30, %v5033_v37 }
 0x1b5   : > { %v7630_v38 = vadd.f32 %v2468_v12, %v2088_v56  ;;  %v3615_v26 = vsel %vm6974_vm9, %v6291_v48, %v3614_v52  ;;  %v2951_v12 = vrot.slane %v2949_v42, 4  ;;  %v6514_v56 = vrot.slane %v4958_v59, 9 }
 0x1b6   : > { %v2752_v11 = vpop.f32.mrf.mxu0  ;;  %v3731_v25 = vunpack.c.l.b16 %v3615_v26  ;;  %v2968_v59 = vshll.u32 %v7615_v7, 16  ;;  %v6515_v26 = vrot.slane %v4959_v41, 9  ;;  %v5153_v16 = vunpack.c.l.b16 %v5034_v45  ;;  %v7676_v7 = vld [vmem:[#allocation2 + $0x38] sm:$0x1] }
 0x1b7   : > { %v7637_v29 = vadd.f32 %v2752_v11, %v7384_v21  ;;  %v2964_v21 = vrot.slane %v2962_v44, 4  ;;  %v7656_v11 = vpack.c.b16 %v5151_v14, %v5150_v13  ;;  %v2955_v13 = vor.u32 %v2954_v46, %v2951_v12  ;;  %v3537_v12 = vld [vmem:[#allocation2 + $0x30] sm:$0xe] }
 0x1b8   : > { %4167 = vmatmul.bf16.gmra.mxu3 %v6726_v53  ;;  %v5031_v53 = vsel %vm6974_vm9, %v6514_v56, %v5030_v58  ;;  %v3761_v48 = vpack.c.b16 %v3732_v61, %v3731_v25  ;;  %v5039_v58 = vrot.slane %v5037_v54, 4  ;;  %v5040_v14 = vrot.slane %v7661_v51, 5 }
 0x1b9   : > { %8844 = vst [vmem:[#allocation6_spill] sm:$0xff] %v7637_v29  ;;  %v2092_v19 = vpop.f32.mrf.mxu2  ;;  %v2965_v42 = vor.u32 %v2964_v21, %v7646_v33  ;;  %v5152_v21 = vunpack.c.l.b16 %v5031_v53  ;;  %v2970_v41 = vrot.slane %v2968_v59, 5  ;;  %v3624_v45 = vrot.slane %v7676_v7, 5 }
 0x1ba   : > { %v1857_v52 = vpop.f32.mrf.mxu1  ;;  %8845 = vst [vmem:[#allocation7_spill] sm:$0xff] %v7656_v11  ;;  %v5041_v25 = vsel %vm6974_vm9, %v5039_v58, %v5040_v14  ;;  %v6292_v58 = vrot.slane %v3537_v12, 9 }
 0x1bb   : > { %v2471_v1 = vpop.f32.mrf.mxu3  ;;  %v2091_v44 = vadd.f32 %v2090_v32, %v1857_v52  ;;  %v2966_v56 = vrot.slane %v2965_v42, 4  ;;  %v7678_v52 = vpack.c.b16 %v5153_v16, %v5152_v21  ;;  %v5155_v46 = vunpack.c.l.b16 %v5041_v25  ;;  %v2861_v42 = vld [vmem:[#allocation2 + $0x30] sm:$0xf] }
 0x1bc   : > { %v6727_v16 = vld [vmem:[#allocation2 + $0x30] sm:$0xff]  ;;  %v2973_v14 = vshrl.u32 %v2861_v42, 16  ;;  %v3622_v25 = vsel %vm6974_vm9, %v6292_v58, %v3621_v31 }
 0x1bd   : > { %v7666_v43 = vadd.f32 %v2471_v1, %v2091_v44  ;;  %3426 = vmatmul.bf16.gmra.mxu1 %v3334_v24  ;;  %v5038_v1 = vsel %vm6974_vm9, %v6515_v26, %v5037_v54  ;;  %8847 = vst [vmem:[#allocation9_spill] sm:$0xff] %v7678_v52  ;;  %v2971_v54 = vsel %vm6991_vm12, %v2966_v56, %v2970_v41  ;;  %v2986_v26 = vshrl.u32 %v7653_v28, 16 }
 0x1be   : > { %v2755_v32 = vpop.f32.mrf.mxu0  ;;  %3857 = vmatmul.bf16.gmra.mxu2 %v3761_v48  ;;  %v5154_v44 = vunpack.c.l.b16 %v5038_v1  ;;  %v2956_v48 = vrot.slane %v2955_v13, 4  ;;  %v2976_v56 = vshll.u32 %v2861_v42, 16 }
 0x1bf   : > { %v7671_v61 = vadd.f32 %v2755_v32, %v7402_v63  ;;  %v3623_v63 = vrot.slane %v3621_v31, 4  ;;  %v2982_v32 = vshll.u32 %v7653_v28, 16  ;;  %v7699_v28 = vld [vmem:[#allocation2 + $0x40] sm:$0xf] }
 0x1c0   : > { %v2961_v1 = vsel %vm6991_vm12, %v2956_v48, %v7646_v33  ;;  %v3733_v48 = vunpack.c.l.b16 %v3622_v25  ;;  %v2978_v42 = vrot.slane %v2976_v56, 5 }
 0x1c1   : > { %8846 = vst [vmem:[#allocation8_spill] sm:$0xff] %v7671_v61  ;;  %2794 = vmatmul.bf16.gmra.mxu0 %v6696_v62  ;;  %v2095_v37 = vpop.f32.mrf.mxu2  ;;  %v7687_v62 = vpack.c.b16 %v5155_v46, %v5154_v44  ;;  %v7703_v12 = vrot.slane %v2982_v32, 5  ;;  %v7705_v44 = vld [vmem:[#allocation2 + $0x44] sm:$0x1]  ;;  %v5044_v46 = vrot.slane %v7699_v28, 5  ;;  %v6754_v32 = vld [vmem:[%s8819_s4 + $0x1e8] sm:$0xff] }
 0x1c2   : > { %v1859_v30 = vpop.f32.mrf.mxu1  ;;  %v5047_v25 = vrot.slane %v7705_v44, 5  ;;  %4838 = vmatpush.bf16.msra.mxu0 %v6754_v32 }
 0x1c3   : > { %v2473_v24 = vpop.f32.mrf.mxu3  ;;  %v2093_v53 = vadd.f32 %v2092_v19, %v1859_v30  ;;  %8848 = vst [vmem:[#allocation10_spill] sm:$0xff] %v7687_v62  ;;  %v3625_v19 = vsel %vm6974_vm9, %v3623_v63, %v3624_v45  ;;  %v4960_v30 = vld [vmem:[#allocation2 + $0x3c] sm:$0xe]  ;;  %v2988_v63 = vrot.slane %v2986_v26, 4  ;;  %v2975_v45 = vrot.slane %v2973_v14, 4 }
 0x1c4   : > { %v3734_v41 = vunpack.c.l.b16 %v3625_v19  ;;  %v5046_v26 = vrot.slane %v5044_v46, 4 }
 0x1c5   : > { %v7689_v21 = vadd.f32 %v2473_v24, %v2093_v53  ;;  %v3306_v24 = vunpack.c.l.b16 %v2971_v54  ;;  %v6516_v54 = vrot.slane %v4960_v30, 9  ;;  %v2989_v19 = vor.u32 %v2988_v63, %v7703_v12 }
 0x1c6   : > { %v2757_v59 = vpop.f32.mrf.mxu0  ;;  %v3762_v58 = vpack.c.b16 %v3734_v41, %v3733_v48  ;;  %v6697_v41 = vld [vmem:[#allocation2 + $0x9c] sm:$0xff]  ;;  %v2979_v63 = vor.u32 %v2978_v42, %v2975_v45 }
 0x1c7   : > { %v7694_v13 = vadd.f32 %v2757_v59, %v7417_v57  ;;  %v3305_v57 = vunpack.c.l.b16 %v2961_v1  ;;  %v2865_v59 = vld [vmem:[#allocation2 + $0x40] sm:$0xf]  ;;  %v5045_v1 = vsel %vm6974_vm9, %v6516_v54, %v5044_v46  ;;  %v5048_v46 = vsel %vm6974_vm9, %v5046_v26, %v5047_v25  ;;  %v7726_v54 = vld [vmem:[#allocation2 + $0x44] sm:$0x1]  ;;  %v2864_v42 = vld [vmem:[#allocation2 + $0x3c] sm:$0xf] }
 0x1c8   : > { %4172 = vmatmul.bf16.gmra.mxu3 %v6727_v16  ;;  %v2990_v48 = vrot.slane %v2989_v19, 4  ;;  %v3010_v62 = vshrl.u32 %v2865_v59, 16 }
 0x1c9   : > { %8849 = vst [vmem:[#allocation11_spill] sm:$0xff] %v7694_v13  ;;  %v2097_v22 = vpop.f32.mrf.mxu2  ;;  %v3335_v31 = vpack.c.b16 %v3306_v24, %v3305_v57  ;;  %v6762_v24 = vld [vmem:[%s8819_s4 + $0x228] sm:$0xff]  ;;  %v2992_v57 = vshll.u32 %v7676_v7, 16  ;;  %v3006_v7 = vshll.u32 %v2865_v59, 16 }
 0x1ca   : > { %v1862_v33 = vpop.f32.mrf.mxu1  ;;  %5264 = vmatpush.bf16.msra.mxu1 %v6762_v24 }
 0x1cb   : > { %v2476_v53 = vpop.f32.mrf.mxu3  ;;  %v2096_v16 = vadd.f32 %v2095_v37, %v1862_v33  ;;  %v3628_v37 = vrot.slane %v2865_v59, 5  ;;  %v5156_v33 = vunpack.c.l.b16 %v5045_v1  ;;  %v2994_v45 = vrot.slane %v2992_v57, 5 }
 0x1cc   : > { %v3631_v1 = vrot.slane %v7726_v54, 5  ;;  %v2997_v59 = vshrl.u32 %v2864_v42, 16 }
 0x1cd   : > { %v7715_v14 = vadd.f32 %v2476_v53, %v2096_v16  ;;  %3431 = vmatmul.bf16.gmra.mxu1 %v3335_v31  ;;  %v5157_v53 = vunpack.c.l.b16 %v5048_v46  ;;  %v3538_v16 = vld [vmem:[#allocation2 + $0x3c] sm:$0xe]  ;;  %v3630_v31 = vrot.slane %v3628_v37, 4  ;;  %v2995_v24 = vsel %vm6991_vm12, %v2990_v48, %v2994_v45  ;;  %v4961_v48 = vld [vmem:[#allocation2 + $0x48] sm:$0xe] }
 0x1ce   : > { %v2760_v56 = vpop.f32.mrf.mxu0  ;;  %3862 = vmatmul.bf16.gmra.mxu2 %v3762_v58  ;;  %v6293_v25 = vrot.slane %v3538_v16, 9  ;;  %v7745_v16 = vrot.slane %v3006_v7, 5  ;;  %v2868_v7 = vld [vmem:[#allocation2 + $0x4c] sm:$0xf] }
 0x1cf   : > { %v7721_v30 = vadd.f32 %v2760_v56, %v7438_v39  ;;  %v7728_v32 = vpack.c.b16 %v5157_v53, %v5156_v33  ;;  %v2980_v56 = vrot.slane %v2979_v63, 4  ;;  %v6728_v63 = vld [vmem:[#allocation2 + $0x3c] sm:$0xff]  ;;  %v3000_v53 = vshll.u32 %v2864_v42, 16 }
 0x1d0   : > { %v3629_v57 = vsel %vm6974_vm9, %v6293_v25, %v3628_v37  ;;  %v4289_v37 = vld [vmem:[#allocation2 + $0x50] sm:$0x1] }
 0x1d1   : > { %8850 = vst [vmem:[#allocation12_spill] sm:$0xff] %v7721_v30  ;;  %2799 = vmatmul.bf16.gmra.mxu0 %v6697_v41  ;;  %v2100_v26 = vpop.f32.mrf.mxu2  ;;  %v2985_v19 = vsel %vm6991_vm12, %v2980_v56, %v7703_v12  ;;  %v3012_v12 = vrot.slane %v3010_v62, 4  ;;  %v3735_v45 = vunpack.c.l.b16 %v3629_v57  ;;  %v5054_v57 = vrot.slane %v4289_v37, 5  ;;  %v2869_v37 = vld [vmem:[#allocation2 + $0x50] sm:$0x1] }
 0x1d2   : > { %8851 = vst [vmem:[#allocation13_spill] sm:$0xff] %v7728_v32  ;;  %v1864_v39 = vpop.f32.mrf.mxu1  ;;  %v3307_v56 = vunpack.c.l.b16 %v2985_v19  ;;  %v2999_v32 = vrot.slane %v2997_v59, 4 }
 0x1d3   : > { %v2478_v58 = vpop.f32.mrf.mxu3  ;;  %v2098_v52 = vadd.f32 %v2097_v22, %v1864_v39  ;;  %v3632_v22 = vsel %vm6974_vm9, %v3630_v31, %v3631_v1  ;;  %v7747_v39 = vld [vmem:[#allocation2 + $0x4c] sm:$0xf]  ;;  %v3013_v42 = vor.u32 %v3012_v12, %v7745_v16 }
 0x1d4   : > { %v5051_v25 = vrot.slane %v7747_v39, 5 }
 0x1d5   : > { %v7736_v41 = vadd.f32 %v2478_v58, %v2098_v52  ;;  %v3308_v52 = vunpack.c.l.b16 %v2995_v24  ;;  %v3736_v58 = vunpack.c.l.b16 %v3632_v22  ;;  %v3016_v22 = vshll.u32 %v7726_v54, 16  ;;  %v6753_v54 = vld [vmem:[%s8819_s4 + $0x1e0] sm:$0xff] }
 0x1d6   : > { %v2762_v46 = vpop.f32.mrf.mxu0  ;;  %4839 = vmatpush.bf16.msra.mxu0 %v6753_v54 }
 0x1d7   : > { %v7743_v33 = vadd.f32 %v2762_v46, %v7464_v35  ;;  %v3002_v35 = vrot.slane %v3000_v53, 5  ;;  %v6517_v46 = vrot.slane %v4961_v48, 9  ;;  %v3336_v20 = vpack.c.b16 %v3308_v52, %v3307_v56 }
 0x1d8   : > { %4177 = vmatmul.bf16.gmra.mxu3 %v6728_v63  ;;  %v5053_v63 = vrot.slane %v5051_v25, 4  ;;  %v3763_v24 = vpack.c.b16 %v3736_v58, %v3735_v45  ;;  %v3635_v53 = vrot.slane %v2868_v7, 5  ;;  %v3014_v52 = vrot.slane %v3013_v42, 4 }
 0x1d9   : > { %8852 = vst [vmem:[#allocation14_spill] sm:$0xff] %v7743_v33  ;;  %v2102_v11 = vpop.f32.mrf.mxu2  ;;  %v5052_v19 = vsel %vm6974_vm9, %v6517_v46, %v5051_v25  ;;  %v3003_v48 = vor.u32 %v3002_v35, %v2999_v32  ;;  %v3539_v46 = vld [vmem:[#allocation2 + $0x48] sm:$0xe] }
 0x1da   : > { %v1867_v31 = vpop.f32.mrf.mxu1  ;;  %v5055_v58 = vsel %vm6974_vm9, %v5053_v63, %v5054_v57  ;;  %v5158_v56 = vunpack.c.l.b16 %v5052_v19  ;;  %v3637_v25 = vrot.slane %v3635_v53, 4  ;;  %v3638_v57 = vrot.slane %v2869_v37, 5 }
 0x1db   : > { %v2481_v1 = vpop.f32.mrf.mxu3  ;;  %v2101_v62 = vadd.f32 %v2100_v26, %v1867_v31  ;;  %v6698_v26 = vld [vmem:[#allocation2 + $0xa8] sm:$0xff]  ;;  %v5159_v45 = vunpack.c.l.b16 %v5055_v58  ;;  %v3004_v35 = vrot.slane %v3003_v48, 4 }
 0x1dc   : > { %v2867_v31 = vld [vmem:[#allocation2 + $0x48] sm:$0xf] }
 0x1dd   : > { %v7754_v33 = vadd.f32 %v2481_v1, %v2101_v62  ;;  %3436 = vmatmul.bf16.gmra.mxu1 %v3336_v20  ;;  %v3018_v20 = vrot.slane %v3016_v22, 5  ;;  %v3030_v62 = vshll.u32 %v2868_v7, 16  ;;  %v3009_v22 = vsel %vm6991_vm12, %v3004_v35, %v7745_v16  ;;  %v7787_v35 = vld [vmem:[#allocation2 + $0x58] sm:$0xf] }
 0x1de   : > { %v2765_v59 = vpop.f32.mrf.mxu0  ;;  %3867 = vmatmul.bf16.gmra.mxu2 %v3763_v24  ;;  %v3034_v24 = vshrl.u32 %v2868_v7, 16 }
 0x1df   : > { %v7757_v12 = vadd.f32 %v2765_v59, %v7497_v17  ;;  %v7764_v17 = vpack.c.b16 %v5159_v45, %v5158_v56  ;;  %v3019_v42 = vsel %vm6991_vm12, %v3014_v52, %v3018_v20  ;;  %v3021_v59 = vshrl.u32 %v2867_v31, 16  ;;  %v6729_v56 = vld [vmem:[#allocation2 + $0x48] sm:$0xff] }
 0x1e0   : > { %v3310_v48 = vunpack.c.l.b16 %v3019_v42  ;;  %v6294_v45 = vrot.slane %v3539_v46, 9  ;;  %v3639_v52 = vsel %vm6974_vm9, %v3637_v25, %v3638_v57  ;;  %v7781_v20 = vrot.slane %v3030_v62, 5  ;;  %v6751_v25 = vld [vmem:[%s8819_s4 + $0x1d0] sm:$0xff] }
 0x1e1   : > { %8853 = vst [vmem:[#allocation15_spill] sm:$0xff] %v7757_v12  ;;  %2804 = vmatmul.bf16.gmra.mxu0 %v6698_v26  ;;  %v2105_v19 = vpop.f32.mrf.mxu2  ;;  %v3024_v26 = vshll.u32 %v2867_v31, 16  ;;  %v3036_v16 = vrot.slane %v3034_v24, 4  ;;  %v7783_v31 = vld [vmem:[#allocation2 + $0x58] sm:$0xf]  ;;  %v3023_v46 = vrot.slane %v3021_v59, 4 }
 0x1e2   : > { %8854 = vst [vmem:[#allocation16_spill] sm:$0xff] %v7764_v17  ;;  %v1869_v1 = vpop.f32.mrf.mxu1  ;;  %v2870_v42 = vld [vmem:[#allocation2 + $0x54] sm:$0xf]  ;;  %v7795_v12 = vld [vmem:[#allocation2 + $0x5c] sm:$0x1] }
 0x1e3   : > { %v2483_v32 = vpop.f32.mrf.mxu3  ;;  %v2103_v63 = vadd.f32 %v2102_v11, %v1869_v1  ;;  %v6752_v11 = vld [vmem:[%s8819_s4 + $0x1d8] sm:$0xff]  ;;  %v3309_v1 = vunpack.c.l.b16 %v3009_v22  ;;  %v3026_v62 = vrot.slane %v3024_v26, 5  ;;  %v4962_v24 = vld [vmem:[#allocation2 + $0x54] sm:$0xe]  ;;  %v3048_v59 = vshll.u32 %v2870_v42, 16 }
 0x1e4   : > { %4840 = vmatpush.bf16.msra.mxu0 %v6752_v11  ;;  %v3642_v11 = vrot.slane %v7787_v35, 5 }
 0x1e5   : > { %v7771_v54 = vadd.f32 %v2483_v32, %v2103_v63  ;;  %v3636_v32 = vsel %vm6974_vm9, %v6294_v45, %v3635_v53  ;;  %v3040_v63 = vshll.u32 %v2869_v37, 16  ;;  %v3337_v57 = vpack.c.b16 %v3310_v48, %v3309_v1  ;;  %v3540_v45 = vld [vmem:[#allocation2 + $0x54] sm:$0xe] }
 0x1e6   : > { %v2767_v58 = vpop.f32.mrf.mxu0  ;;  %v3737_v17 = vunpack.c.l.b16 %v3636_v32  ;;  %v3037_v53 = vor.u32 %v3036_v16, %v7781_v20  ;;  %v6518_v37 = vrot.slane %v4962_v24, 9  ;;  %v3027_v1 = vor.u32 %v3026_v62, %v3023_v46  ;;  %v7799_v16 = vld [vmem:[#allocation2 + $0x5c] sm:$0x1] }
 0x1e7   : > { %v7779_v7 = vadd.f32 %v2767_v58, %v7519_v15  ;;  %v3738_v15 = vunpack.c.l.b16 %v3639_v52  ;;  %v5058_v58 = vrot.slane %v7783_v31, 5  ;;  %v3042_v13 = vrot.slane %v3040_v63, 5 }
 0x1e8   : > { %4182 = vmatmul.bf16.gmra.mxu3 %v6729_v56  ;;  %4841 = vmatpush.bf16.msra.mxu0 %v6751_v25  ;;  %v6295_v29 = vrot.slane %v3540_v45, 9  ;;  %v5061_v25 = vrot.slane %v7795_v12, 5  ;;  %v3644_v46 = vrot.slane %v3642_v11, 4  ;;  %v3050_v63 = vrot.slane %v3048_v59, 5  ;;  %v4275_v45 = vld [vmem:[#allocation2 + $0x18] sm:$0xf] }
 0x1e9   : > { %8855 = vst [vmem:[#allocation17_spill] sm:$0xff] %v7779_v7  ;;  %v3045_v7 = vshrl.u32 %v2870_v42, 16  ;;  %v2107_v52 = vpop.f32.mrf.mxu2  ;;  %v5060_v26 = vrot.slane %v5058_v58, 4  ;;  %v3764_v48 = vpack.c.b16 %v3738_v15, %v3737_v17  ;;  %v5059_v17 = vsel %vm6974_vm9, %v6518_v37, %v5058_v58  ;;  %v6699_v42 = vld [vmem:[#allocation2 + $0xb4] sm:$0xff]  ;;  %v6749_v58 = vld [vmem:[%s8819_s4 + $0x1c0] sm:$0xff] }
 0x1ea   : > { %v1872_v22 = vpop.f32.mrf.mxu1  ;;  %v3038_v15 = vrot.slane %v3037_v53, 4  ;;  %v3054_v24 = vshll.u32 %v7787_v35, 16  ;;  %v5160_v53 = vunpack.c.l.b16 %v5059_v17 }
 0x1eb   : > { %v2486_v56 = vpop.f32.mrf.mxu3  ;;  %v2106_v30 = vadd.f32 %v2105_v19, %v1872_v22  ;;  %v6761_v19 = vld [vmem:[%s8819_s4 + $0x220] sm:$0xff]  ;;  %v3047_v62 = vrot.slane %v3045_v7, 4  ;;  %v3028_v22 = vrot.slane %v3027_v1, 4 }
 0x1ec   : > { %4842 = vmatpush.bf16.msra.mxu0 %v6750_v0  ;;  %5265 = vmatpush.bf16.msra.mxu1 %v6761_v19  ;;  %v3643_v0 = vsel %vm6974_vm9, %v6295_v29, %v3642_v11  ;;  %v7832_v11 = vld [vmem:[#allocation2 + $0x64] sm:$0xf] }
 0x1ed   : > { %v7797_v61 = vadd.f32 %v2486_v56, %v2106_v30  ;;  %3441 = vmatmul.bf16.gmra.mxu1 %v3337_v57  ;;  %v3058_v57 = vshrl.u32 %v7787_v35, 16  ;;  %v3645_v56 = vrot.slane %v7799_v16, 5  ;;  %v3033_v37 = vsel %vm6991_vm12, %v3028_v22, %v7781_v20  ;;  %v6730_v22 = vld [vmem:[#allocation2 + $0x54] sm:$0xff] }
 0x1ee   : > { %v2770_v32 = vpop.f32.mrf.mxu0  ;;  %3872 = vmatmul.bf16.gmra.mxu2 %v3764_v48  ;;  %v3043_v48 = vsel %vm6991_vm12, %v3038_v15, %v3042_v13  ;;  %v3051_v17 = vor.u32 %v3050_v63, %v3047_v62  ;;  %v4333_v20 = vshll.u32 %v7617_v4, 16  ;;  %v4337_v13 = vshrl.u32 %v7617_v4, 16 }
 0x1ef   : > { %v7811_v30 = vadd.f32 %v2770_v32, %v7545_v6  ;;  %v5062_v6 = vsel %vm6974_vm9, %v5060_v26, %v5061_v25  ;;  %v3646_v26 = vsel %vm6974_vm9, %v3644_v46, %v3645_v56  ;;  %v3056_v25 = vrot.slane %v3054_v24, 5 }
 0x1f0   : > { %v5161_v7 = vunpack.c.l.b16 %v5062_v6  ;;  %v3060_v29 = vrot.slane %v3058_v57, 4  ;;  %4843 = vmatpush.bf16.msra.mxu0 %v6749_v58  ;;  %v4324_v6 = vshrl.u32 %v4275_v45, 16  ;;  %v3312_v56 = vunpack.c.l.b16 %v3043_v48  ;;  %v7845_v48 = vld [vmem:[#allocation2 + $0x64] sm:$0xf] }
 0x1f1   : > { %8856 = vst [vmem:[#allocation18_spill] sm:$0xff] %v7811_v30  ;;  %2809 = vmatmul.bf16.gmra.mxu0 %v6699_v42  ;;  %v2110_v19 = vpop.f32.mrf.mxu2  ;;  %v3541_v42 = vld [vmem:[#allocation2 + $0x60] sm:$0xe]  ;;  %v4327_v30 = vshll.u32 %v4275_v45, 16  ;;  %v3739_v63 = vunpack.c.l.b16 %v3643_v0  ;;  %v3064_v24 = vshll.u32 %v7799_v16, 16  ;;  %v3649_v57 = vrot.slane %v7832_v11, 5 }
 0x1f2   : > { %v1874_v59 = vpop.f32.mrf.mxu1  ;;  %v7830_v1 = vpack.c.b16 %v5161_v7, %v5160_v53  ;;  %v3311_v58 = vunpack.c.l.b16 %v3033_v37  ;;  %v3052_v53 = vrot.slane %v3051_v17, 4  ;;  %v3061_v7 = vor.u32 %v3060_v29, %v3056_v25  ;;  %8860 = vst [vmem:[#allocation22_spill] sm:$0xff] %v7845_v48  ;;  %v7849_v37 = vld [vmem:[#allocation2 + $0x68] sm:$0x1] }
 0x1f3   : > { %v2488_v35 = vpop.f32.mrf.mxu3  ;;  %v2108_v32 = vadd.f32 %v2107_v52, %v1874_v59  ;;  %v3740_v52 = vunpack.c.l.b16 %v3646_v26  ;;  %v6296_v45 = vrot.slane %v3541_v42, 9  ;;  %v4326_v4 = vrot.slane %v4324_v6, 4 }
 0x1f4   : > { %8857 = vst [vmem:[#allocation19_spill] sm:$0xff] %v7830_v1  ;;  %v4329_v59 = vrot.slane %v4327_v30, 5  ;;  %v3338_v26 = vpack.c.b16 %v3312_v56, %v3311_v58  ;;  %v3057_v16 = vsel %vm6991_vm12, %v3052_v53, %v3056_v25  ;;  %v3651_v30 = vrot.slane %v3649_v57, 4  ;;  %v6700_v56 = vld [vmem:[#allocation2 + $0xc0] sm:$0xff] }
 0x1f5   : > { %v7836_v15 = vadd.f32 %v2488_v35, %v2108_v32  ;;  %v7843_v35 = vrot.slane %v4333_v20, 5  ;;  %v4339_v32 = vrot.slane %v4337_v13, 4  ;;  %v7853_v17 = vsel %vm6974_vm9, %v6296_v45, %v3649_v57 }
 0x1f6   : > { %v2772_v46 = vpop.f32.mrf.mxu0  ;;  %v3062_v6 = vrot.slane %v3061_v7, 4  ;;  %v4343_v20 = vshll.u32 %v7627_v34, 16  ;;  %v5065_v13 = vrot.slane %v7845_v48, 5  ;;  %v3652_v45 = vrot.slane %v7849_v37, 5 }
 0x1f7   : > { %8858 = vst [vmem:[#allocation20_spill] sm:$0xff] %v7836_v15  ;;  %v7839_v62 = vadd.f32 %v2772_v46, %v7567_v8  ;;  %v3765_v8 = vpack.c.b16 %v3740_v52, %v3739_v63  ;;  %v4278_v46 = vld [vmem:[#allocation2 + $0x24] sm:$0xf]  ;;  %v4330_v52 = vor.u32 %v4329_v59, %v4326_v4  ;;  %v4340_v63 = vor.u32 %v4339_v32, %v7843_v35  ;;  %v4281_v59 = vld [vmem:[#allocation2 + $0x30] sm:$0xf] }
 0x1f8   : > { %4187 = vmatmul.bf16.gmra.mxu3 %v6730_v22  ;;  %v3066_v22 = vrot.slane %v3064_v24, 5  ;;  %v4348_v25 = vshrl.u32 %v4278_v46, 16  ;;  %v4351_v24 = vshll.u32 %v4278_v46, 16  ;;  %v4361_v57 = vshrl.u32 %v7634_v23, 16  ;;  %v7869_v32 = vld [vmem:[#allocation2 + $0x68] sm:$0x1] }
 0x1f9   : > { %8859 = vst [vmem:[#allocation21_spill] sm:$0xff] %v7839_v62  ;;  %v2112_v42 = vpop.f32.mrf.mxu2  ;;  %v7866_v7 = vunpack.c.l.b16 %v3057_v16  ;;  %v3741_v4 = vunpack.c.l.b16 %v7853_v17  ;;  %v4345_v46 = vrot.slane %v4343_v20, 5  ;;  %v4963_v16 = vld [vmem:[#allocation2 + $0x60] sm:$0xe]  ;;  %v5068_v62 = vrot.slane %v7869_v32, 5 }
 0x1fa   : > { %v1877_v0 = vpop.f32.mrf.mxu1  ;;  %8863 = vst [vmem:[#allocation25_spill] sm:$0xff] %v7869_v32  ;;  %v4363_v17 = vrot.slane %v4361_v57, 4  ;;  %v4385_v20 = vshrl.u32 %v7651_v47, 16 }
 0x1fb   : > { %v2491_v1 = vpop.f32.mrf.mxu3  ;;  %v2111_v29 = vadd.f32 %v2110_v19, %v1877_v0  ;;  %v4357_v19 = vshll.u32 %v7634_v23, 16  ;;  %v5067_v0 = vrot.slane %v5065_v13, 4  ;;  %v4331_v23 = vrot.slane %v4330_v52, 4 }
 0x1fd   : > { %v7858_v58 = vadd.f32 %v2491_v1, %v2111_v29  ;;  %3446 = vmatmul.bf16.gmra.mxu1 %v3338_v26  ;;  %v3067_v1 = vsel %vm6991_vm12, %v3062_v6, %v3066_v22  ;;  %v3653_v26 = vsel %vm6974_vm9, %v3651_v30, %v3652_v45  ;;  %v4350_v29 = vrot.slane %v4348_v25, 4 }
 0x1fe   : > { %v2775_v53 = vpop.f32.mrf.mxu0  ;;  %3877 = vmatmul.bf16.gmra.mxu2 %v3765_v8  ;;  %v4353_v8 = vrot.slane %v4351_v24, 5  ;;  %v3078_v22 = vshll.u32 %v7832_v11, 16  ;;  %v4375_v6 = vshll.u32 %v4281_v59, 16  ;;  %v4381_v30 = vshll.u32 %v7651_v47, 16  ;;  %v6731_v47 = vld [vmem:[#allocation2 + $0x60] sm:$0xff] }
 0x1ff   : > { %8861 = vst [vmem:[#allocation23_spill] sm:$0xff] %v7858_v58  ;;  %v7864_v34 = vadd.f32 %v2775_v53, %v7579_v18  ;;  %v4341_v18 = vrot.slane %v4340_v63, 4  ;;  %v7875_v53 = vrot.slane %v4357_v19, 5  ;;  %v3082_v63 = vshrl.u32 %v7832_v11, 16  ;;  %v2873_v11 = vld [vmem:[#allocation2 + $0x60] sm:$0xf] }
 0x200   : > { %v6519_v25 = vrot.slane %v4963_v16, 9  ;;  %v5069_v24 = vsel %vm6974_vm9, %v5067_v0, %v5068_v62  ;;  %v3314_v45 = vunpack.c.l.b16 %v3067_v1  ;;  %v3742_v19 = vunpack.c.l.b16 %v3653_v26 }
 0x201   : > { %8862 = vst [vmem:[#allocation24_spill] sm:$0xff] %v7864_v34  ;;  %2814 = vmatmul.bf16.gmra.mxu0 %v6700_v56  ;;  %v4372_v34 = vshrl.u32 %v4281_v59, 16  ;;  %v2115_v52 = vpop.f32.mrf.mxu2  ;;  %v4336_v57 = vsel %vm6991_vm12, %v4331_v23, %v7843_v35  ;;  %v4367_v59 = vshll.u32 %v7644_v2, 16  ;;  %v4364_v26 = vor.u32 %v4363_v17, %v7875_v53 }
 0x202   : > { %v1879_v58 = vpop.f32.mrf.mxu1  ;;  %v5066_v62 = vsel %vm6974_vm9, %v6519_v25, %v5065_v13  ;;  %v4377_v0 = vrot.slane %v4375_v6, 5  ;;  %v7898_v2 = vrot.slane %v3078_v22, 5  ;;  %v7900_v23 = vrot.slane %v4381_v30, 5  ;;  %v4284_v25 = vld [vmem:[#allocation2 + $0x3c] sm:$0xf] }
 0x203   : > { %v2493_v15 = vpop.f32.mrf.mxu3  ;;  %v2113_v56 = vadd.f32 %v2112_v42, %v1879_v58  ;;  %v4346_v42 = vsel %vm6991_vm12, %v4341_v18, %v4345_v46  ;;  %v4354_v58 = vor.u32 %v4353_v8, %v4350_v29  ;;  %v4374_v35 = vrot.slane %v4372_v34, 4 }
 0x204   : > { %v4387_v16 = vrot.slane %v4385_v20, 4  ;;  %v3069_v46 = vshrl.u32 %v2873_v11, 16  ;;  %v3072_v18 = vshll.u32 %v2873_v11, 16  ;;  %v5162_v29 = vunpack.c.l.b16 %v5066_v62 }
 0x205   : > { %v7888_v32 = vadd.f32 %v2493_v15, %v2113_v56  ;;  %v3084_v15 = vrot.slane %v3082_v63, 4  ;;  %v5163_v8 = vunpack.c.l.b16 %v5069_v24  ;;  %v3339_v13 = vpack.c.b16 %v3314_v45, %v7866_v7 }
 0x206   : > { %v2777_v48 = vpop.f32.mrf.mxu0  ;;  %v3766_v56 = vpack.c.b16 %v3742_v19, %v3741_v4  ;;  %v4725_v6 = vunpack.c.l.b16 %v4346_v42  ;;  %v4355_v22 = vrot.slane %v4354_v58, 4  ;;  %v4391_v30 = vshll.u32 %v7661_v51, 16 }
 0x207   : > { %v7895_v1 = vadd.f32 %v2777_v48, %v7585_v10  ;;  %v4724_v10 = vunpack.c.l.b16 %v4336_v57  ;;  %v4369_v48 = vrot.slane %v4367_v59, 5  ;;  %v7906_v63 = vpack.c.b16 %v5163_v8, %v5162_v29  ;;  %v7910_v59 = vld [vmem:[#allocation2 + $0x70] sm:$0xf] }
 0x208   : > { %4192 = vmatmul.bf16.gmra.mxu3 %v6731_v47  ;;  %v7903_v47 = vld [vmem:[#allocation2 + $0x70] sm:$0xf]  ;;  %v3085_v24 = vor.u32 %v3084_v15, %v7898_v2  ;;  %v4365_v62 = vrot.slane %v4364_v26, 4  ;;  %v4378_v7 = vor.u32 %v4377_v0, %v4374_v35  ;;  %v3071_v4 = vrot.slane %v3069_v46, 4  ;;  %v6760_v46 = vld [vmem:[%s8819_s4 + $0x218] sm:$0xff] }
 0x209   : > { %8864 = vst [vmem:[#allocation26_spill] sm:$0xff] %v7895_v1  ;;  %v2117_v11 = vpop.f32.mrf.mxu2  ;;  %v3074_v45 = vrot.slane %v3072_v18, 5  ;;  %v4388_v19 = vor.u32 %v4387_v16, %v7900_v23  ;;  %v4396_v57 = vshrl.u32 %v4284_v25, 16  ;;  %v3088_v51 = vshll.u32 %v7849_v37, 16  ;;  %5266 = vmatpush.bf16.msra.mxu1 %v6760_v46  ;;  %v6732_v46 = vld [vmem:[#allocation2 + $0x6c] sm:$0xff] }
 0x20a   : > { %v1882_v17 = vpop.f32.mrf.mxu1  ;;  %8865 = vst [vmem:[#allocation27_spill] sm:$0xff] %v7906_v63  ;;  %v4399_v29 = vshll.u32 %v4284_v25, 16  ;;  %v7918_v26 = vadd.f32 %v7296_v36, %v7304_v3  ;;  %v4756_v0 = vpack.c.b16 %v4725_v6, %v4724_v10  ;;  %v3086_v15 = vrot.slane %v3085_v24, 4 }
 0x20b   : > { %v2496_v34 = vpop.f32.mrf.mxu3  ;;  %v2116_v20 = vadd.f32 %v2115_v52, %v1882_v17  ;;  %v3656_v52 = vrot.slane %v7903_v47, 5  ;;  %v4360_v16 = vsel %vm6991_vm12, %v4355_v22, %v7875_v53  ;;  %v4370_v37 = vsel %vm6991_vm12, %v4365_v62, %v4369_v48  ;;  %v4964_v62 = vld [vmem:[#allocation2 + $0x6c] sm:$0xe] }
 0x20c   : > { %v5072_v36 = vrot.slane %v7910_v59, 5  ;;  %v3075_v3 = vor.u32 %v3074_v45, %v3071_v4  ;;  %v7934_v18 = vrot.slane %v4378_v7, 4  ;;  %v7936_v8 = vrot.slane %v4388_v19, 4 }
 0x20d   : > { %v7912_v42 = vadd.f32 %v2496_v34, %v2116_v20  ;;  %3451 = vmatmul.bf16.gmra.mxu1 %v3339_v13  ;;  %v7938_v13 = vrot.slane %v4391_v30, 5  ;;  %v3090_v53 = vrot.slane %v3088_v51, 5  ;;  %v3658_v10 = vrot.slane %v3656_v52, 4  ;;  %v7950_v30 = vld [vmem:[#allocation2 + $0x74] sm:$0x1] }
 0x20e   : > { %v2780_v58 = vpop.f32.mrf.mxu0  ;;  %3882 = vmatmul.bf16.gmra.mxu2 %v3766_v56  ;;  %v3542_v56 = vld [vmem:[#allocation2 + $0x6c] sm:$0xe]  ;;  %v7940_v48 = vrot.slane %v4396_v57, 4  ;;  %v7942_v25 = vrot.slane %v4399_v29, 5  ;;  %v7944_v6 = vunpack.c.l.b16 %v4360_v16  ;;  %v7946_v22 = vunpack.c.l.b16 %v4370_v37 }
 0x20f   : > { %v7921_v35 = vadd.f32 %v2780_v58, %v7607_v55  ;;  %v7932_v55 = vld [vmem:[#allocation2 + $0x74] sm:$0x1]  ;;  %v4405_v20 = vshll.u32 %v7699_v28, 16  ;;  %v4409_v24 = vshrl.u32 %v7699_v28, 16  ;;  %v3091_v45 = vsel %vm6991_vm12, %v3086_v15, %v3090_v53  ;;  %v2876_v57 = vld [vmem:[#allocation2 + $0x6c] sm:$0xf] }
 0x210   : > { %v3659_v19 = vrot.slane %v7932_v55, 5  ;;  %v5074_v58 = vrot.slane %v5072_v36, 4  ;;  %v3076_v51 = vrot.slane %v3075_v3, 4  ;;  %v6297_v29 = vrot.slane %v3542_v56, 9 }
 0x211   : > { %8866 = vst [vmem:[#allocation28_spill] sm:$0xff] %v7921_v35  ;;  %4844 = vmatmul.bf16.vlgmr.msra.gmra.mxu0 %v4756_v0  ;;  %v2120_v4 = vpop.f32.mrf.mxu2  ;;  %v3102_v0 = vshll.u32 %v7903_v47, 16  ;;  %v3106_v16 = vshrl.u32 %v7903_v47, 16  ;;  %v5075_v15 = vrot.slane %v7950_v30, 5  ;;  %v3316_v56 = vunpack.c.l.b16 %v3091_v45 }
 0x212   : > { %v1884_v17 = vpop.f32.mrf.mxu1  ;;  %v3081_v3 = vsel %vm6991_vm12, %v3076_v51, %v7898_v2  ;;  %v3093_v63 = vshrl.u32 %v2876_v57, 16  ;;  %v3657_v47 = vsel %vm6974_vm9, %v6297_v29, %v3656_v52  ;;  %v4384_v51 = vsel %vm6991_vm12, %v7934_v18, %v7900_v23 }
 0x213   : > { %v2498_v34 = vpop.f32.mrf.mxu3  ;;  %v2118_v7 = vadd.f32 %v2117_v11, %v1884_v17  ;;  %v3660_v11 = vsel %vm6974_vm9, %v3658_v10, %v3659_v19  ;;  %v6520_v17 = vrot.slane %v4964_v62, 9  ;;  %v5447_v10 = vld [vmem:[%s8821_s6] sm:$0xf]  ;;  %v5076_v2 = vsel %vm6974_vm9, %v5074_v58, %v5075_v15 }
 0x214   : > { %v7980_v45 = vrot.slane %v3102_v0, 5  ;;  %v3108_v19 = vrot.slane %v3106_v16, 4  ;;  %v5449_v52 = vsel %vm473_vm0, %v5447_v10, 0  ;;  %v7991_v58 = vrot.slane %v4405_v20, 5 }
 0x215   : > { %v7957_v37 = vadd.f32 %v2498_v34, %v2118_v7  ;;  %v3096_v34 = vshll.u32 %v2876_v57, 16  ;;  %v5073_v62 = vsel %vm6974_vm9, %v6520_v17, %v5072_v36  ;;  %v3744_v7 = vunpack.c.l.b16 %v3660_v11  ;;  %5458 = vmatpush.bf16.msra.mxu2 %v5449_v52 }
 0x216   : > { %v2782_v28 = vpop.f32.mrf.mxu0  ;;  %v3315_v57 = vunpack.c.l.b16 %v3081_v3  ;;  %v4394_v36 = vsel %vm6991_vm12, %v7936_v8, %v7938_v13  ;;  %v3743_v16 = vunpack.c.l.b16 %v3657_v47  ;;  %v5164_v11 = vunpack.c.l.b16 %v5073_v62 }
 0x217   : > { %v7963_v53 = vadd.f32 %v2782_v28, %v7630_v38  ;;  %v6772_v38 = vld [vmem:[%s8820_s5 + $0x38] sm:$0xff]  ;;  %v5165_v17 = vunpack.c.l.b16 %v5076_v2  ;;  %v3095_v18 = vrot.slane %v3093_v63, 4  ;;  %v4402_v10 = vor.u32 %v7942_v25, %v7940_v48  ;;  %v8015_v2 = vld [vmem:[#allocation2 + $0x80] sm:$0x1] }
 0x218   : > { %4197 = vmatmul.bf16.gmra.mxu3 %v6732_v46  ;;  %v7993_v28 = vld [vmem:[#allocation2 + $0x7c] sm:$0xf]  ;;  %v4411_v46 = vrot.slane %v4409_v24, 4  ;;  %v3340_v23 = vpack.c.b16 %v3316_v56, %v3315_v57  ;;  %v3767_v8 = vpack.c.b16 %v3744_v7, %v3743_v16  ;;  %v3098_v13 = vrot.slane %v3096_v34, 5 }
 0x219   : > { %8867 = vst [vmem:[#allocation29_spill] sm:$0xff] %v7963_v53  ;;  %5588 = vmatpush.bf16.msra.mxu3 %v6772_v38  ;;  %v2122_v3 = vpop.f32.mrf.mxu2  ;;  %v3109_v20 = vor.u32 %v3108_v19, %v7980_v45  ;;  %v7998_v38 = vld [vmem:[#allocation2 + $0x7c] sm:$0xf]  ;;  %v8000_v52 = vpack.c.b16 %v5165_v17, %v5164_v11  ;;  %v8005_v62 = vunpack.c.l.b16 %v4394_v36  ;;  %v4415_v63 = vshll.u32 %v7705_v44, 16  ;;  %v3543_v11 = vld [vmem:[#allocation2 + $0x78] sm:$0xe] }
 0x21a   : > { %v1887_v29 = vpop.f32.mrf.mxu1  ;;  %v4757_v25 = vpack.c.b16 %v7946_v22, %v7944_v6  ;;  %v3112_v56 = vshll.u32 %v7932_v55, 16  ;;  %v4412_v34 = vor.u32 %v4411_v46, %v7991_v58  ;;  %v8017_v7 = vunpack.c.l.b16 %v4384_v51  ;;  %v8030_v51 = vld [vmem:[#allocation2 + $0x80] sm:$0x1] }
 0x21b   : > { %v2501_v0 = vpop.f32.mrf.mxu3  ;;  %v2121_v15 = vadd.f32 %v2120_v4, %v1887_v29  ;;  %8868 = vst [vmem:[#allocation30_spill] sm:$0xff] %v8000_v52  ;;  %v3663_v4 = vrot.slane %v7993_v28, 5  ;;  %v5079_v19 = vrot.slane %v7998_v38, 5  ;;  %v3099_v57 = vor.u32 %v3098_v13, %v3095_v18  ;;  %v2879_v18 = vld [vmem:[#allocation2 + $0x78] sm:$0xf] }
 0x21c   : > { %v3110_v44 = vrot.slane %v3109_v20, 4  ;;  %v8020_v36 = vrot.slane %v4402_v10, 4  ;;  %v8024_v29 = vadd.f32 %v7306_v9, %v7918_v26  ;;  %v8028_v22 = vrot.slane %v4415_v63, 5 }
 0x21d   : > { %v8002_v47 = vadd.f32 %v2501_v0, %v2121_v15  ;;  %3456 = vmatmul.bf16.gmra.mxu1 %v3340_v23  ;;  %v3665_v6 = vrot.slane %v3663_v4, 4  ;;  %v3114_v46 = vrot.slane %v3112_v56, 5  ;;  %v3666_v17 = vrot.slane %v8015_v2, 5 }
 0x21e   : > { %v2785_v24 = vpop.f32.mrf.mxu0  ;;  %3887 = vmatmul.bf16.gmra.mxu2 %v3767_v8  ;;  %v8037_v26 = vrot.slane %v4412_v34, 4  ;;  %v3126_v10 = vshll.u32 %v7993_v28, 16  ;;  %v5081_v13 = vrot.slane %v5079_v19, 4  ;;  %v3100_v20 = vrot.slane %v3099_v57, 4  ;;  %v6733_v34 = vld [vmem:[#allocation2 + $0x78] sm:$0xff] }
 0x21f   : > { %v8009_v48 = vadd.f32 %v2785_v24, %v7666_v43  ;;  %v4965_v43 = vld [vmem:[#allocation2 + $0x78] sm:$0xe]  ;;  %v3115_v24 = vsel %vm6991_vm12, %v3110_v44, %v3114_v46  ;;  %v3130_v63 = vshrl.u32 %v7993_v28, 16  ;;  %v6298_v9 = vrot.slane %v3543_v11, 9 }
 0x220   : > { %v6521_v8 = vrot.slane %v4965_v43, 9  ;;  %v3105_v28 = vsel %vm6991_vm12, %v3100_v20, %v7980_v45  ;;  %v3117_v44 = vshrl.u32 %v2879_v18, 16  ;;  %v3318_v11 = vunpack.c.l.b16 %v3115_v24  ;;  %v4966_v45 = vld [vmem:[#allocation2 + $0x84] sm:$0xe] }
 0x221   : > { %8869 = vst [vmem:[#allocation31_spill] sm:$0xff] %v8009_v48  ;;  %4849 = vmatmul.bf16.gmra.mxu0 %v4757_v25  ;;  %v3848_v23 = vpop.f32.mrf.mxu2  ;;  %v5082_v25 = vrot.slane %v8030_v51, 5  ;;  %v3317_v20 = vunpack.c.l.b16 %v3105_v28  ;;  %v4418_v52 = vsel %vm6991_vm12, %v8037_v26, %v8028_v22  ;;  %v6522_v48 = vrot.slane %v4966_v45, 9 }
 0x222   : > { %v1889_v0 = vpop.f32.mrf.mxu1  ;;  %v5080_v43 = vsel %vm6974_vm9, %v6521_v8, %v5079_v19  ;;  %v3120_v19 = vshll.u32 %v2879_v18, 16  ;;  %v3119_v18 = vrot.slane %v3117_v44, 4 }
 0x223   : > { %v2503_v16 = vpop.f32.mrf.mxu3  ;;  %v2123_v15 = vadd.f32 %v2122_v3, %v1889_v0  ;;  %v3667_v3 = vsel %vm6974_vm9, %v3665_v6, %v3666_v17  ;;  %v4287_v0 = vld [vmem:[#allocation2 + $0x48] sm:$0xf]  ;;  %v5083_v46 = vsel %vm6974_vm9, %v5081_v13, %v5082_v25  ;;  %v3664_v6 = vsel %vm6974_vm9, %v6298_v9, %v3663_v4  ;;  %v4304_v25 = vld [vmem:[#allocation2 + $0x8c] sm:$0x1] }
 0x224   : > { %v8062_v17 = vrot.slane %v3126_v10, 5  ;;  %v5167_v8 = vunpack.c.l.b16 %v5083_v46  ;;  %v4420_v13 = vshrl.u32 %v4287_v0, 16  ;;  %v3745_v9 = vunpack.c.l.b16 %v3664_v6  ;;  %v8069_v10 = vld [vmem:[#allocation2 + $0x88] sm:$0xf] }
 0x225   : > { %v8044_v56 = vadd.f32 %v2503_v16, %v2123_v15  ;;  %v8056_v16 = vld [vmem:[#allocation2 + $0x88] sm:$0xf]  ;;  %v5166_v15 = vunpack.c.l.b16 %v5080_v43  ;;  %v3341_v28 = vpack.c.b16 %v3318_v11, %v3317_v20  ;;  %v5089_v35 = vrot.slane %v4304_v25, 5 }
 0x226   : > { %v2787_v55 = vpop.f32.mrf.mxu0  ;;  %v5086_v24 = vrot.slane %v8056_v16, 5  ;;  %v3670_v44 = vrot.slane %v8069_v10, 5  ;;  %v3136_v11 = vshll.u32 %v8015_v2, 16  ;;  %v4290_v2 = vld [vmem:[#allocation2 + $0x54] sm:$0xf] }
 0x227   : > { %v8051_v57 = vadd.f32 %v2787_v55, %v7689_v21  ;;  %v3746_v21 = vunpack.c.l.b16 %v3667_v3  ;;  %v3132_v55 = vrot.slane %v3130_v63, 4  ;;  %v4423_v63 = vshll.u32 %v4287_v0, 16 }
 0x228   : > { %4202 = vmatmul.bf16.gmra.mxu3 %v6733_v34  ;;  %v8071_v3 = vpack.c.b16 %v5167_v8, %v5166_v15  ;;  %v5088_v53 = vrot.slane %v5086_v24, 4  ;;  %v4429_v0 = vshll.u32 %v7747_v39, 16  ;;  %v5087_v15 = vsel %vm6974_vm9, %v6522_v48, %v5086_v24 }
 0x229   : > { %8870 = vst [vmem:[#allocation32_spill] sm:$0xff] %v8051_v57  ;;  %v3850_v46 = vpop.f32.mrf.mxu2  ;;  %v3122_v57 = vrot.slane %v3120_v19, 5  ;;  %v3768_v22 = vpack.c.b16 %v3746_v21, %v3745_v9  ;;  %v3133_v26 = vor.u32 %v3132_v55, %v8062_v17  ;;  %v4433_v19 = vshrl.u32 %v7747_v39, 16  ;;  %v6759_v39 = vld [vmem:[%s8819_s4 + $0x210] sm:$0xff] }
 0x22a   : > { %v3422_v34 = vpop.f32.mrf.mxu1  ;;  %8871 = vst [vmem:[#allocation33_spill] sm:$0xff] %v8071_v3  ;;  %v2821_v21 = vadd.f32 %v7569_v60, %v8024_v29  ;;  %v8872_v48 = vsel %vm6991_vm12, %v8020_v36, %v7991_v58  ;;  %v8097_v8 = vunpack.c.l.b16 %v4418_v52  ;;  %v5168_v29 = vunpack.c.l.b16 %v5087_v15  ;;  %5267 = vmatpush.bf16.msra.mxu1 %v6759_v39 }
 0x22b   : > { %v4163_v4 = vpop.f32.mrf.mxu3  ;;  %v3502_v43 = vadd.f32 %v3422_v34, %v7549_v40  ;;  %v3123_v60 = vor.u32 %v3122_v57, %v3119_v18  ;;  %v3672_v58 = vrot.slane %v3670_v44, 4  ;;  %v8107_v36 = vrot.slane %v4420_v13, 4 }
 0x22c   : > { %v8109_v52 = vrot.slane %v4423_v63, 5  ;;  %v8111_v20 = vrot.slane %v4429_v0, 5  ;;  %v3138_v34 = vrot.slane %v3136_v11, 5  ;;  %v4453_v13 = vshll.u32 %v7783_v31, 16 }
 0x22d   : > { %v3928_v1 = vadd.f32 %v3848_v23, %v3502_v43  ;;  %3461 = vmatmul.bf16.gmra.mxu1 %v3341_v28  ;;  %v5090_v23 = vsel %vm6974_vm9, %v5088_v53, %v5089_v35  ;;  %v8873_v35 = vpack.c.b16 %v8005_v62, %v8017_v7  ;;  %v8105_v53 = vld [vmem:[#allocation2 + $0x8c] sm:$0x1]  ;;  %v4435_v62 = vrot.slane %v4433_v19, 4  ;;  %v2882_v28 = vld [vmem:[#allocation2 + $0x84] sm:$0xf] }
 0x22e   : > { %v2790_v6 = vpop.f32.mrf.mxu0  ;;  %3892 = vmatmul.bf16.gmra.mxu2 %v3768_v22  ;;  %v5169_v45 = vunpack.c.l.b16 %v5090_v23  ;;  %v4444_v7 = vshrl.u32 %v4290_v2, 16  ;;  %v3673_v43 = vrot.slane %v8105_v53, 5  ;;  %v4447_v22 = vshll.u32 %v4290_v2, 16  ;;  %v6734_v19 = vld [vmem:[#allocation2 + $0x84] sm:$0xff] }
 0x22f   : > { %v8080_v40 = vadd.f32 %v2790_v6, %v7715_v14  ;;  %v8088_v55 = vadd.f32 %v4163_v4, %v3928_v1  ;;  %v8095_v14 = vunpack.c.l.b16 %v8872_v48  ;;  %v3134_v1 = vrot.slane %v3133_v26, 4  ;;  %v3544_v4 = vld [vmem:[#allocation2 + $0x84] sm:$0xe] }
 0x230   : > { %v8113_v57 = vpack.c.b16 %v5169_v45, %v5168_v29  ;;  %v3124_v63 = vrot.slane %v3123_v60, 4  ;;  %v3150_v6 = vshll.u32 %v8069_v10, 16  ;;  %v3154_v0 = vshrl.u32 %v8069_v10, 16 }
 0x231   : > { %4854 = vmatmul.bf16.gmra.mxu0 %v8873_v35  ;;  %v3853_v18 = vpop.f32.mrf.mxu2  ;;  %v3139_v26 = vsel %vm6991_vm12, %v3134_v1, %v3138_v34  ;;  %v6299_v23 = vrot.slane %v3544_v4, 9  ;;  %v4457_v48 = vshrl.u32 %v7783_v31, 16  ;;  %v3141_v35 = vshrl.u32 %v2882_v28, 16  ;;  %v6771_v31 = vld [vmem:[%s8820_s5 + $0x30] sm:$0xff] }
 0x232   : > { %v3424_v25 = vpop.f32.mrf.mxu1  ;;  %8874 = vst [vmem:[#allocation34_spill] sm:$0xff] %v8113_v57  ;;  %v3129_v2 = vsel %vm6991_vm12, %v3124_v63, %v8062_v17  ;;  %v3144_v60 = vshll.u32 %v2882_v28, 16  ;;  %v3320_v10 = vunpack.c.l.b16 %v3139_v26  ;;  %v4446_v29 = vrot.slane %v4444_v7, 4  ;;  %v8139_v17 = vld [vmem:[#allocation2 + $0x94] sm:$0xf]  ;;  %5589 = vmatpush.bf16.msra.mxu3 %v6771_v31 }
 0x233   : > { %v4165_v24 = vpop.f32.mrf.mxu3  ;;  %v3503_v9 = vadd.f32 %v3424_v25, %v2821_v21  ;;  %v3674_v21 = vsel %vm6974_vm9, %v3672_v58, %v3673_v43  ;;  %v8137_v45 = vrot.slane %v3150_v6, 5  ;;  %v3156_v58 = vrot.slane %v3154_v0, 4  ;;  %v8146_v26 = vld [vmem:[#allocation2 + $0x94] sm:$0xf] }
 0x234   : > { %v4449_v25 = vrot.slane %v4447_v22, 5  ;;  %v3319_v34 = vunpack.c.l.b16 %v3129_v2  ;;  %v4436_v4 = vor.u32 %v4435_v62, %v8111_v20  ;;  %v3143_v7 = vrot.slane %v3141_v35, 4 }
 0x235   : > { %v3929_v15 = vadd.f32 %v3850_v46, %v3503_v9  ;;  %v3671_v46 = vsel %vm6974_vm9, %v6299_v23, %v3670_v44  ;;  %v8144_v44 = vrot.slane %v4453_v13, 5  ;;  %v3146_v63 = vrot.slane %v3144_v60, 5 }
 0x236   : > { %v2792_v11 = vpop.f32.mrf.mxu0  ;;  %v3747_v28 = vunpack.c.l.b16 %v3671_v46  ;;  %v4459_v6 = vrot.slane %v4457_v48, 4  ;;  %v3342_v0 = vpack.c.b16 %v3320_v10, %v3319_v34  ;;  %v3157_v62 = vor.u32 %v3156_v58, %v8137_v45  ;;  %v4967_v34 = vld [vmem:[#allocation2 + $0x90] sm:$0xe] }
 0x237   : > { %v8125_v39 = vadd.f32 %v2792_v11, %v7736_v41  ;;  %v8130_v1 = vadd.f32 %v4165_v24, %v3929_v15  ;;  %v3748_v41 = vunpack.c.l.b16 %v3674_v21  ;;  %v4426_v24 = vor.u32 %v8109_v52, %v8107_v36  ;;  %v6789_v11 = vld [vmem:[#allocation2 + $0x50] sm:$0x1] }
 0x238   : > { %4207 = vmatmul.bf16.gmra.mxu3 %v6734_v19  ;;  %v4439_v19 = vshll.u32 %v6789_v11, 16  ;;  %v5093_v36 = vrot.slane %v8139_v17, 5  ;;  %v4450_v13 = vor.u32 %v4449_v25, %v4446_v29  ;;  %v4463_v23 = vshll.u32 %v7795_v12, 16  ;;  %v8162_v12 = vld [vmem:[#allocation2 + $0x98] sm:$0x1] }
 0x239   : > { %v3855_v15 = vpop.f32.mrf.mxu2  ;;  %v3769_v52 = vpack.c.b16 %v3748_v41, %v3747_v28  ;;  %v4759_v48 = vpack.c.b16 %v8097_v8, %v8095_v14  ;;  %v8155_v35 = vrot.slane %v4436_v4, 4  ;;  %v3147_v10 = vor.u32 %v3146_v63, %v3143_v7  ;;  %v8166_v29 = vld [vmem:[#allocation2 + $0x98] sm:$0x1]  ;;  %v3545_v4 = vld [vmem:[#allocation2 + $0x90] sm:$0xe] }
 0x23a   : > { %v3427_v9 = vpop.f32.mrf.mxu1  ;;  %v3160_v46 = vshll.u32 %v8105_v53, 16  ;;  %v4460_v31 = vor.u32 %v4459_v6, %v8144_v44  ;;  %v4427_v14 = vrot.slane %v4426_v24, 4  ;;  %v4441_v8 = vrot.slane %v4439_v19, 5  ;;  %v2885_v28 = vld [vmem:[#allocation2 + $0x90] sm:$0xf] }
 0x23b   : > { %v4168_v43 = vpop.f32.mrf.mxu3  ;;  %v3504_v22 = vadd.f32 %v3427_v9, %v7582_v49  ;;  %v3677_v49 = vrot.slane %v8146_v26, 5  ;;  %v5095_v41 = vrot.slane %v5093_v36, 4  ;;  %v3158_v58 = vrot.slane %v3157_v62, 4 }
 0x23c   : > { %v8168_v25 = vrot.slane %v4450_v13, 4  ;;  %v4432_v53 = vsel %vm6991_vm12, %v4427_v14, %v8111_v20  ;;  %v5096_v24 = vrot.slane %v8162_v12, 5  ;;  %v3148_v6 = vrot.slane %v3147_v10, 4  ;;  %v4293_v20 = vld [vmem:[#allocation2 + $0x60] sm:$0xf] }
 0x23d   : > { %v3930_v21 = vadd.f32 %v3853_v18, %v3504_v22  ;;  %3466 = vmatmul.bf16.gmra.mxu1 %v3342_v0  ;;  %v3679_v9 = vrot.slane %v3677_v49, 4  ;;  %v3162_v22 = vrot.slane %v3160_v46, 5  ;;  %v3680_v0 = vrot.slane %v8166_v29, 5 }
 0x23e   : > { %v2795_v2 = vpop.f32.mrf.mxu0  ;;  %3897 = vmatmul.bf16.gmra.mxu2 %v3769_v52  ;;  %v4461_v11 = vrot.slane %v4460_v31, 4  ;;  %v3174_v62 = vshll.u32 %v8146_v26, 16  ;;  %v6523_v13 = vrot.slane %v4967_v34, 9  ;;  %v6735_v31 = vld [vmem:[#allocation2 + $0x90] sm:$0xff]  ;;  %v3168_v14 = vshll.u32 %v2885_v28, 16 }
 0x23f   : > { %v8158_v60 = vadd.f32 %v2795_v2, %v7754_v33  ;;  %v8164_v18 = vadd.f32 %v4168_v43, %v3930_v21  ;;  %v4465_v33 = vrot.slane %v4463_v23, 5  ;;  %v4442_v43 = vsel %vm6991_vm12, %v8155_v35, %v4441_v8 }
 0x240   : > { %v5097_v23 = vsel %vm6974_vm9, %v5095_v41, %v5096_v24  ;;  %v3163_v21 = vsel %vm6991_vm12, %v3158_v58, %v3162_v22  ;;  %v6300_v2 = vrot.slane %v3545_v4, 9  ;;  %v3178_v35 = vshrl.u32 %v8146_v26, 16 }
 0x241   : > { %8875 = vst [vmem:[#allocation35_spill] sm:$0xff] %v8158_v60  ;;  %4859 = vmatmul.bf16.gmra.mxu0 %v4759_v48  ;;  %v3858_v52 = vpop.f32.mrf.mxu2  ;;  %v3165_v48 = vshrl.u32 %v2885_v28, 16  ;;  %v5094_v8 = vsel %vm6974_vm9, %v6523_v13, %v5093_v36  ;;  %v3153_v41 = vsel %vm6991_vm12, %v3148_v6, %v8137_v45  ;;  %v4466_v26 = vsel %vm6991_vm12, %v4461_v11, %v4465_v33  ;;  %v8203_v13 = vld [vmem:[#allocation2 + $0xa0] sm:$0xf] }
 0x242   : > { %v3429_v7 = vpop.f32.mrf.mxu1  ;;  %v3322_v4 = vunpack.c.l.b16 %v3163_v21  ;;  %v8201_v28 = vrot.slane %v3174_v62, 5  ;;  %v5170_v24 = vunpack.c.l.b16 %v5094_v8  ;;  %v3321_v22 = vunpack.c.l.b16 %v3153_v41 }
 0x243   : > { %v4170_v63 = vpop.f32.mrf.mxu3  ;;  %v3505_v19 = vadd.f32 %v3429_v7, %v7592_v27  ;;  %v3681_v27 = vsel %vm6974_vm9, %v3679_v9, %v3680_v0  ;;  %v3678_v9 = vsel %vm6974_vm9, %v6300_v2, %v3677_v49  ;;  %v5171_v7 = vunpack.c.l.b16 %v5097_v23 }
 0x244   : > { %v3750_v36 = vunpack.c.l.b16 %v3681_v27  ;;  %v3167_v0 = vrot.slane %v3165_v48, 4  ;;  %v3170_v45 = vrot.slane %v3168_v14, 5  ;;  %v4471_v6 = vshll.u32 %v4293_v20, 16 }
 0x245   : > { %v3931_v10 = vadd.f32 %v3855_v15, %v3505_v19  ;;  %v4468_v15 = vshrl.u32 %v4293_v20, 16  ;;  %v3749_v11 = vunpack.c.l.b16 %v3678_v9  ;;  %v8205_v21 = vpack.c.b16 %v5171_v7, %v5170_v24  ;;  %v8880_v9 = vld [vmem:[#allocation22_spill] sm:$0xff] }
 0x246   : > { %v2797_v46 = vpop.f32.mrf.mxu0  ;;  %v3343_v62 = vpack.c.b16 %v3322_v4, %v3321_v22  ;;  %v4456_v23 = vsel %vm6991_vm12, %v8168_v25, %v8144_v44  ;;  %v3171_v14 = vor.u32 %v3170_v45, %v3167_v0  ;;  %v3684_v8 = vrot.slane %v8203_v13, 5  ;;  %v8216_v4 = vld [vmem:[#allocation2 + $0xa0] sm:$0xf] }
 0x247   : > { %v8190_v34 = vadd.f32 %v2797_v46, %v7771_v54  ;;  %v8197_v58 = vadd.f32 %v4170_v63, %v3931_v10  ;;  %v3180_v54 = vrot.slane %v3178_v35, 4  ;;  %v4733_v63 = vunpack.c.l.b16 %v4442_v43  ;;  %8877 = vst [vmem:[#allocation37_spill] sm:$0xff] %v8205_v21  ;;  %v8878_v10 = vld [vmem:[#allocation5_spill] sm:$0xff] }
 0x248   : > { %4212 = vmatmul.bf16.gmra.mxu3 %v6735_v31  ;;  %v4732_v46 = vunpack.c.l.b16 %v4432_v53  ;;  %v3770_v48 = vpack.c.b16 %v3750_v36, %v3749_v11  ;;  %v8213_v35 = vunpack.c.l.b16 %v4466_v26  ;;  %v4470_v43 = vrot.slane %v4468_v15, 4  ;;  %v6758_v15 = vld [vmem:[%s8819_s4 + $0x208] sm:$0xff] }
 0x249   : > { %8876 = vst [vmem:[#allocation36_spill] sm:$0xff] %v8190_v34  ;;  %v3860_v2 = vpop.f32.mrf.mxu2  ;;  %v3181_v20 = vor.u32 %v3180_v54, %v8201_v28  ;;  %v4473_v41 = vrot.slane %v4471_v6, 5  ;;  %v3184_v25 = vshll.u32 %v8166_v29, 16  ;;  %v4477_v26 = vshll.u32 %v8880_v9, 16  ;;  %v3546_v29 = vld [vmem:[#allocation2 + $0x9c] sm:$0xe]  ;;  %5268 = vmatpush.bf16.msra.mxu1 %v6758_v15 }
 0x24a   : > { %v3432_v19 = vpop.f32.mrf.mxu1  ;;  %v4760_v44 = vpack.c.b16 %v4733_v63, %v4732_v46  ;;  %v4481_v54 = vshrl.u32 %v8880_v9, 16  ;;  %v5100_v7 = vrot.slane %v8216_v4, 5  ;;  %v3172_v22 = vrot.slane %v3171_v14, 4  ;;  %v2888_v6 = vld [vmem:[#allocation2 + $0x9c] sm:$0xf] }
 0x24b   : > { %v4173_v33 = vpop.f32.mrf.mxu3  ;;  %v3506_v49 = vadd.f32 %v3432_v19, %v8878_v10  ;;  %v3182_v24 = vrot.slane %v3181_v20, 4  ;;  %v3686_v0 = vrot.slane %v3684_v8, 4  ;;  %v4474_v19 = vor.u32 %v4473_v41, %v4470_v43  ;;  %v4968_v46 = vld [vmem:[#allocation2 + $0x9c] sm:$0xe]  ;;  %v8245_v14 = vld [vmem:[#allocation2 + $0xa4] sm:$0x1] }
 0x24c   : > { %v3186_v63 = vrot.slane %v3184_v25, 5  ;;  %v3198_v10 = vshll.u32 %v8203_v13, 16  ;;  %v4483_v43 = vrot.slane %v4481_v54, 4  ;;  %v5102_v25 = vrot.slane %v5100_v7, 4  ;;  %v6736_v15 = vld [vmem:[#allocation2 + $0x9c] sm:$0xff] }
 0x24d   : > { %v3932_v31 = vadd.f32 %v3858_v52, %v3506_v49  ;;  %3471 = vmatmul.bf16.gmra.mxu1 %v3343_v62  ;;  %v8225_v52 = vunpack.c.l.b16 %v4456_v23  ;;  %v3202_v49 = vshrl.u32 %v8203_v13, 16  ;;  %v8238_v62 = vrot.slane %v4477_v26, 5  ;;  %v8881_v23 = vld [vmem:[#allocation6_spill] sm:$0xff] }
 0x24e   : > { %v2800_v27 = vpop.f32.mrf.mxu0  ;;  %3902 = vmatmul.bf16.gmra.mxu2 %v3770_v48  ;;  %v3187_v41 = vsel %vm6991_vm12, %v3182_v24, %v3186_v63  ;;  %v3189_v13 = vshrl.u32 %v2888_v6, 16  ;;  %v6524_v45 = vrot.slane %v4968_v46, 9  ;;  %v8254_v54 = vrot.slane %v3198_v10, 5  ;;  %v4296_v46 = vld [vmem:[#allocation2 + $0x6c] sm:$0xf] }
 0x24f   : > { %v8219_v53 = vadd.f32 %v2800_v27, %v7797_v61  ;;  %v8223_v36 = vadd.f32 %v4173_v33, %v3932_v31  ;;  %v8231_v61 = vld [vmem:[#allocation2 + $0xa4] sm:$0x1]  ;;  %v3177_v31 = vsel %vm6991_vm12, %v3172_v22, %v8201_v28  ;;  %v3204_v21 = vrot.slane %v3202_v49, 4 }
 0x250   : > { %v3687_v27 = vrot.slane %v8231_v61, 5  ;;  %v8882_v28 = vld [vmem:[#allocation20_spill] sm:$0xff]  ;;  %v5103_v57 = vrot.slane %v8245_v14, 5  ;;  %v8266_v10 = vrot.slane %v4474_v19, 4  ;;  %v4484_v49 = vor.u32 %v4483_v43, %v8238_v62  ;;  %v8275_v19 = vld [vmem:[#allocation2 + $0xac] sm:$0xf] }
 0x251   : > { %8879 = vst [vmem:[#allocation5_spill] sm:$0xff] %v8219_v53  ;;  %4864 = vmatmul.bf16.gmra.mxu0 %v4760_v44  ;;  %v3863_v20 = vpop.f32.mrf.mxu2  ;;  %v6301_v44 = vrot.slane %v3546_v29, 9  ;;  %v3324_v29 = vunpack.c.l.b16 %v3187_v41 }
 0x252   : > { %v3434_v33 = vpop.f32.mrf.mxu1 }
 0x253   : > { %v4175_v11 = vpop.f32.mrf.mxu3  ;;  %v3507_v48 = vadd.f32 %v3434_v33, %v8881_v23  ;;  %v3688_v33 = vsel %vm6974_vm9, %v3686_v0, %v3687_v27  ;;  %v3192_v23 = vshll.u32 %v2888_v6, 16  ;;  %v6770_v0 = vld [vmem:[%s8820_s5 + $0x28] sm:$0xff]  ;;  %v5101_v6 = vsel %vm6974_vm9, %v6524_v45, %v5100_v7 }
 0x254   : > { %v3752_v63 = vunpack.c.l.b16 %v3688_v33  ;;  %v3191_v27 = vrot.slane %v3189_v13, 4  ;;  %5590 = vmatpush.bf16.msra.mxu3 %v6770_v0  ;;  %v3205_v7 = vor.u32 %v3204_v21, %v8254_v54  ;;  %v8273_v45 = vld [vmem:[#allocation2 + $0xac] sm:$0xf]  ;;  %v5172_v43 = vunpack.c.l.b16 %v5101_v6 }
 0x255   : > { %v3933_v9 = vadd.f32 %v3860_v2, %v3507_v48  ;;  %v3685_v2 = vsel %vm6974_vm9, %v6301_v44, %v3684_v8  ;;  %v3323_v48 = vunpack.c.l.b16 %v3177_v31  ;;  %v3194_v41 = vrot.slane %v3192_v23, 5  ;;  %v8884_v8 = vld [vmem:[#allocation25_spill] sm:$0xff] }
 0x256   : > { %v2802_v26 = vpop.f32.mrf.mxu0  ;;  %v4487_v44 = vshll.u32 %v8884_v8, 16  ;;  %v4492_v13 = vshrl.u32 %v4296_v46, 16  ;;  %v3208_v0 = vshll.u32 %v8231_v61, 16  ;;  %v8279_v8 = vrot.slane %v4484_v49, 4  ;;  %v4969_v49 = vld [vmem:[#allocation2 + $0xa8] sm:$0xe] }
 0x257   : > { %v8252_v22 = vadd.f32 %v2802_v26, %v8882_v28  ;;  %v8257_v24 = vadd.f32 %v4175_v11, %v3933_v9  ;;  %v5104_v11 = vsel %vm6974_vm9, %v5102_v25, %v5103_v57  ;;  %v8885_v28 = vld [vmem:[#allocation8_spill] sm:$0xff]  ;;  %v3344_v57 = vpack.c.b16 %v3324_v29, %v3323_v48  ;;  %v8887_v29 = vld [vmem:[#allocation23_spill] sm:$0xff] }
 0x258   : > { %4217 = vmatmul.bf16.gmra.mxu3 %v6736_v15  ;;  %v3751_v15 = vunpack.c.l.b16 %v3685_v2  ;;  %v5173_v33 = vunpack.c.l.b16 %v5104_v11  ;;  %v4495_v25 = vshll.u32 %v4296_v46, 16  ;;  %v3691_v53 = vrot.slane %v8273_v45, 5 }
 0x259   : > { %8883 = vst [vmem:[#allocation22_spill] sm:$0xff] %v8252_v22  ;;  %v3865_v31 = vpop.f32.mrf.mxu2  ;;  %v4501_v6 = vshll.u32 %v7910_v59, 16  ;;  %v5107_v11 = vrot.slane %v8275_v19, 5  ;;  %v3206_v46 = vrot.slane %v3205_v7, 4  ;;  %v4489_v61 = vrot.slane %v4487_v44, 5 }
 0x25a   : > { %v3437_v9 = vpop.f32.mrf.mxu1  ;;  %v3771_v23 = vpack.c.b16 %v3752_v63, %v3751_v15  ;;  %v8281_v2 = vpack.c.b16 %v5173_v33, %v5172_v43  ;;  %v3195_v63 = vor.u32 %v3194_v41, %v3191_v27  ;;  %v8291_v15 = vld [vmem:[#allocation2 + $0xb0] sm:$0x1]  ;;  %v8889_v43 = vpack.c.b16 %v8213_v35, %v8225_v52 }
 0x25b   : > { %v4178_v26 = vpop.f32.mrf.mxu3  ;;  %v3508_v3 = vadd.f32 %v3437_v9, %v8885_v28  ;;  %v3210_v33 = vrot.slane %v3208_v0, 5  ;;  %v4480_v27 = vsel %vm6991_vm12, %v8266_v10, %v8238_v62  ;;  %v4490_v41 = vsel %vm6991_vm12, %v8279_v8, %v4489_v61  ;;  %v2891_v28 = vld [vmem:[#allocation2 + $0xa8] sm:$0xf]  ;;  %v8890_v8 = vld [vmem:[#allocation11_spill] sm:$0xff] }
 0x25c   : > { %8886 = vst [vmem:[#allocation6_spill] sm:$0xff] %v8281_v2  ;;  %v4505_v44 = vshrl.u32 %v7910_v59, 16  ;;  %v3693_v7 = vrot.slane %v3691_v53, 4  ;;  %v6525_v35 = vrot.slane %v4969_v49, 9  ;;  %v5109_v52 = vrot.slane %v5107_v11, 4 }
 0x25d   : > { %v3934_v21 = vadd.f32 %v3863_v20, %v3508_v3  ;;  %3476 = vmatmul.bf16.gmra.mxu1 %v3344_v57  ;;  %v8293_v3 = vrot.slane %v4492_v13, 4  ;;  %v8295_v20 = vrot.slane %v4495_v25, 5  ;;  %v8310_v57 = vrot.slane %v4501_v6, 5 }
 0x25e   : > { %v2805_v22 = vpop.f32.mrf.mxu0  ;;  %3907 = vmatmul.bf16.gmra.mxu2 %v3771_v23  ;;  %v3196_v23 = vrot.slane %v3195_v63, 4  ;;  %v3211_v62 = vsel %vm6991_vm12, %v3206_v46, %v3210_v33  ;;  %v3694_v10 = vrot.slane %v8291_v15, 5  ;;  %v3222_v0 = vshll.u32 %v8273_v45, 16 }
 0x25f   : > { %v8287_v48 = vadd.f32 %v2805_v22, %v8887_v29  ;;  %v8289_v9 = vadd.f32 %v4178_v26, %v3934_v21  ;;  %v3547_v22 = vld [vmem:[#allocation2 + $0xa8] sm:$0xe]  ;;  %v8308_v26 = vld [vmem:[#allocation2 + $0xb0] sm:$0x1]  ;;  %v3226_v29 = vshrl.u32 %v8273_v45, 16  ;;  %v5108_v6 = vsel %vm6974_vm9, %v6525_v35, %v5107_v11 }
 0x260   : > { %v5110_v61 = vrot.slane %v8308_v26, 5  ;;  %v3201_v63 = vsel %vm6991_vm12, %v3196_v23, %v8254_v54  ;;  %v6302_v49 = vrot.slane %v3547_v22, 9  ;;  %v3213_v46 = vshrl.u32 %v2891_v28, 16 }
 0x261   : > { %8888 = vst [vmem:[#allocation20_spill] sm:$0xff] %v8287_v48  ;;  %4869 = vmatmul.bf16.gmra.mxu0 %v8889_v43  ;;  %v3868_v21 = vpop.f32.mrf.mxu2  ;;  %v4507_v43 = vrot.slane %v4505_v44, 4  ;;  %v6737_v48 = vld [vmem:[#allocation2 + $0xa8] sm:$0xff]  ;;  %v3326_v35 = vunpack.c.l.b16 %v3211_v62  ;;  %v5174_v34 = vunpack.c.l.b16 %v5108_v6  ;;  %v8335_v22 = vrot.slane %v3222_v0, 5 }
 0x262   : > { %v3439_v13 = vpop.f32.mrf.mxu1  ;;  %v5111_v45 = vsel %vm6974_vm9, %v5109_v52, %v5110_v61  ;;  %v3228_v44 = vrot.slane %v3226_v29, 4  ;;  %v4736_v23 = vunpack.c.l.b16 %v4480_v27  ;;  %v8337_v52 = vld [vmem:[#allocation2 + $0xb8] sm:$0xf]  ;;  %v3215_v62 = vrot.slane %v3213_v46, 4 }
 0x263   : > { %v4180_v25 = vpop.f32.mrf.mxu3  ;;  %v3509_v59 = vadd.f32 %v3439_v13, %v8890_v8  ;;  %v3695_v13 = vsel %vm6974_vm9, %v3693_v7, %v3694_v10  ;;  %v3216_v8 = vshll.u32 %v2891_v28, 16  ;;  %v5175_v60 = vunpack.c.l.b16 %v5111_v45  ;;  %v4970_v7 = vld [vmem:[#allocation2 + $0xb4] sm:$0xe]  ;;  %v8345_v29 = vld [vmem:[#allocation2 + $0xb8] sm:$0xf] }
 0x264   : > { %v3754_v28 = vunpack.c.l.b16 %v3695_v13  ;;  %v4737_v10 = vunpack.c.l.b16 %v4490_v41  ;;  %v4511_v27 = vshll.u32 %v7950_v30, 16  ;;  %v6526_v41 = vrot.slane %v4970_v7, 9 }
 0x265   : > { %v3935_v33 = vadd.f32 %v3865_v31, %v3509_v59  ;;  %v3692_v31 = vsel %vm6974_vm9, %v6302_v49, %v3691_v53  ;;  %v3218_v59 = vrot.slane %v3216_v8, 5  ;;  %v5114_v61 = vrot.slane %v8337_v52, 5 }
 0x266   : > { %v2807_v2 = vpop.f32.mrf.mxu0  ;;  %v3753_v6 = vunpack.c.l.b16 %v3692_v31  ;;  %v3229_v46 = vor.u32 %v3228_v44, %v8335_v22  ;;  %v3232_v7 = vshll.u32 %v8291_v15, 16 }
 0x267   : > { %v8329_v11 = vadd.f32 %v2807_v2, %v7888_v32  ;;  %v8331_v54 = vadd.f32 %v4180_v25, %v3935_v33  ;;  %v8339_v32 = vpack.c.b16 %v5175_v60, %v5174_v34  ;;  %v3325_v2 = vunpack.c.l.b16 %v3201_v63  ;;  %v8343_v25 = vld [vmem:[#allocation2 + $0xbc] sm:$0x1]  ;;  %v8891_v60 = vld [vmem:[#allocation12_spill] sm:$0xff] }
 0x268   : > { %4222 = vmatmul.bf16.gmra.mxu3 %v6737_v48  ;;  %v4498_v48 = vor.u32 %v8295_v20, %v8293_v3  ;;  %v4508_v3 = vor.u32 %v4507_v43, %v8310_v57  ;;  %v3772_v20 = vpack.c.b16 %v3754_v28, %v3753_v6  ;;  %v5115_v33 = vsel %vm6974_vm9, %v6526_v41, %v5114_v61  ;;  %v8367_v41 = vld [vmem:[#allocation2 + $0xbc] sm:$0x1] }
 0x269   : > { %v3345_v63 = vpack.c.b16 %v3326_v35, %v3325_v2  ;;  %v3870_v49 = vpop.f32.mrf.mxu2  ;;  %v5116_v13 = vrot.slane %v5114_v61, 4  ;;  %v5117_v8 = vrot.slane %v8343_v25, 5  ;;  %v3219_v31 = vor.u32 %v3218_v59, %v3215_v62  ;;  %v4299_v2 = vld [vmem:[#allocation2 + $0x78] sm:$0xf] }
 0x26a   : > { %v3442_v53 = vpop.f32.mrf.mxu1  ;;  %v3698_v35 = vrot.slane %v8345_v29, 5  ;;  %v4762_v43 = vpack.c.b16 %v4737_v10, %v4736_v23  ;;  %v4509_v6 = vrot.slane %v4508_v3, 4  ;;  %v5176_v62 = vunpack.c.l.b16 %v5115_v33 }
 0x26b   : > { %v4183_v0 = vpop.f32.mrf.mxu3  ;;  %v3510_v34 = vadd.f32 %v3442_v53, %v8891_v60  ;;  %v5118_v28 = vsel %vm6974_vm9, %v5116_v13, %v5117_v8  ;;  %v3230_v59 = vrot.slane %v3229_v46, 4  ;;  %v4513_v61 = vrot.slane %v4511_v27, 5  ;;  %v2894_v13 = vld [vmem:[#allocation2 + $0xb4] sm:$0xf] }
 0x26c   : > { %v5177_v15 = vunpack.c.l.b16 %v5118_v28  ;;  %v4516_v60 = vshrl.u32 %v4299_v2, 16  ;;  %v3220_v23 = vrot.slane %v3219_v31, 4  ;;  %v3234_v10 = vrot.slane %v3232_v7, 5  ;;  %v8895_v8 = vld [vmem:[#allocation14_spill] sm:$0xff] }
 0x26d   : > { %v3936_v45 = vadd.f32 %v3868_v21, %v3510_v34  ;;  %3481 = vmatmul.bf16.gmra.mxu1 %v3345_v63  ;;  %v6757_v21 = vld [vmem:[%s8819_s4 + $0x200] sm:$0xff]  ;;  %v3700_v34 = vrot.slane %v3698_v35, 4  ;;  %v3246_v33 = vshll.u32 %v8345_v29, 16  ;;  %v3250_v46 = vshrl.u32 %v8345_v29, 16 }
 0x26e   : > { %v2810_v30 = vpop.f32.mrf.mxu0  ;;  %3912 = vmatmul.bf16.gmra.mxu2 %v3772_v20  ;;  %5269 = vmatpush.bf16.msra.mxu1 %v6757_v21  ;;  %v3548_v20 = vld [vmem:[#allocation2 + $0xb4] sm:$0xe]  ;;  %v3701_v27 = vrot.slane %v8367_v41, 5  ;;  %v4519_v31 = vshll.u32 %v4299_v2, 16  ;;  %v3225_v7 = vsel %vm6991_vm12, %v3220_v23, %v8335_v22  ;;  %v4525_v28 = vshll.u32 %v7998_v38, 16 }
 0x26f   : > { %v8358_v44 = vadd.f32 %v2810_v30, %v7912_v42  ;;  %v8362_v53 = vadd.f32 %v4183_v0, %v3936_v45  ;;  %v4499_v42 = vrot.slane %v4498_v48, 4  ;;  %v8369_v0 = vpack.c.b16 %v5177_v15, %v5176_v62  ;;  %v6738_v15 = vld [vmem:[#allocation2 + $0xb4] sm:$0xff] }
 0x270   : > { %v4514_v30 = vsel %vm6991_vm12, %v4509_v6, %v4513_v61  ;;  %v4529_v29 = vshrl.u32 %v7998_v38, 16  ;;  %v3702_v6 = vsel %vm6974_vm9, %v3700_v34, %v3701_v27  ;;  %v3237_v2 = vshrl.u32 %v2894_v13, 16 }
 0x271   : > { %8892 = vst [vmem:[#allocation25_spill] sm:$0xff] %v8362_v53  ;;  %4874 = vmatmul.bf16.gmra.mxu0 %v4762_v43  ;;  %v3873_v48 = vpop.f32.mrf.mxu2  ;;  %v3235_v43 = vsel %vm6991_vm12, %v3230_v59, %v3234_v10  ;;  %v3240_v22 = vshll.u32 %v2894_v13, 16  ;;  %v8393_v23 = vrot.slane %v3246_v33, 5  ;;  %v3252_v59 = vrot.slane %v3250_v46, 4 }
 0x272   : > { %8893 = vst [vmem:[#allocation8_spill] sm:$0xff] %v8369_v0  ;;  %v3444_v63 = vpop.f32.mrf.mxu1  ;;  %v3328_v10 = vunpack.c.l.b16 %v3235_v43  ;;  %v4504_v34 = vsel %vm6991_vm12, %v4499_v42, %v8310_v57  ;;  %v3327_v13 = vunpack.c.l.b16 %v3225_v7  ;;  %v4521_v33 = vrot.slane %v4519_v31, 5  ;;  %v8896_v0 = vld [vmem:[#allocation15_spill] sm:$0xff]  ;;  %v695_v31 = vld [vmem:[#allocation2 + $0xcc] sm:$0x1] }
 0x273   : > { %v8371_v3 = vpop.f32.mrf.mxu3  ;;  %v3511_v45 = vadd.f32 %v3444_v63, %v8895_v8  ;;  %v6303_v63 = vrot.slane %v3548_v20, 9  ;;  %v3756_v20 = vunpack.c.l.b16 %v3702_v6  ;;  %v4518_v8 = vrot.slane %v4516_v60, 4  ;;  %v8406_v6 = vld [vmem:[#allocation2 + $0xc4] sm:$0xf] }
 0x274   : > { %8894 = vst [vmem:[#allocation23_spill] sm:$0xff] %v8371_v3  ;;  %v4531_v46 = vrot.slane %v4529_v29, 4  ;;  %v3346_v57 = vpack.c.b16 %v3328_v10, %v3327_v13  ;;  %v4738_v60 = vunpack.c.l.b16 %v4504_v34  ;;  %v3549_v29 = vld [vmem:[#allocation2 + $0xc0] sm:$0xe]  ;;  %v3256_v3 = vshll.u32 %v8367_v41, 16 }
 0x275   : > { %v8386_v21 = vadd.f32 %v3870_v49, %v3511_v45  ;;  %v3699_v38 = vsel %vm6974_vm9, %v6303_v63, %v3698_v35  ;;  %v6769_v49 = vld [vmem:[%s8820_s5 + $0x20] sm:$0xff]  ;;  %v8403_v45 = vrot.slane %v4525_v28, 5  ;;  %v3253_v63 = vor.u32 %v3252_v59, %v8393_v23  ;;  %v8410_v28 = vld [vmem:[#allocation2 + $0xc8] sm:$0x1] }
 0x276   : > { %v2812_v62 = vpop.f32.mrf.mxu0  ;;  %5591 = vmatpush.bf16.msra.mxu3 %v6769_v49  ;;  %v3755_v35 = vunpack.c.l.b16 %v3699_v38  ;;  %v4535_v41 = vshll.u32 %v8030_v51, 16  ;;  %v3274_v49 = vshrl.u32 %v8406_v6, 16 }
 0x277   : > { %v8391_v61 = vadd.f32 %v2812_v62, %v7957_v37  ;;  %v4739_v37 = vunpack.c.l.b16 %v4514_v30  ;;  %v3239_v62 = vrot.slane %v3237_v2, 4  ;;  %v3705_v30 = vrot.slane %v8406_v6, 5 }
 0x278   : > { %4227 = vmatmul.bf16.gmra.mxu3 %v6738_v15  ;;  %v3242_v15 = vrot.slane %v3240_v22, 5  ;;  %v3773_v7 = vpack.c.b16 %v3756_v20, %v3755_v35  ;;  %v696_v2 = vsel %vm6927_vm5, 0, %v695_v31  ;;  %v3254_v20 = vrot.slane %v3253_v63, 4 }
 0x279   : > { %v3875_v42 = vpop.f32.mrf.mxu2  ;;  %v4763_v38 = vpack.c.b16 %v4739_v37, %v4738_v60  ;;  %697 = vst [vmem:[#allocation2 + $0xcc] sm:$0x1] %v696_v2  ;;  %v4532_v13 = vor.u32 %v4531_v46, %v8403_v45  ;;  %v6304_v35 = vrot.slane %v3549_v29, 9  ;;  %v3707_v31 = vrot.slane %v3705_v30, 4  ;;  %v2897_v37 = vld [vmem:[#allocation2 + $0xc0] sm:$0xf] }
 0x27a   : > { %v3447_v27 = vpop.f32.mrf.mxu1  ;;  %v3243_v34 = vor.u32 %v3242_v15, %v3239_v62  ;;  %v8900_v15 = vld [vmem:[#allocation17_spill] sm:$0xff]  ;;  %v3261_v51 = vshrl.u32 %v2897_v37, 16  ;;  %v3270_v29 = vshll.u32 %v8406_v6, 16  ;;  %v4553_v6 = vshrl.u32 %v8056_v16, 16 }
 0x27b   : > { %v4188_v43 = vpop.f32.mrf.mxu3  ;;  %v3512_v53 = vadd.f32 %v3447_v27, %v8896_v0  ;;  %v4522_v0 = vor.u32 %v4521_v33, %v4518_v8  ;;  %v4533_v62 = vrot.slane %v4532_v13, 4  ;;  %v3706_v60 = vsel %vm6974_vm9, %v6304_v35, %v3705_v30 }
 0x27c   : > { %v4549_v13 = vshll.u32 %v8056_v16, 16  ;;  %v3757_v35 = vunpack.c.l.b16 %v3706_v60  ;;  %v8901_v16 = vld [vmem:[#allocation18_spill] sm:$0xff] }
 0x27d   : > { %v3938_v22 = vadd.f32 %v3873_v48, %v3512_v53  ;;  %3486 = vmatmul.bf16.gmra.mxu1 %v3346_v57  ;;  %v3708_v53 = vrot.slane %v8410_v28, 5  ;;  %v3258_v48 = vrot.slane %v3256_v3, 5  ;;  %v4523_v57 = vrot.slane %v4522_v0, 4 }
 0x27e   : > { %v2815_v59 = vpop.f32.mrf.mxu0  ;;  %3917 = vmatmul.bf16.gmra.mxu2 %v3773_v7  ;;  %v3264_v7 = vshll.u32 %v2897_v37, 16  ;;  %v4537_v0 = vrot.slane %v4535_v41, 5  ;;  %v3276_v41 = vrot.slane %v3274_v49, 4 }
 0x27f   : > { %v8416_v10 = vadd.f32 %v2815_v59, %v8002_v47  ;;  %v8419_v27 = vadd.f32 %v4188_v43, %v3938_v22  ;;  %v3244_v47 = vrot.slane %v3243_v34, 4  ;;  %v3259_v43 = vsel %vm6991_vm12, %v3254_v20, %v3258_v48  ;;  %v6739_v59 = vld [vmem:[#allocation2 + $0xc0] sm:$0xff] }
 0x280   : > { %v3709_v3 = vsel %vm6974_vm9, %v3707_v31, %v3708_v53  ;;  %v4302_v20 = vld [vmem:[#allocation2 + $0x84] sm:$0xf]  ;;  %v3263_v53 = vrot.slane %v3261_v51, 4  ;;  %v3266_v48 = vrot.slane %v3264_v7, 5  ;;  %v3280_v51 = vshll.u32 %v8410_v28, 16 }
 0x281   : > { %8898 = vst [vmem:[#allocation11_spill] sm:$0xff] %v8419_v27  ;;  %4879 = vmatmul.bf16.gmra.mxu0 %v4763_v38  ;;  %v3878_v46 = vpop.f32.mrf.mxu2  ;;  %v4528_v38 = vsel %vm6991_vm12, %v4523_v57, %v8403_v45  ;;  %v3249_v34 = vsel %vm6991_vm12, %v3244_v47, %v8393_v23  ;;  %v3758_v31 = vunpack.c.l.b16 %v3709_v3  ;;  %v4538_v45 = vsel %vm6991_vm12, %v4533_v62, %v4537_v0 }
 0x282   : > { %v3449_v8 = vpop.f32.mrf.mxu1  ;;  %v3329_v37 = vunpack.c.l.b16 %v3249_v34  ;;  %v4741_v47 = vunpack.c.l.b16 %v4538_v45  ;;  %v4740_v3 = vunpack.c.l.b16 %v4528_v38 }
 0x283   : > { %v8423_v33 = vpop.f32.mrf.mxu3  ;;  %v3513_v63 = vadd.f32 %v3449_v8, %v8900_v15  ;;  %v4540_v8 = vshrl.u32 %v4302_v20, 16  ;;  %v4543_v15 = vshll.u32 %v4302_v20, 16  ;;  %v3774_v27 = vpack.c.b16 %v3758_v31, %v3757_v35  ;;  %v6790_v31 = vld [vmem:[#allocation2 + $0x8c] sm:$0x1] }
 0x284   : > { %8899 = vst [vmem:[#allocation12_spill] sm:$0xff] %v8423_v33  ;;  %v3267_v33 = vor.u32 %v3266_v48, %v3263_v53  ;;  %v4764_v34 = vpack.c.b16 %v4741_v47, %v4740_v3  ;;  %v3282_v35 = vrot.slane %v3280_v51, 5  ;;  %v4559_v45 = vshll.u32 %v6790_v31, 16  ;;  %v4305_v3 = vld [vmem:[#allocation2 + $0x90] sm:$0xf] }
 0x285   : > { %v8434_v2 = vadd.f32 %v3875_v42, %v3513_v63  ;;  %v3330_v42 = vunpack.c.l.b16 %v3259_v43  ;;  %v4551_v63 = vrot.slane %v4549_v13, 5  ;;  %v4542_v49 = vrot.slane %v4540_v8, 4 }
 0x286   : > { %v2817_v22 = vpop.f32.mrf.mxu0  ;;  %v4545_v20 = vrot.slane %v4543_v15, 5  ;;  %v3268_v38 = vrot.slane %v3267_v33, 4  ;;  %v4561_v33 = vrot.slane %v4559_v45, 5 }
 0x287   : > { %v8440_v30 = vadd.f32 %v2817_v22, %v8044_v56  ;;  %v3272_v56 = vrot.slane %v3270_v29, 5  ;;  %v4555_v22 = vrot.slane %v4553_v6, 4  ;;  %v3347_v43 = vpack.c.b16 %v3330_v42, %v3329_v37 }
 0x288   : > { %4232 = vmatmul.bf16.gmra.mxu3 %v6739_v59  ;;  %v4546_v53 = vor.u32 %v4545_v20, %v4542_v49  ;;  %v4564_v49 = vshrl.u32 %v4305_v3, 16  ;;  %v8903_v20 = vld [vmem:[#allocation24_spill] sm:$0xff] }
 0x289   : > { %v3880_v60 = vpop.f32.mrf.mxu2  ;;  %v3277_v62 = vor.u32 %v3276_v41, %v3272_v56  ;;  %v4556_v13 = vor.u32 %v4555_v22, %v4551_v63  ;;  %v8902_v41 = vld [vmem:[#allocation21_spill] sm:$0xff]  ;;  %v3273_v8 = vsel %vm6991_vm12, %v3268_v38, %v3272_v56  ;;  %v4573_v56 = vshll.u32 %v8139_v17, 16 }
 0x28a   : > { %v3452_v57 = vpop.f32.mrf.mxu1  ;;  %v4547_v22 = vrot.slane %v4546_v53, 4 }
 0x28b   : > { %v4193_v23 = vpop.f32.mrf.mxu3  ;;  %v3514_v59 = vadd.f32 %v3452_v57, %v8901_v16  ;;  %v3278_v42 = vrot.slane %v3277_v62, 4  ;;  %v4557_v48 = vrot.slane %v4556_v13, 4  ;;  %v4577_v62 = vshrl.u32 %v8139_v17, 16 }
 0x28d   : > { %v3940_v7 = vadd.f32 %v3878_v46, %v3514_v59  ;;  %3491 = vmatmul.bf16.gmra.mxu1 %v3347_v43  ;;  %v3283_v57 = vsel %vm6991_vm12, %v3278_v42, %v3282_v35  ;;  %v4562_v16 = vsel %vm6991_vm12, %v4557_v48, %v4561_v33  ;;  %v3331_v59 = vunpack.c.l.b16 %v3273_v8  ;;  %v6791_v48 = vld [vmem:[%s6879_s12] sm:$0xff] }
 0x28e   : > { %v4845_v29 = vpop.f32.mrf.mxu0  ;;  %3922 = vmatmul.bf16.gmra.mxu2 %v3774_v27  ;;  %v6740_v27 = vld [vmem:[#allocation2 + $0xcc] sm:$0xff]  ;;  %v3332_v43 = vunpack.c.l.b16 %v3283_v57  ;;  %v4575_v35 = vrot.slane %v4573_v56, 5  ;;  %v4579_v17 = vrot.slane %v4577_v62, 4  ;;  %v4583_v57 = vshll.u32 %v8162_v12, 16  ;;  %v4308_v12 = vld [vmem:[#allocation2 + $0x9c] sm:$0xf] }
 0x28f   : > { %v8452_v0 = vadd.f32 %v4845_v29, %v8088_v55  ;;  %v8454_v6 = vadd.f32 %v4193_v23, %v3940_v7  ;;  %v4743_v29 = vunpack.c.l.b16 %v4562_v16 }
 0x290   : > { %v3348_v38 = vpack.c.b16 %v3332_v43, %v3331_v59  ;;  %v4580_v8 = vor.u32 %v4579_v17, %v4575_v35  ;;  %v4585_v56 = vrot.slane %v4583_v57, 5  ;;  %v4591_v17 = vshll.u32 %v4308_v12, 16 }
 0x291   : > { %4884 = vmatmul.bf16.gmra.mxu0 %v4764_v34  ;;  %v3883_v37 = vpop.f32.mrf.mxu2  ;;  %v4567_v34 = vshll.u32 %v4305_v3, 16 }
 0x292   : > { %v3454_v28 = vpop.f32.mrf.mxu1  ;;  %v4581_v59 = vrot.slane %v4580_v8, 4 }
 0x293   : > { %v8456_v46 = vpop.f32.mrf.mxu3  ;;  %v3515_v55 = vadd.f32 %v3454_v28, %v8902_v41 }
 0x295   : > { %v8463_v23 = vadd.f32 %v3880_v60, %v3515_v55  ;;  %v6768_v60 = vld [vmem:[%s8820_s5 + $0x18] sm:$0xff]  ;;  %v4566_v55 = vrot.slane %v4564_v49, 4 }
 0x296   : > { %v4847_v47 = vpop.f32.mrf.mxu0  ;;  %5592 = vmatpush.bf16.msra.mxu3 %v6768_v60 }
 0x297   : > { %v8466_v15 = vadd.f32 %v4847_v47, %v8130_v1  ;;  %v4552_v1 = vsel %vm6991_vm12, %v4547_v22, %v4551_v63 }
 0x298   : > { %4237 = vmatmul.bf16.gmra.mxu3 %v6740_v27  ;;  %v4742_v31 = vunpack.c.l.b16 %v4552_v1  ;;  %v4569_v27 = vrot.slane %v4567_v34, 5  ;;  %v4586_v1 = vsel %vm6991_vm12, %v4581_v59, %v4585_v56  ;;  %v8907_v59 = vld [vmem:[#allocation29_spill] sm:$0xff] }
 0x299   : > { %v3885_v42 = vpop.f32.mrf.mxu2 }
 0x29a   : > { %v3457_v51 = vpop.f32.mrf.mxu1  ;;  %v4765_v63 = vpack.c.b16 %v4743_v29, %v4742_v31 }
 0x29b   : > { %v4198_v7 = vpop.f32.mrf.mxu3  ;;  %v3516_v13 = vadd.f32 %v3457_v51, %v8903_v20  ;;  %v4597_v51 = vshll.u32 %v8216_v4, 16  ;;  %v4745_v20 = vunpack.c.l.b16 %v4586_v1 }
 0x29d   : > { %v3942_v45 = vadd.f32 %v3883_v37, %v3516_v13  ;;  %3496 = vmatmul.bf16.gmra.mxu1 %v3348_v38  ;;  %v8904_v37 = vld [vmem:[#allocation26_spill] sm:$0xff]  ;;  %v4588_v13 = vshrl.u32 %v4308_v12, 16  ;;  %v8905_v38 = vld [vmem:[#allocation28_spill] sm:$0xff]  ;;  %v4599_v31 = vrot.slane %v4597_v51, 5 }
 0x29e   : > { %v4850_v28 = vpop.f32.mrf.mxu0  ;;  %6577 = vmatmul.msk.bf16.vlgmr.msra.gmra.mxu2 %vm424_vm1, %v6791_v48  ;;  %v8906_v48 = vld [vmem:[#allocation7_spill] sm:$0xff] }
 0x29f   : > { %v8479_v53 = vadd.f32 %v4850_v28, %v8164_v18  ;;  %v8483_v41 = vadd.f32 %v4198_v7, %v3942_v45  ;;  %v4570_v18 = vor.u32 %v4569_v27, %v4566_v55  ;;  %v4601_v7 = vshrl.u32 %v8216_v4, 16  ;;  %v6792_v27 = vld [vmem:[%s6879_s12 + $0x8] sm:$0xff] }
 0x2a0   : > { %v4590_v57 = vrot.slane %v4588_v13, 4  ;;  %v6767_v13 = vld [vmem:[%s8820_s5 + $0x10] sm:$0xff] }
 0x2a1   : > { %4889 = vmatmul.bf16.gmra.mxu0 %v4765_v63  ;;  %v3888_v16 = vpop.f32.mrf.mxu2  ;;  %v4571_v60 = vrot.slane %v4570_v18, 4  ;;  %v4603_v45 = vrot.slane %v4601_v7, 4  ;;  %5593 = vmatpush.bf16.msra.mxu3 %v6767_v13 }
 0x2a2   : > { %v3459_v33 = vpop.f32.mrf.mxu1 }
 0x2a3   : > { %v8486_v47 = vpop.f32.mrf.mxu3  ;;  %v3517_v22 = vadd.f32 %v3459_v33, %v8904_v37  ;;  %v4576_v29 = vsel %vm6991_vm12, %v4571_v60, %v4575_v35  ;;  %v4593_v33 = vrot.slane %v4591_v17, 5  ;;  %v4604_v37 = vor.u32 %v4603_v45, %v4599_v31  ;;  %v8908_v45 = vld [vmem:[#allocation31_spill] sm:$0xff] }
 0x2a4   : > { %v4744_v28 = vunpack.c.l.b16 %v4576_v29 }
 0x2a5   : > { %v8489_v43 = vadd.f32 %v3885_v42, %v3517_v22  ;;  %v4607_v22 = vshll.u32 %v8245_v14, 16  ;;  %v4605_v60 = vrot.slane %v4604_v37, 4  ;;  %v4311_v14 = vld [vmem:[#allocation2 + $0xa8] sm:$0xf] }
 0x2a6   : > { %v4852_v3 = vpop.f32.mrf.mxu0  ;;  %v4766_v35 = vpack.c.b16 %v4745_v20, %v4744_v28  ;;  %v4625_v20 = vshrl.u32 %v8275_v19, 16  ;;  %v4612_v17 = vshrl.u32 %v4311_v14, 16 }
 0x2a7   : > { %v8492_v62 = vadd.f32 %v4852_v3, %v8197_v58  ;;  %v4609_v51 = vrot.slane %v4607_v22, 5  ;;  %v6793_v22 = vld [vmem:[%s6879_s12 + $0x10] sm:$0xff] }
 0x2a9   : > { %v3890_v42 = vpop.f32.mrf.mxu2 }
 0x2aa   : > { %v3462_v49 = vpop.f32.mrf.mxu1 }
 0x2ab   : > { %v4203_v34 = vpop.f32.mrf.mxu3  ;;  %v3518_v58 = vadd.f32 %v3462_v49, %v8905_v38  ;;  %v4610_v49 = vsel %vm6991_vm12, %v4605_v60, %v4609_v51  ;;  %v4631_v60 = vshll.u32 %v8308_v26, 16  ;;  %v8910_v51 = vld [vmem:[#allocation32_spill] sm:$0xff] }
 0x2ad   : > { %v3944_v63 = vadd.f32 %v3888_v16, %v3518_v58  ;;  %5270 = vmatmul.bf16.vlgmr.msra.gmra.mxu1 %v8906_v48  ;;  %v4615_v48 = vshll.u32 %v4311_v14, 16  ;;  %v4633_v13 = vrot.slane %v4631_v60, 5 }
 0x2ae   : > { %v4855_v55 = vpop.f32.mrf.mxu0  ;;  %6578 = vmatmul.msk.bf16.gmra.mxu2 %vm424_vm1, %v6792_v27 }
 0x2af   : > { %v8503_v4 = vadd.f32 %v4855_v55, %v8223_v36  ;;  %v8507_v8 = vadd.f32 %v4203_v34, %v3944_v63  ;;  %v4594_v36 = vor.u32 %v4593_v33, %v4590_v57  ;;  %v4621_v34 = vshll.u32 %v8275_v19, 16  ;;  %v8909_v57 = vld [vmem:[#allocation9_spill] sm:$0xff] }
 0x2b1   : > { %4894 = vmatmul.bf16.gmra.mxu0 %v4766_v35  ;;  %v3893_v56 = vpop.f32.mrf.mxu2  ;;  %v4595_v29 = vrot.slane %v4594_v36, 4  ;;  %v4623_v55 = vrot.slane %v4621_v34, 5  ;;  %v4627_v35 = vrot.slane %v4625_v20, 4 }
 0x2b2   : > { %v3464_v18 = vpop.f32.mrf.mxu1 }
 0x2b3   : > { %v8510_v16 = vpop.f32.mrf.mxu3  ;;  %v3519_v3 = vadd.f32 %v3464_v18, %v8907_v59  ;;  %v4600_v38 = vsel %vm6991_vm12, %v4595_v29, %v4599_v31  ;;  %v4614_v59 = vrot.slane %v4612_v17, 4  ;;  %v4628_v36 = vor.u32 %v4627_v35, %v4623_v55  ;;  %v4314_v17 = vld [vmem:[#allocation2 + $0xb4] sm:$0xf] }
 0x2b4   : > { %v4746_v19 = vunpack.c.l.b16 %v4600_v38  ;;  %v4645_v38 = vshll.u32 %v8337_v52, 16 }
 0x2b5   : > { %v8513_v1 = vadd.f32 %v3890_v42, %v3519_v3  ;;  %v4747_v42 = vunpack.c.l.b16 %v4610_v49  ;;  %v4617_v3 = vrot.slane %v4615_v48, 5  ;;  %v4629_v14 = vrot.slane %v4628_v36, 4  ;;  %v6794_v36 = vld [vmem:[%s6879_s12 + $0x18] sm:$0xff] }
 0x2b6   : > { %v4857_v12 = vpop.f32.mrf.mxu0 }
 0x2b7   : > { %v8516_v7 = vadd.f32 %v4857_v12, %v8257_v24  ;;  %v4767_v31 = vpack.c.b16 %v4747_v42, %v4746_v19  ;;  %v4634_v42 = vsel %vm6991_vm12, %v4629_v14, %v4633_v13 }
 0x2b8   : > { %v4749_v19 = vunpack.c.l.b16 %v4634_v42 }
 0x2b9   : > { %v3895_v63 = vpop.f32.mrf.mxu2 }
 0x2ba   : > { %v3467_v24 = vpop.f32.mrf.mxu1 }
 0x2bb   : > { %v4208_v58 = vpop.f32.mrf.mxu3  ;;  %v3520_v28 = vadd.f32 %v3467_v24, %v8908_v45  ;;  %v4649_v24 = vshrl.u32 %v8337_v52, 16 }
 0x2bd   : > { %v3946_v27 = vadd.f32 %v3893_v56, %v3520_v28  ;;  %5275 = vmatmul.bf16.gmra.mxu1 %v8909_v57  ;;  %v4647_v28 = vrot.slane %v4645_v38, 5  ;;  %v4636_v57 = vshrl.u32 %v4314_v17, 16  ;;  %v4317_v38 = vld [vmem:[#allocation2 + $0xc0] sm:$0xf] }
 0x2be   : > { %v4860_v33 = vpop.f32.mrf.mxu0  ;;  %6579 = vmatmul.msk.bf16.gmra.mxu2 %vm424_vm1, %v6793_v22  ;;  %v8911_v22 = vld [vmem:[#allocation10_spill] sm:$0xff] }
 0x2bf   : > { %v8530_v37 = vadd.f32 %v4860_v33, %v8289_v9  ;;  %v8534_v18 = vadd.f32 %v4208_v58, %v3946_v27  ;;  %v4618_v9 = vor.u32 %v4617_v3, %v4614_v59  ;;  %v4638_v60 = vrot.slane %v4636_v57, 4 }
 0x2c1   : > { %4899 = vmatmul.bf16.gmra.mxu0 %v4767_v31  ;;  %v3898_v49 = vpop.f32.mrf.mxu2  ;;  %v4619_v26 = vrot.slane %v4618_v9, 4 }
 0x2c2   : > { %v3469_v12 = vpop.f32.mrf.mxu1 }
 0x2c3   : > { %v8537_v56 = vpop.f32.mrf.mxu3  ;;  %v3521_v29 = vadd.f32 %v3469_v12, %v8910_v51  ;;  %v4624_v45 = vsel %vm6991_vm12, %v4619_v26, %v4623_v55  ;;  %v4655_v51 = vshll.u32 %v8343_v25, 16  ;;  %v4663_v25 = vshll.u32 %v4317_v38, 16 }
 0x2c4   : > { %v4748_v33 = vunpack.c.l.b16 %v4624_v45 }
 0x2c5   : > { %v8540_v34 = vadd.f32 %v3895_v63, %v3521_v29  ;;  %v4651_v63 = vrot.slane %v4649_v24, 4  ;;  %v4657_v13 = vrot.slane %v4655_v51, 5  ;;  %v8561_v24 = vld [vmem:[#allocation2 + $0xc4] sm:$0xf]  ;;  %v8913_v51 = vld [vmem:[#allocation13_spill] sm:$0xff] }
 0x2c6   : > { %v4862_v20 = vpop.f32.mrf.mxu0  ;;  %v4768_v3 = vpack.c.b16 %v4749_v19, %v4748_v33  ;;  %v4669_v45 = vshll.u32 %v8561_v24, 16 }
 0x2c7   : > { %v8545_v58 = vadd.f32 %v4862_v20, %v8331_v54  ;;  %v4639_v54 = vshll.u32 %v4314_v17, 16  ;;  %v4652_v59 = vor.u32 %v4651_v63, %v4647_v28  ;;  %v4660_v17 = vshrl.u32 %v4317_v38, 16 }
 0x2c8   : > { %v4673_v63 = vshrl.u32 %v8561_v24, 16  ;;  %v4671_v33 = vrot.slane %v4669_v45, 5 }
 0x2c9   : > { %v3900_v52 = vpop.f32.mrf.mxu2  ;;  %v4641_v12 = vrot.slane %v4639_v54, 5  ;;  %v4662_v57 = vrot.slane %v4660_v17, 4  ;;  %v4665_v54 = vrot.slane %v4663_v25, 5 }
 0x2ca   : > { %v3472_v48 = vpop.f32.mrf.mxu1 }
 0x2cb   : > { %v4213_v35 = vpop.f32.mrf.mxu3  ;;  %v3522_v27 = vadd.f32 %v3472_v48, %v8080_v40  ;;  %v4653_v40 = vrot.slane %v4652_v59, 4  ;;  %v4642_v20 = vor.u32 %v4641_v12, %v4638_v60 }
 0x2cd   : > { %v3948_v31 = vadd.f32 %v3898_v49, %v3522_v27  ;;  %5280 = vmatmul.bf16.gmra.mxu1 %v8911_v22  ;;  %v4658_v42 = vsel %vm6991_vm12, %v4653_v40, %v4657_v13  ;;  %v4643_v48 = vrot.slane %v4642_v20, 4  ;;  %v8912_v22 = vld [vmem:[#allocation35_spill] sm:$0xff]  ;;  %v6795_v20 = vld [vmem:[%s6879_s12 + $0x20] sm:$0xff] }
 0x2ce   : > { %6580 = vmatmul.msk.bf16.gmra.mxu2 %vm424_vm1, %v6794_v36  ;;  %v4751_v19 = vunpack.c.l.b16 %v4658_v42  ;;  %v8575_v36 = vld [vmem:[#allocation2 + $0xc8] sm:$0x1] }
 0x2cf   : > { %v8555_v55 = vadd.f32 %v4213_v35, %v3948_v31  ;;  %v4648_v35 = vsel %vm6991_vm12, %v4643_v48, %v4647_v28  ;;  %v4675_v31 = vrot.slane %v4673_v63, 4  ;;  %v4666_v28 = vor.u32 %v4665_v54, %v4662_v57 }
 0x2d0   : > { %v4750_v60 = vunpack.c.l.b16 %v4648_v35  ;;  %v4320_v35 = vld [vmem:[#allocation2 + $0xcc] sm:$0xf] }
 0x2d1   : > { %4904 = vmatmul.bf16.gmra.mxu0 %v4768_v3  ;;  %v3903_v14 = vpop.f32.mrf.mxu2  ;;  %v4667_v17 = vrot.slane %v4666_v28, 4  ;;  %v4684_v54 = vshrl.u32 %v4320_v35, 16 }
 0x2d2   : > { %v3474_v29 = vpop.f32.mrf.mxu1  ;;  %v4769_v40 = vpack.c.b16 %v4751_v19, %v4750_v60  ;;  %v8586_v19 = vld [vmem:[#allocation2 + $0xd0] sm:$0xf] }
 0x2d3   : > { %v8558_v9 = vpop.f32.mrf.mxu3  ;;  %v3523_v49 = vadd.f32 %v3474_v29, %v8125_v39  ;;  %v6766_v39 = vld [vmem:[%s8820_s5 + $0x8] sm:$0xff]  ;;  %v4676_v29 = vor.u32 %v4675_v31, %v4671_v33  ;;  %v4687_v31 = vshll.u32 %v4320_v35, 16  ;;  %v4672_v60 = vsel %vm6991_vm12, %v4667_v17, %v4671_v33 }
 0x2d4   : > { %5594 = vmatpush.bf16.msra.mxu3 %v6766_v39  ;;  %v751_v39 = vld [vmem:[#allocation2 + $0xd4] sm:$0x1] }
 0x2d5   : > { %v8563_v26 = vadd.f32 %v3900_v52, %v3523_v49  ;;  %v4679_v49 = vshll.u32 %v8575_v36, 16  ;;  %v4677_v25 = vrot.slane %v4676_v29, 4  ;;  %v752_v57 = vsel %vm6935_vm6, 0, %v751_v39 }
 0x2d6   : > { %753 = vst [vmem:[#allocation2 + $0xd4] sm:$0x1] %v752_v57  ;;  %v8917_v57 = vld [vmem:[#allocation16_spill] sm:$0xff] }
 0x2d7   : > { %v4681_v45 = vrot.slane %v4679_v49, 5 }
 0x2d9   : > { %v3905_v3 = vpop.f32.mrf.mxu2 }
 0x2da   : > { %v3477_v27 = vpop.f32.mrf.mxu1 }
 0x2db   : > { %v4218_v52 = vpop.f32.mrf.mxu3  ;;  %v3524_v59 = vadd.f32 %v3477_v27, %v8912_v22  ;;  %v4693_v22 = vshll.u32 %v8586_v19, 16 }
 0x2dd   : > { %v3950_v12 = vadd.f32 %v3903_v14, %v3524_v59  ;;  %5285 = vmatmul.bf16.gmra.mxu1 %v8913_v51  ;;  %v8914_v14 = vld [vmem:[#allocation36_spill] sm:$0xff]  ;;  %v4697_v59 = vshrl.u32 %v8586_v19, 16  ;;  %v4686_v51 = vrot.slane %v4684_v54, 4  ;;  %v4695_v28 = vrot.slane %v4693_v22, 5  ;;  %v8599_v35 = vld [vmem:[#allocation2 + $0xd4] sm:$0x1] }
 0x2de   : > { %6581 = vmatmul.msk.bf16.gmra.mxu2 %vm424_vm1, %v6795_v20  ;;  %v4752_v20 = vunpack.c.l.b16 %v4672_v60  ;;  %v6796_v54 = vld [vmem:[%s6879_s12 + $0x28] sm:$0xff] }
 0x2df   : > { %v8581_v13 = vadd.f32 %v4218_v52, %v3950_v12  ;;  %v4682_v12 = vsel %vm6991_vm12, %v4677_v25, %v4681_v45  ;;  %v4699_v29 = vrot.slane %v4697_v59, 4  ;;  %v4703_v25 = vshll.u32 %v8599_v35, 16 }
 0x2e1   : > { %4909 = vmatmul.bf16.gmra.mxu0 %v4769_v40  ;;  %v3908_v48 = vpop.f32.mrf.mxu2  ;;  %v4689_v40 = vrot.slane %v4687_v31, 5  ;;  %v4700_v17 = vor.u32 %v4699_v29, %v4695_v28  ;;  %v4705_v60 = vrot.slane %v4703_v25, 5 }
 0x2e2   : > { %v3479_v38 = vpop.f32.mrf.mxu1 }
 0x2e3   : > { %v8583_v42 = vpop.f32.mrf.mxu3  ;;  %v3525_v63 = vadd.f32 %v3479_v38, %v8914_v14  ;;  %v4753_v38 = vunpack.c.l.b16 %v4682_v12  ;;  %v8916_v14 = vld [vmem:[#allocation5_spill] sm:$0xff]  ;;  %v4690_v33 = vor.u32 %v4689_v40, %v4686_v51  ;;  %v4701_v59 = vrot.slane %v4700_v17, 4 }
 0x2e5   : > { %v8590_v52 = vadd.f32 %v3905_v3, %v3525_v63  ;;  %v4770_v45 = vpack.c.b16 %v4753_v38, %v4752_v20  ;;  %v4691_v22 = vrot.slane %v4690_v33, 4  ;;  %v6765_v20 = vld [vmem:[%s8820_s5] sm:$0xff] }
 0x2e6   : > { %5595 = vmatpush.bf16.msra.mxu3 %v6765_v20  ;;  %v8919_v33 = vld [vmem:[#allocation20_spill] sm:$0xff] }
 0x2e7   : > { %v4696_v29 = vsel %vm6991_vm12, %v4691_v22, %v4695_v28  ;;  %v6797_v28 = vld [vmem:[%s6879_s12 + $0x30] sm:$0xff] }
 0x2e8   : > { %v4754_v38 = vunpack.c.l.b16 %v4696_v29 }
 0x2e9   : > { %v3910_v39 = vpop.f32.mrf.mxu2 }
 0x2ea   : > { %v3482_v49 = vpop.f32.mrf.mxu1 }
 0x2eb   : > { %v4223_v3 = vpop.f32.mrf.mxu3  ;;  %v3526_v63 = vadd.f32 %v3482_v49, %v8916_v14 }
 0x2ed   : > { %v3952_v27 = vadd.f32 %v3908_v48, %v3526_v63  ;;  %5290 = vmatmul.bf16.gmra.mxu1 %v8917_v57  ;;  %v8918_v48 = vld [vmem:[#allocation22_spill] sm:$0xff] }
 0x2ee   : > { %6582 = vmatmul.msk.bf16.gmra.mxu2 %vm424_vm1, %v6796_v54 }
 0x2ef   : > { %v8605_v31 = vadd.f32 %v4223_v3, %v3952_v27  ;;  %v4706_v3 = vsel %vm6991_vm12, %v4701_v59, %v4705_v60 }
 0x2f0   : > { %v4755_v63 = vunpack.c.l.b16 %v4706_v3  ;;  %v5124_v3 = vrot.slane %v8575_v36, 5  ;;  %v6798_v36 = vld [vmem:[%s6879_s12 + $0x38] sm:$0xff] }
 0x2f1   : > { %4914 = vmatmul.bf16.gmra.mxu0 %v4770_v45  ;;  %v3913_v51 = vpop.f32.mrf.mxu2  ;;  %v8920_v45 = vld [vmem:[#allocation19_spill] sm:$0xff] }
 0x2f2   : > { %v3484_v12 = vpop.f32.mrf.mxu1  ;;  %v4771_v25 = vpack.c.b16 %v4755_v63, %v4754_v38 }
 0x2f3   : > { %v8607_v49 = vpop.f32.mrf.mxu3  ;;  %v3527_v14 = vadd.f32 %v3484_v12, %v8918_v48  ;;  %v5121_v48 = vrot.slane %v8561_v24, 5 }
 0x2f5   : > { %v8610_v40 = vadd.f32 %v3910_v39, %v3527_v14  ;;  %v4971_v14 = vld [vmem:[#allocation2 + $0xc0] sm:$0xe]  ;;  %v5123_v29 = vrot.slane %v5121_v48, 4 }
 0x2f7   : > { %v5125_v63 = vsel %vm6974_vm9, %v5123_v29, %v5124_v3  ;;  %v8922_v3 = vld [vmem:[#allocation30_spill] sm:$0xff] }
 0x2f9   : > { %v3915_v54 = vpop.f32.mrf.mxu2 }
 0x2fa   : > { %v3487_v27 = vpop.f32.mrf.mxu1 }
 0x2fb   : > { %v4228_v57 = vpop.f32.mrf.mxu3  ;;  %v3528_v17 = vadd.f32 %v3487_v27, %v8919_v33  ;;  %v5179_v33 = vunpack.c.l.b16 %v5125_v63 }
 0x2fd   : > { %v3954_v39 = vadd.f32 %v3913_v51, %v3528_v17  ;;  %5295 = vmatmul.bf16.gmra.mxu1 %v8920_v45  ;;  %v6527_v51 = vrot.slane %v4971_v14, 9 }
 0x2fe   : > { %6583 = vmatmul.msk.bf16.gmra.mxu2 %vm424_vm1, %v6797_v28 }
 0x2ff   : > { %v8623_v5 = vadd.f32 %v4228_v57, %v3954_v39  ;;  %v5122_v38 = vsel %vm6974_vm9, %v6527_v51, %v5121_v48  ;;  %v8921_v39 = vld [vmem:[#allocation27_spill] sm:$0xff] }
 0x301   : > { %4919 = vmatmul.bf16.gmra.mxu0 %v4771_v25  ;;  %v3918_v20 = vpop.f32.mrf.mxu2 }
 0x302   : > { %v3489_v22 = vpop.f32.mrf.mxu1 }
 0x303   : > { %v8625_v59 = vpop.f32.mrf.mxu3  ;;  %v3529_v60 = vadd.f32 %v3489_v22, %v8329_v11  ;;  %v5178_v11 = vunpack.c.l.b16 %v5122_v38  ;;  %v6799_v38 = vld [vmem:[%s6879_s12 + $0x40] sm:$0xff] }
 0x305   : > { %v8628_v12 = vadd.f32 %v3915_v54, %v3529_v60  ;;  %v8637_v24 = vpack.c.b16 %v5179_v33, %v5178_v11  ;;  %v8923_v11 = vld [vmem:[#allocation33_spill] sm:$0xff] }
 0x306   : > { %v6800_v33 = vld [vmem:[%s6879_s12 + $0x48] sm:$0xff] }
 0x309   : > { %v3920_v54 = vpop.f32.mrf.mxu2 }
 0x30a   : > { %v3492_v27 = vpop.f32.mrf.mxu1 }
 0x30b   : > { %v4233_v57 = vpop.f32.mrf.mxu3  ;;  %v3530_v17 = vadd.f32 %v3492_v27, %v8358_v44 }
 0x30d   : > { %v3956_v25 = vadd.f32 %v3918_v20, %v3530_v17  ;;  %5300 = vmatmul.bf16.gmra.mxu1 %v8921_v39 }
 0x30e   : > { %6584 = vmatmul.msk.bf16.gmra.mxu2 %vm424_vm1, %v6798_v36 }
 0x30f   : > { %v8642_v45 = vadd.f32 %v4233_v57, %v3956_v25 }
 0x311   : > { %v3923_v51 = vpop.f32.mrf.mxu2 }
 0x312   : > { %v3494_v28 = vpop.f32.mrf.mxu1 }
 0x313   : > { %v3531_v22 = vadd.f32 %v3494_v28, %v8391_v61  ;;  %v8645_v60 = vpop.f32.mrf.mxu3 }
 0x315   : > { %v8647_v48 = vadd.f32 %v3920_v54, %v3531_v22  ;;  %v4865_v54 = vpop.f32.mrf.mxu0 }
 0x31a   : > { %v3497_v44 = vpop.f32.mrf.mxu1 }
 0x31b   : > { %v3532_v14 = vadd.f32 %v3497_v44, %v8416_v10  ;;  %v4238_v29 = vpop.f32.mrf.mxu3  ;;  %v8924_v44 = vld [vmem:[#allocation34_spill] sm:$0xff] }
 0x31d   : > { %5305 = vmatmul.bf16.gmra.mxu1 %v8922_v3  ;;  %v3958_v20 = vadd.f32 %v3923_v51, %v3532_v14  ;;  %v4867_v14 = vpop.f32.mrf.mxu0 }
 0x31e   : > { %6585 = vmatmul.msk.bf16.gmra.mxu2 %vm424_vm1, %v6799_v38 }
 0x31f   : > { %v8653_v63 = vadd.f32 %v4238_v29, %v3958_v20 }
 0x322   : > { %v3499_v27 = vpop.f32.mrf.mxu1 }
 0x323   : > { %v8656_v61 = vadd.f32 %v3499_v27, %v8440_v30  ;;  %v6801_v30 = vld [vmem:[%s6879_s12 + $0x50] sm:$0xff] }
 0x325   : > { %v4870_v27 = vpop.f32.mrf.mxu0 }
 0x32a   : > { %v5271_v57 = vpop.f32.mrf.mxu1 }
 0x32b   : > { %v5351_v10 = vadd.f32 %v5271_v57, %v8452_v0  ;;  %v8925_v57 = vld [vmem:[#allocation37_spill] sm:$0xff] }
 0x32d   : > { %5310 = vmatmul.bf16.gmra.mxu1 %v8923_v11  ;;  %v5383_v39 = vmax.f32 %v5351_v10, 0.0  ;;  %v8669_v11 = vpop.f32.mrf.mxu2 }
 0x32e   : > { %6586 = vmatmul.msk.bf16.gmra.mxu2 %vm424_vm1, %v6800_v33  ;;  %v6802_v33 = vld [vmem:[%s6879_s12 + $0x58] sm:$0xff] }
 0x332   : > { %v5273_v17 = vpop.f32.mrf.mxu1 }
 0x333   : > { %v5352_v25 = vadd.f32 %v5273_v17, %v8466_v15 }
 0x335   : > { %v5384_v36 = vmax.f32 %v5352_v25, 0.0  ;;  %v4872_v25 = vpop.f32.mrf.mxu0 }
 0x337   : > { %v5415_v28 = vpack.c.bf16 %v5384_v36, %v5383_v39 }
 0x339   : > { %5596 = vmatmul.bf16.vlgmr.msra.gmra.mxu3 %v5415_v28 }
 0x33a   : > { %v5276_v22 = vpop.f32.mrf.mxu1 }
 0x33b   : > { %v5353_v51 = vadd.f32 %v5276_v22, %v8479_v53  ;;  %v8926_v22 = vld [vmem:[#allocation6_spill] sm:$0xff] }
 0x33d   : > { %5315 = vmatmul.bf16.gmra.mxu1 %v8924_v44  ;;  %v5385_v3 = vmax.f32 %v5353_v51, 0.0  ;;  %v4875_v44 = vpop.f32.mrf.mxu0 }
 0x33e   : > { %6587 = vmatmul.msk.bf16.gmra.mxu2 %vm424_vm1, %v6801_v30 }
 0x342   : > { %v5278_v29 = vpop.f32.mrf.mxu1 }
 0x343   : > { %v5354_v0 = vadd.f32 %v5278_v29, %v8492_v62 }
 0x345   : > { %v5386_v15 = vmax.f32 %v5354_v0, 0.0 }
 0x347   : > { %v5416_v20 = vpack.c.bf16 %v5386_v15, %v5385_v3  ;;  %v4877_v15 = vpop.f32.mrf.mxu0 }
 0x349   : > { %5601 = vmatmul.bf16.gmra.mxu3 %v5416_v20  ;;  %v8927_v20 = vld [vmem:[#allocation23_spill] sm:$0xff] }
 0x34a   : > { %v5281_v38 = vpop.f32.mrf.mxu1 }
 0x34b   : > { %v5355_v10 = vadd.f32 %v5281_v38, %v8503_v4  ;;  %v4252_v38 = vadd.f32 %v8927_v20, %v8386_v21 }
 0x34d   : > { %5320 = vmatmul.bf16.gmra.mxu1 %v8925_v57  ;;  %v5387_v62 = vmax.f32 %v5355_v10, 0.0  ;;  %v8928_v57 = vld [vmem:[#allocation25_spill] sm:$0xff]  ;;  %v4934_v10 = vadd.f32 %v4867_v14, %v4252_v38 }
 0x34e   : > { %6588 = vmatmul.msk.bf16.gmra.mxu2 %vm424_vm1, %v6802_v33  ;;  %v4933_v33 = vadd.f32 %v4865_v54, %v8928_v57 }
 0x352   : > { %v5283_v17 = vpop.f32.mrf.mxu1 }
 0x353   : > { %v5356_v53 = vadd.f32 %v5283_v17, %v8516_v7 }
 0x355   : > { %v5388_v39 = vmax.f32 %v5356_v53, 0.0 }
 0x357   : > { %v5417_v36 = vpack.c.bf16 %v5388_v39, %v5387_v62 }
 0x359   : > { %5606 = vmatmul.bf16.gmra.mxu3 %v5417_v36 }
 0x35a   : > { %v5286_v28 = vpop.f32.mrf.mxu1 }
 0x35b   : > { %v5357_v30 = vadd.f32 %v5286_v28, %v8530_v37  ;;  %v4880_v37 = vpop.f32.mrf.mxu0 }
 0x35d   : > { %5325 = vmatmul.bf16.gmra.mxu1 %v8926_v22  ;;  %v5389_v0 = vmax.f32 %v5357_v30, 0.0  ;;  %v8929_v30 = vld [vmem:[#allocation8_spill] sm:$0xff] }
 0x362   : > { %v5288_v51 = vpop.f32.mrf.mxu1 }
 0x363   : > { %v5358_v29 = vadd.f32 %v5288_v51, %v8545_v58  ;;  %v4882_v22 = vpop.f32.mrf.mxu0 }
 0x365   : > { %v5390_v3 = vmax.f32 %v5358_v29, 0.0  ;;  %v8931_v29 = vld [vmem:[#allocation11_spill] sm:$0xff] }
 0x366   : > { %v4935_v21 = vadd.f32 %v4870_v27, %v8931_v29  ;;  %v4256_v27 = vadd.f32 %v8456_v46, %v8463_v23  ;;  %v5460_v46 = vpop.f32.mrf.mxu2 }
 0x367   : > { %v5418_v4 = vpack.c.bf16 %v5390_v3, %v5389_v0 }
 0x369   : > { %5611 = vmatmul.bf16.gmra.mxu3 %v5418_v4 }
 0x36a   : > { %v5291_v7 = vpop.f32.mrf.mxu1 }
 0x36b   : > { %v5359_v17 = vadd.f32 %v5291_v7, %v4933_v33  ;;  %v4885_v20 = vpop.f32.mrf.mxu0  ;;  %v5128_v33 = vrot.slane %v8586_v19, 5 }
 0x36d   : > { %5330 = vmatmul.bf16.gmra.mxu1 %v8339_v32  ;;  %v5391_v39 = vmax.f32 %v5359_v17, 0.0  ;;  %v8930_v32 = vld [vmem:[#allocation12_spill] sm:$0xff] }
 0x36e   : > { %v4254_v51 = vadd.f32 %v8930_v32, %v8434_v2  ;;  %v5131_v2 = vrot.slane %v8599_v35, 5  ;;  %v5462_v50 = vpop.f32.mrf.mxu2 }
 0x370   : > { %v4936_v0 = vadd.f32 %v4872_v25, %v4254_v51  ;;  %v4937_v25 = vadd.f32 %v4875_v44, %v8454_v6 }
 0x372   : > { %v5293_v53 = vpop.f32.mrf.mxu1 }
 0x373   : > { %v5360_v62 = vadd.f32 %v5293_v53, %v4934_v10  ;;  %v4972_v10 = vld [vmem:[#allocation2 + $0xcc] sm:$0xe]  ;;  %v5130_v53 = vrot.slane %v5128_v33, 4 }
 0x374   : > { %v6528_v17 = vrot.slane %v4972_v10, 9 }
 0x375   : > { %v5392_v58 = vmax.f32 %v5360_v62, 0.0  ;;  %v4938_v62 = vadd.f32 %v4877_v15, %v4256_v27  ;;  %v5132_v19 = vsel %vm6974_vm9, %v5130_v53, %v5131_v2  ;;  %v4258_v15 = vadd.f32 %v8486_v47, %v8489_v43  ;;  %v6804_v53 = vld [vmem:[%s6879_s12 + $0x68] sm:$0xff] }
 0x376   : > { %v5181_v51 = vunpack.c.l.b16 %v5132_v19  ;;  %v5465_v10 = vpop.f32.mrf.mxu2  ;;  %v4260_v47 = vadd.f32 %v8510_v16, %v8513_v1  ;;  %v8711_v1 = vld [vmem:[%s8822_s7] ss:$0 sm:$0xff] }
 0x377   : > { %v5419_v36 = vpack.c.bf16 %v5392_v58, %v5391_v39  ;;  %v4887_v39 = vpop.f32.mrf.mxu0 }
 0x379   : > { %5616 = vmatmul.bf16.gmra.mxu3 %v5419_v36 }
 0x37a   : > { %v5296_v28 = vpop.f32.mrf.mxu1 }
 0x37b   : > { %v5361_v54 = vadd.f32 %v5296_v28, %v4935_v21  ;;  %v5129_v28 = vsel %vm6974_vm9, %v6528_v17, %v5128_v33  ;;  %v4939_v21 = vadd.f32 %v4880_v37, %v8483_v41  ;;  %v4941_v41 = vadd.f32 %v4885_v20, %v8507_v8 }
 0x37c   : > { %v5180_v35 = vunpack.c.l.b16 %v5129_v28 }
 0x37d   : > { %5335 = vmatmul.bf16.gmra.mxu1 %v8929_v30  ;;  %v5393_v4 = vmax.f32 %v5361_v54, 0.0  ;;  %v4940_v54 = vadd.f32 %v4882_v22, %v4258_v15  ;;  %v4942_v22 = vadd.f32 %v4887_v39, %v4260_v47 }
 0x37e   : > { %v5197_v6 = vpack.c.b16 %v5181_v51, %v5180_v35  ;;  %v5467_v37 = vpop.f32.mrf.mxu2  ;;  %v6805_v51 = vld [vmem:[%s6879_s12 + $0x70] sm:$0xff] }
 0x37f   : > { %v4890_v44 = vpop.f32.mrf.mxu0 }
 0x382   : > { %v5298_v14 = vpop.f32.mrf.mxu1 }
 0x383   : > { %v5362_v3 = vadd.f32 %v5298_v14, %v4936_v0  ;;  %v6803_v0 = vld [vmem:[%s6879_s12 + $0x60] sm:$0xff] }
 0x384   : > { %6589 = vmatmul.msk.bf16.gmra.mxu2 %vm424_vm1, %v6803_v0 }
 0x385   : > { %v5394_v7 = vmax.f32 %v5362_v3, 0.0 }
 0x386   : > { %v5470_v19 = vpop.f32.mrf.mxu2 }
 0x387   : > { %v5420_v38 = vpack.c.bf16 %v5394_v7, %v5393_v4  ;;  %v4892_v7 = vpop.f32.mrf.mxu0 }
 0x389   : > { %5621 = vmatmul.bf16.gmra.mxu3 %v5420_v38 }
 0x38a   : > { %v5301_v57 = vpop.f32.mrf.mxu1 }
 0x38b   : > { %v5363_v58 = vadd.f32 %v5301_v57, %v4937_v25 }
 0x38d   : > { %5340 = vmatmul.bf16.gmra.mxu1 %v8637_v24  ;;  %v5395_v30 = vmax.f32 %v5363_v58, 0.0 }
 0x38e   : > { %v8718_v35 = vpop.f32.mrf.mxu2 }
 0x38f   : > { %v4895_v43 = vpop.f32.mrf.mxu0 }
 0x392   : > { %v5303_v36 = vpop.f32.mrf.mxu1 }
 0x393   : > { %v5364_v24 = vadd.f32 %v5303_v36, %v4938_v62  ;;  %v8706_v62 = vpop.f32.mrf.mxu3 }
 0x394   : > { %6590 = vmatmul.msk.bf16.gmra.mxu2 %vm424_vm1, %v6804_v53 }
 0x395   : > { %v5396_v32 = vmax.f32 %v5364_v24, 0.0  ;;  %v4262_v24 = vadd.f32 %v8537_v56, %v8540_v34 }
 0x397   : > { %v5421_v29 = vpack.c.bf16 %v5396_v32, %v5395_v30  ;;  %v4897_v16 = vpop.f32.mrf.mxu0  ;;  %v4943_v30 = vadd.f32 %v4890_v44, %v8534_v18 }
 0x399   : > { %5626 = vmatmul.bf16.gmra.mxu3 %v5421_v29  ;;  %v4944_v29 = vadd.f32 %v4892_v7, %v4262_v24  ;;  %v4266_v24 = vadd.f32 %v8583_v42, %v8590_v52 }
 0x39a   : > { %v5306_v23 = vpop.f32.mrf.mxu1 }
 0x39b   : > { %v5365_v14 = vadd.f32 %v5306_v23, %v4939_v21 }
 0x39d   : > { %5345 = vmatmul.bf16.gmra.mxu1 %v5197_v6  ;;  %v5397_v38 = vmax.f32 %v5365_v14, 0.0  ;;  %v5475_v14 = vpop.f32.mrf.mxu2 }
 0x39f   : > { %v4900_v34 = vpop.f32.mrf.mxu0 }
 0x3a2   : > { %v5308_v3 = vpop.f32.mrf.mxu1 }
 0x3a3   : > { %v5366_v4 = vadd.f32 %v5308_v3, %v4940_v54 }
 0x3a4   : > { %6591 = vmatmul.msk.bf16.gmra.mxu2 %vm424_vm1, %v6805_v51 }
 0x3a5   : > { %v5398_v57 = vmax.f32 %v5366_v4, 0.0 }
 0x3a7   : > { %v5422_v33 = vpack.c.bf16 %v5398_v57, %v5397_v38  ;;  %v4902_v38 = vpop.f32.mrf.mxu0 }
 0x3a8   : > { %v4948_v51 = vadd.f32 %v4902_v38, %v4266_v24 }
 0x3a9   : > { %5631 = vmatmul.bf16.gmra.mxu3 %v5422_v33  ;;  %v4264_v33 = vadd.f32 %v8558_v9, %v8563_v26 }
 0x3aa   : > { %v5311_v17 = vpop.f32.mrf.mxu1 }
 0x3ab   : > { %v5367_v2 = vadd.f32 %v5311_v17, %v4941_v41  ;;  %v4945_v17 = vadd.f32 %v4895_v43, %v8555_v55  ;;  %v6806_v41 = vld [vmem:[%s6879_s12 + $0x78] sm:$0xff]  ;;  %v4946_v53 = vadd.f32 %v4897_v16, %v4264_v33 }
 0x3ad   : > { %v5399_v58 = vmax.f32 %v5367_v2, 0.0 }
 0x3af   : > { %v4905_v9 = vpop.f32.mrf.mxu0 }
 0x3b2   : > { %v5313_v27 = vpop.f32.mrf.mxu1 }
 0x3b3   : > { %v5368_v25 = vadd.f32 %v5313_v27, %v4942_v22 }
 0x3b5   : > { %v5400_v36 = vmax.f32 %v5368_v25, 0.0 }
 0x3b7   : > { %v5423_v28 = vpack.c.bf16 %v5400_v36, %v5399_v58 }
 0x3b9   : > { %5636 = vmatmul.bf16.gmra.mxu3 %v5423_v28 }
 0x3ba   : > { %v5316_v8 = vpop.f32.mrf.mxu1 }
 0x3bc   : > { %v5597_v20 = vpop.f32.mrf.mxu3 }
 0x3bd   : > { %v5598_v39 = vadd.f32 %v5597_v20, %v5460_v46  ;;  %v5369_v46 = vadd.f32 %v5316_v8, %v4943_v30  ;;  %v4947_v30 = vadd.f32 %v4900_v34, %v8581_v13 }
 0x3bf   : > { %v5681_v32 = vadd.f32 %v8711_v1, %v5598_v39  ;;  %v5401_v44 = vmax.f32 %v5369_v46, 0.0 }
 0x3c1   : > { %v5713_v6 = vmax.f32 %v5681_v32, 0.0 }
 0x3c2   : > { %v5318_v56 = vpop.f32.mrf.mxu1 }
 0x3c3   : > { %5745 = vst [vmem:[%s8725_s21] sm:$0xff] %v5713_v6  ;;  %v5370_v18 = vadd.f32 %v5318_v56, %v4944_v29  ;;  %v4907_v29 = vpop.f32.mrf.mxu0 }
 0x3c4   : > { %v5599_v23 = vpop.f32.mrf.mxu3 }
 0x3c5   : > { %v5402_v15 = vmax.f32 %v5370_v18, 0.0  ;;  %v5600_v21 = vadd.f32 %v5599_v23, %v5462_v50  ;;  %v5477_v50 = vpop.f32.mrf.mxu2  ;;  %6592 = vmatmul.msk.bf16.gmra.mxu2 %vm424_vm1, %v6806_v41 }
 0x3c7   : > { %v5424_v0 = vpack.c.bf16 %v5402_v15, %v5401_v44  ;;  %v5682_v54 = vadd.f32 %v8711_v1, %v5600_v21 }
 0x3c9   : > { %v5714_v3 = vmax.f32 %v5682_v54, 0.0  ;;  %5641 = vmatmul.bf16.gmra.mxu3 %v5424_v0 }
 0x3ca   : > { %v5321_v4 = vpop.f32.mrf.mxu1 }
 0x3cb   : > { %5746 = vst [vmem:[%s8725_s21 + $0x8] sm:$0xff] %v5714_v3  ;;  %v5371_v22 = vadd.f32 %v5321_v4, %v4945_v17  ;;  %v4910_v0 = vpop.f32.mrf.mxu0  ;;  %v4268_v4 = vadd.f32 %v8607_v49, %v8610_v40 }
 0x3cc   : > { %v5602_v7 = vpop.f32.mrf.mxu3 }
 0x3cd   : > { %v5603_v57 = vadd.f32 %v5602_v7, %v5465_v10  ;;  %v5403_v10 = vmax.f32 %v5371_v22, 0.0  ;;  %v5480_v43 = vpop.f32.mrf.mxu2  ;;  %v4949_v7 = vadd.f32 %v4905_v9, %v8605_v31  ;;  %v4951_v9 = vadd.f32 %v4910_v0, %v8623_v5 }
 0x3cf   : > { %v5683_v47 = vadd.f32 %v8711_v1, %v5603_v57  ;;  %v4950_v57 = vadd.f32 %v4907_v29, %v4268_v4 }
 0x3d1   : > { %v5715_v2 = vmax.f32 %v5683_v47, 0.0 }
 0x3d2   : > { %v5323_v27 = vpop.f32.mrf.mxu1 }
 0x3d3   : > { %5747 = vst [vmem:[%s8725_s21 + $0x10] sm:$0xff] %v5715_v2  ;;  %v5372_v25 = vadd.f32 %v5323_v27, %v4946_v53  ;;  %v4912_v22 = vpop.f32.mrf.mxu0 }
 0x3d4   : > { %v5604_v58 = vpop.f32.mrf.mxu3 }
 0x3d5   : > { %v5404_v36 = vmax.f32 %v5372_v25, 0.0  ;;  %v5605_v28 = vadd.f32 %v5604_v58, %v5467_v37  ;;  %v5482_v37 = vpop.f32.mrf.mxu2 }
 0x3d7   : > { %v5425_v26 = vpack.c.bf16 %v5404_v36, %v5403_v10  ;;  %v5684_v55 = vadd.f32 %v8711_v1, %v5605_v28  ;;  %v4270_v28 = vadd.f32 %v8625_v59, %v8628_v12 }
 0x3d9   : > { %v5716_v8 = vmax.f32 %v5684_v55, 0.0  ;;  %5646 = vmatmul.bf16.gmra.mxu3 %v5425_v26 }
 0x3da   : > { %v5326_v20 = vpop.f32.mrf.mxu1 }
 0x3db   : > { %5748 = vst [vmem:[%s8725_s21 + $0x18] sm:$0xff] %v5716_v8  ;;  %v5373_v46 = vadd.f32 %v5326_v20, %v4947_v30  ;;  %v4915_v26 = vpop.f32.mrf.mxu0  ;;  %v4952_v8 = vadd.f32 %v4912_v22, %v4270_v28 }
 0x3dc   : > { %v5607_v16 = vpop.f32.mrf.mxu3 }
 0x3dd   : > { %v5608_v39 = vadd.f32 %v5607_v16, %v5470_v19  ;;  %v5405_v44 = vmax.f32 %v5373_v46, 0.0  ;;  %v5485_v13 = vpop.f32.mrf.mxu2 }
 0x3df   : > { %v5685_v32 = vadd.f32 %v8711_v1, %v5608_v39 }
 0x3e1   : > { %v5717_v6 = vmax.f32 %v5685_v32, 0.0 }
 0x3e2   : > { %v5328_v56 = vpop.f32.mrf.mxu1 }
 0x3e3   : > { %5749 = vst [vmem:[%s8725_s21 + $0x20] sm:$0xff] %v5717_v6  ;;  %v5374_v18 = vadd.f32 %v5328_v56, %v4948_v51  ;;  %v4917_v12 = vpop.f32.mrf.mxu0 }
 0x3e4   : > { %v5609_v23 = vpop.f32.mrf.mxu3 }
 0x3e5   : > { %v5406_v15 = vmax.f32 %v5374_v18, 0.0  ;;  %v5610_v19 = vadd.f32 %v5609_v23, %v8718_v35  ;;  %v5487_v35 = vpop.f32.mrf.mxu2  ;;  %v4272_v23 = vadd.f32 %v8645_v60, %v8647_v48 }
 0x3e7   : > { %v5426_v21 = vpack.c.bf16 %v5406_v15, %v5405_v44  ;;  %v5686_v42 = vadd.f32 %v8711_v1, %v5610_v19  ;;  %v4953_v44 = vadd.f32 %v4915_v26, %v8642_v45 }
 0x3e9   : > { %v5718_v52 = vmax.f32 %v5686_v42, 0.0  ;;  %5651 = vmatmul.bf16.gmra.mxu3 %v5426_v21 }
 0x3ea   : > { %v5331_v34 = vpop.f32.mrf.mxu1 }
 0x3eb   : > { %5750 = vst [vmem:[%s8725_s21 + $0x28] sm:$0xff] %v5718_v52  ;;  %v5375_v33 = vadd.f32 %v5331_v34, %v4949_v7  ;;  %v4920_v52 = vpop.f32.mrf.mxu0 }
 0x3ec   : > { %v5612_v54 = vpop.f32.mrf.mxu3 }
 0x3ed   : > { %v5613_v3 = vadd.f32 %v5612_v54, %v5475_v14  ;;  %v5407_v2 = vmax.f32 %v5375_v33, 0.0  ;;  %v5490_v40 = vpop.f32.mrf.mxu2 }
 0x3ef   : > { %v5687_v38 = vadd.f32 %v8711_v1, %v5613_v3 }
 0x3f1   : > { %v5719_v17 = vmax.f32 %v5687_v38, 0.0  ;;  %v3959_v38 = vadd.f32 %v8669_v11, %v8656_v61 }
 0x3f2   : > { %v5333_v47 = vpop.f32.mrf.mxu1 }
 0x3f3   : > { %5751 = vst [vmem:[%s8725_s21 + $0x30] sm:$0xff] %v5719_v17  ;;  %v5376_v41 = vadd.f32 %v5333_v47, %v4950_v57  ;;  %v4922_v17 = vpop.f32.mrf.mxu0 }
 0x3f4   : > { %v5614_v53 = vpop.f32.mrf.mxu3 }
 0x3f5   : > { %v5408_v27 = vmax.f32 %v5376_v41, 0.0  ;;  %v5615_v14 = vadd.f32 %v5614_v53, %v5477_v50  ;;  %v5492_v50 = vpop.f32.mrf.mxu2  ;;  %v4274_v41 = vadd.f32 %v8706_v62, %v3959_v38  ;;  %v4955_v53 = vadd.f32 %v4920_v52, %v8653_v63 }
 0x3f7   : > { %v5427_v25 = vpack.c.bf16 %v5408_v27, %v5407_v2  ;;  %v5688_v49 = vadd.f32 %v8711_v1, %v5615_v14  ;;  %v4956_v22 = vadd.f32 %v4922_v17, %v4274_v41 }
 0x3f9   : > { %v5720_v31 = vmax.f32 %v5688_v49, 0.0  ;;  %5656 = vmatmul.bf16.gmra.mxu3 %v5427_v25 }
 0x3fa   : > { %v5336_v58 = vpop.f32.mrf.mxu1 }
 0x3fb   : > { %5752 = vst [vmem:[%s8725_s21 + $0x38] sm:$0xff] %v5720_v31  ;;  %v5377_v20 = vadd.f32 %v5336_v58, %v4951_v9 }
 0x3fc   : > { %v5617_v10 = vpop.f32.mrf.mxu3 }
 0x3fd   : > { %v5618_v36 = vadd.f32 %v5617_v10, %v5480_v43  ;;  %v5409_v32 = vmax.f32 %v5377_v20, 0.0  ;;  %v5495_v6 = vpop.f32.mrf.mxu2 }
 0x3ff   : > { %v5689_v55 = vadd.f32 %v8711_v1, %v5618_v36 }
 0x401   : > { %v5721_v16 = vmax.f32 %v5689_v55, 0.0 }
 0x402   : > { %v5338_v39 = vpop.f32.mrf.mxu1 }
 0x403   : > { %5753 = vst [vmem:[%s8725_s21 + $0x40] sm:$0xff] %v5721_v16  ;;  %v5378_v24 = vadd.f32 %v5338_v39, %v4952_v8 }
 0x404   : > { %v5619_v30 = vpop.f32.mrf.mxu3 }
 0x405   : > { %v5410_v51 = vmax.f32 %v5378_v24, 0.0  ;;  %v5620_v43 = vadd.f32 %v5619_v30, %v5482_v37  ;;  %v4954_v37 = vadd.f32 %v4917_v12, %v4272_v23  ;;  %v5497_v54 = vpop.f32.mrf.mxu2 }
 0x407   : > { %v5428_v29 = vpack.c.bf16 %v5410_v51, %v5409_v32  ;;  %v5690_v59 = vadd.f32 %v8711_v1, %v5620_v43 }
 0x409   : > { %v5722_v5 = vmax.f32 %v5690_v59, 0.0  ;;  %5661 = vmatmul.bf16.gmra.mxu3 %v5428_v29 }
 0x40a   : > { %v5341_v46 = vpop.f32.mrf.mxu1 }
 0x40b   : > { %5754 = vst [vmem:[%s8725_s21 + $0x48] sm:$0xff] %v5722_v5  ;;  %v5379_v19 = vadd.f32 %v5341_v46, %v4953_v44 }
 0x40c   : > { %v5622_v56 = vpop.f32.mrf.mxu3 }
 0x40d   : > { %v5623_v18 = vadd.f32 %v5622_v56, %v5485_v13  ;;  %v5411_v3 = vmax.f32 %v5379_v19, 0.0  ;;  %v5500_v47 = vpop.f32.mrf.mxu2 }
 0x40f   : > { %v5691_v15 = vadd.f32 %v8711_v1, %v5623_v18 }
 0x411   : > { %v5723_v21 = vmax.f32 %v5691_v15, 0.0 }
 0x412   : > { %v5343_v42 = vpop.f32.mrf.mxu1 }
 0x413   : > { %5755 = vst [vmem:[%s8725_s21 + $0x50] sm:$0xff] %v5723_v21  ;;  %v5380_v34 = vadd.f32 %v5343_v42, %v4954_v37 }
 0x414   : > { %v5624_v0 = vpop.f32.mrf.mxu3 }
 0x415   : > { %v5412_v4 = vmax.f32 %v5380_v34, 0.0  ;;  %v5625_v13 = vadd.f32 %v5624_v0, %v5487_v35  ;;  %v5502_v58 = vpop.f32.mrf.mxu2 }
 0x417   : > { %v5429_v7 = vpack.c.bf16 %v5412_v4, %v5411_v3  ;;  %v5692_v60 = vadd.f32 %v8711_v1, %v5625_v13 }
 0x419   : > { %v5724_v48 = vmax.f32 %v5692_v60, 0.0  ;;  %5666 = vmatmul.bf16.gmra.mxu3 %v5429_v7 }
 0x41a   : > { %v5346_v45 = vpop.f32.mrf.mxu1 }
 0x41b   : > { %5756 = vst [vmem:[%s8725_s21 + $0x58] sm:$0xff] %v5724_v48  ;;  %v5381_v2 = vadd.f32 %v5346_v45, %v4955_v53 }
 0x41c   : > { %v5627_v57 = vpop.f32.mrf.mxu3 }
 0x41d   : > { %v5628_v33 = vadd.f32 %v5627_v57, %v5490_v40  ;;  %v5413_v11 = vmax.f32 %v5381_v2, 0.0  ;;  %v5505_v26 = vpop.f32.mrf.mxu2 }
 0x41f   : > { %v5693_v35 = vadd.f32 %v8711_v1, %v5628_v33 }
 0x421   : > { %v5725_v27 = vmax.f32 %v5693_v35, 0.0 }
 0x422   : > { %v5348_v14 = vpop.f32.mrf.mxu1 }
 0x423   : > { %5757 = vst [vmem:[%s8725_s21 + $0x60] sm:$0xff] %v5725_v27  ;;  %v5382_v25 = vadd.f32 %v5348_v14, %v4956_v22 }
 0x424   : > { %v5629_v61 = vpop.f32.mrf.mxu3 }
 0x425   : > { %v5414_v49 = vmax.f32 %v5382_v25, 0.0  ;;  %v5630_v40 = vadd.f32 %v5629_v61, %v5492_v50  ;;  %v5507_v39 = vpop.f32.mrf.mxu2 }
 0x427   : > { %v5430_v31 = vpack.c.bf16 %v5414_v49, %v5413_v11  ;;  %v5694_v62 = vadd.f32 %v8711_v1, %v5630_v40 }
 0x429   : > { %v5726_v63 = vmax.f32 %v5694_v62, 0.0  ;;  %5671 = vmatmul.bf16.gmra.mxu3 %v5430_v31 }
 0x42b   : > { %5758 = vst [vmem:[%s8725_s21 + $0x68] sm:$0xff] %v5726_v63 }
 0x42c   : > { %v5632_v10 = vpop.f32.mrf.mxu3 }
 0x42d   : > { %v5633_v36 = vadd.f32 %v5632_v10, %v5495_v6  ;;  %v5510_v29 = vpop.f32.mrf.mxu2 }
 0x42f   : > { %v5695_v28 = vadd.f32 %v8711_v1, %v5633_v36 }
 0x431   : > { %v5727_v9 = vmax.f32 %v5695_v28, 0.0 }
 0x433   : > { %5759 = vst [vmem:[%s8725_s21 + $0x70] sm:$0xff] %v5727_v9 }
 0x434   : > { %v5634_v55 = vpop.f32.mrf.mxu3 }
 0x435   : > { %v5635_v8 = vadd.f32 %v5634_v55, %v5497_v54  ;;  %v5512_v56 = vpop.f32.mrf.mxu2 }
 0x437   : > { %v5696_v50 = vadd.f32 %v8711_v1, %v5635_v8 }
 0x439   : > { %v5728_v20 = vmax.f32 %v5696_v50, 0.0 }
 0x43b   : > { %5760 = vst [vmem:[%s8725_s21 + $0x78] sm:$0xff] %v5728_v20 }
 0x43c   : > { %v5637_v16 = vpop.f32.mrf.mxu3 }
 0x43d   : > { %v5638_v24 = vadd.f32 %v5637_v16, %v5500_v47  ;;  %v5515_v19 = vpop.f32.mrf.mxu2 }
 0x43f   : > { %v5697_v30 = vadd.f32 %v8711_v1, %v5638_v24 }
 0x441   : > { %v5729_v32 = vmax.f32 %v5697_v30, 0.0 }
 0x443   : > { %5761 = vst [vmem:[%s8725_s21 + $0x80] sm:$0xff] %v5729_v32 }
 0x444   : > { %v5639_v51 = vpop.f32.mrf.mxu3 }
 0x445   : > { %v5640_v43 = vadd.f32 %v5639_v51, %v5502_v58  ;;  %v5517_v54 = vpop.f32.mrf.mxu2 }
 0x447   : > { %v5698_v59 = vadd.f32 %v8711_v1, %v5640_v43 }
 0x449   : > { %v5730_v12 = vmax.f32 %v5698_v59, 0.0 }
 0x44b   : > { %5762 = vst [vmem:[%s8725_s21 + $0x88] sm:$0xff] %v5730_v12 }
 0x44c   : > { %v5642_v5 = vpop.f32.mrf.mxu3 }
 0x44d   : > { %v5643_v46 = vadd.f32 %v5642_v5, %v5505_v26  ;;  %v5520_v48 = vpop.f32.mrf.mxu2 }
 0x44f   : > { %v5699_v6 = vadd.f32 %v8711_v1, %v5643_v46 }
 0x451   : > { %v5731_v18 = vmax.f32 %v5699_v6, 0.0 }
 0x453   : > { %5763 = vst [vmem:[%s8725_s21 + $0x90] sm:$0xff] %v5731_v18 }
 0x454   : > { %v5644_v23 = vpop.f32.mrf.mxu3 }
 0x455   : > { %v5645_v44 = vadd.f32 %v5644_v23, %v5507_v39  ;;  %v5522_v47 = vpop.f32.mrf.mxu2 }
 0x457   : > { %v5700_v15 = vadd.f32 %v8711_v1, %v5645_v44 }
 0x459   : > { %v5732_v37 = vmax.f32 %v5700_v15, 0.0 }
 0x45b   : > { %5764 = vst [vmem:[%s8725_s21 + $0x98] sm:$0xff] %v5732_v37 }
 0x45c   : > { %v5647_v21 = vpop.f32.mrf.mxu3 }
 0x45d   : > { %v5648_v42 = vadd.f32 %v5647_v21, %v5510_v29  ;;  %v5525_v27 = vpop.f32.mrf.mxu2 }
 0x45f   : > { %v5701_v52 = vadd.f32 %v8711_v1, %v5648_v42 }
 0x461   : > { %v5733_v34 = vmax.f32 %v5701_v52, 0.0 }
 0x463   : > { %5765 = vst [vmem:[%s8725_s21 + $0xa0] sm:$0xff] %v5733_v34 }
 0x464   : > { %v5649_v0 = vpop.f32.mrf.mxu3 }
 0x465   : > { %v5650_v3 = vadd.f32 %v5649_v0, %v5512_v56  ;;  %v5527_v49 = vpop.f32.mrf.mxu2 }
 0x467   : > { %v5702_v4 = vadd.f32 %v8711_v1, %v5650_v3 }
 0x469   : > { %v5734_v13 = vmax.f32 %v5702_v4, 0.0 }
 0x46b   : > { %5766 = vst [vmem:[%s8725_s21 + $0xa8] sm:$0xff] %v5734_v13 }
 0x46c   : > { %v5652_v7 = vpop.f32.mrf.mxu3 }
 0x46d   : > { %v5653_v60 = vadd.f32 %v5652_v7, %v5515_v19  ;;  %v5530_v36 = vpop.f32.mrf.mxu2 }
 0x46f   : > { %v5703_v45 = vadd.f32 %v8711_v1, %v5653_v60 }
 0x471   : > { %v5735_v38 = vmax.f32 %v5703_v45, 0.0 }
 0x473   : > { %5767 = vst [vmem:[%s8725_s21 + $0xb0] sm:$0xff] %v5735_v38 }
 0x474   : > { %v5654_v57 = vpop.f32.mrf.mxu3 }
 0x475   : > { %v5655_v33 = vadd.f32 %v5654_v57, %v5517_v54  ;;  %v5532_v50 = vpop.f32.mrf.mxu2 }
 0x477   : > { %v5704_v17 = vadd.f32 %v8711_v1, %v5655_v33 }
 0x479   : > { %v5736_v41 = vmax.f32 %v5704_v17, 0.0 }
 0x47b   : > { %5768 = vst [vmem:[%s8725_s21 + $0xb8] sm:$0xff] %v5736_v41 }
 0x47c   : > { %v5657_v53 = vpop.f32.mrf.mxu3 }
 0x47d   : > { %v5658_v35 = vadd.f32 %v5657_v53, %v5520_v48  ;;  %v5535_v32 = vpop.f32.mrf.mxu2 }
 0x47f   : > { %v5705_v22 = vadd.f32 %v8711_v1, %v5658_v35 }
 0x481   : > { %v5737_v2 = vmax.f32 %v5705_v22, 0.0 }
 0x483   : > { %5769 = vst [vmem:[%s8725_s21 + $0xc0] sm:$0xff] %v5737_v2 }
 0x484   : > { %v5659_v14 = vpop.f32.mrf.mxu3 }
 0x485   : > { %v5660_v25 = vadd.f32 %v5659_v14, %v5522_v47  ;;  %v5537_v12 = vpop.f32.mrf.mxu2 }
 0x487   : > { %v5706_v61 = vadd.f32 %v8711_v1, %v5660_v25 }
 0x489   : > { %v5738_v11 = vmax.f32 %v5706_v61, 0.0 }
 0x48b   : > { %5770 = vst [vmem:[%s8725_s21 + $0xc8] sm:$0xff] %v5738_v11 }
 0x48c   : > { %v5662_v40 = vpop.f32.mrf.mxu3 }
 0x48d   : > { %v5663_v31 = vadd.f32 %v5662_v40, %v5525_v27 }
 0x48f   : > { %v5707_v62 = vadd.f32 %v8711_v1, %v5663_v31 }
 0x491   : > { %v5739_v58 = vmax.f32 %v5707_v62, 0.0 }
 0x493   : > { %5771 = vst [vmem:[%s8725_s21 + $0xd0] sm:$0xff] %v5739_v58 }
 0x494   : > { %v5664_v63 = vpop.f32.mrf.mxu3 }
 0x495   : > { %v5665_v10 = vadd.f32 %v5664_v63, %v5527_v49 }
 0x497   : > { %v5708_v28 = vadd.f32 %v8711_v1, %v5665_v10 }
 0x499   : > { %v5740_v9 = vmax.f32 %v5708_v28, 0.0 }
 0x49b   : > { %5772 = vst [vmem:[%s8725_s21 + $0xd8] sm:$0xff] %v5740_v9 }
 0x49c   : > { %v5667_v26 = vpop.f32.mrf.mxu3 }
 0x49d   : > { %v5668_v55 = vadd.f32 %v5667_v26, %v5530_v36 }
 0x49f   : > { %v5709_v8 = vadd.f32 %v8711_v1, %v5668_v55 }
 0x4a1   : > { %v5741_v20 = vmax.f32 %v5709_v8, 0.0 }
 0x4a3   : > { %5773 = vst [vmem:[%s8725_s21 + $0xe0] sm:$0xff] %v5741_v20 }
 0x4a4   : > { %v5669_v16 = vpop.f32.mrf.mxu3 }
 0x4a5   : > { %v5670_v39 = vadd.f32 %v5669_v16, %v5532_v50 }
 0x4a7   : > { %v5710_v24 = vadd.f32 %v8711_v1, %v5670_v39 }
 0x4a9   : > { %v5742_v30 = vmax.f32 %v5710_v24, 0.0 }
 0x4ab   : > { %5774 = vst [vmem:[%s8725_s21 + $0xe8] sm:$0xff] %v5742_v30 }
 0x4ac   : > { %v5672_v51 = vpop.f32.mrf.mxu3 }
 0x4ad   : > { %v5673_v43 = vadd.f32 %v5672_v51, %v5535_v32 }
 0x4af   : > { %v5711_v29 = vadd.f32 %v8711_v1, %v5673_v43 }
 0x4b1   : > { %v5743_v59 = vmax.f32 %v5711_v29, 0.0 }
 0x4b3   : > { %5775 = vst [vmem:[%s8725_s21 + $0xf0] sm:$0xff] %v5743_v59 }
 0x4b4   : > { %v5674_v5 = vpop.f32.mrf.mxu3 }
 0x4b5   : > { %v5675_v46 = vadd.f32 %v5674_v5, %v5537_v12 }
 0x4b7   : > { %v5712_v6 = vadd.f32 %v8711_v1, %v5675_v46 }
 0x4b9   : > { %v5744_v56 = vmax.f32 %v5712_v6, 0.0 }
 0x4bb   : > { %5776 = vst [vmem:[%s8725_s21 + $0xf8] sm:$0xff] %v5744_v56 }
 0x4bc PF: > { %s18_s27 = sadd.s32 1, %s6813_s27  }
 0x4bd   : > { %p15_p4 = scmp.ge.s32.totalorder %s18_s27, 4  }
 0x4bf   :  { %17 = sbr.rel (!%p15_p4) target bundleno = 1 (0x1), region = 93 }

</bundles_post_ra>
